<compile_context>
chip_gen: v5e
topology: v5e:2x2
jax: 0.10.0
libtpu: 0.0.40
codegen_flags: <defaults>
</compile_context>

<pallas_src>
import functools

import jax
import jax.numpy as jnp
from jax import lax
from jax.experimental import pallas as pl
from jax.experimental.pallas import tpu as pltpu

# ---------------------------------------------------------------------------
# Static LeNet geometry (flattened-spatial "wide domain" widths).
# ---------------------------------------------------------------------------
H0 = W0 = 32            # input spatial
C0 = 3                  # real input channels
CP0 = 16                # input channels padded to one bf16 sublane tile
C1, C2 = 16, 32
K = 5
NFC1, NFC2 = 120, 84

# conv1 output at flat p = 32*oh + ow reads x[p + 32*ki + kj]   (max off 132)
# pool1  at p reads conv1[p + {0,1,32,33}]
# conv2  at r = 64*oh2 + 2*ow2 reads pool1[r + 64*ki + 2*kj]    (max off 264)
# pool2  at r reads conv2[r + {0,2,64,66}]
WC1 = 892   # 892 + 132 = 1024 (full flattened 32x32 image)
WP1 = 859   # 859 + 33  = 892
WC2 = 595   # 595 + 264 = 859
WP2 = 529   # 529 + 66  = 595  (valid pool2 positions: r = 128*h + 4*w, h,w < 5)


# ---------------------------------------------------------------------------
# Fused kernel: TB images per grid step.
# ---------------------------------------------------------------------------
def _lenet_kernel(x_ref, w1_ref, b1_ref, w2_ref, b2_ref, sel_ref,
                  f1w_ref, f1b_ref, f2w_ref, f2b_ref, f3w_ref, f3b_ref,
                  out_ref, feat_ref, *, tb):
    # ---- conv/pool feature extractor, one image at a time ----
    def conv_body(t, carry):
        x = x_ref[t]                                               # (16, 1024) bf16

        # conv1: stack the 25 shifted windows along the contraction dim.
        rhs1 = jnp.concatenate(
            [x[:, ki * W0 + kj: ki * W0 + kj + WC1]
             for ki in range(K) for kj in range(K)], axis=0)       # (400, WC1) bf16
        a1 = jnp.dot(w1_ref[...], rhs1,
                     preferred_element_type=jnp.float32)           # (16, WC1) f32
        a1 = jnp.maximum(a1 + b1_ref[...], 0.0)

        # maxpool1 2x2/2: elementwise max of 4 shifted slices.
        p1 = jnp.maximum(
            jnp.maximum(a1[:, 0:WP1], a1[:, 1:1 + WP1]),
            jnp.maximum(a1[:, W0:W0 + WP1], a1[:, W0 + 1:W0 + 1 + WP1]))
        p1 = p1.astype(jnp.bfloat16)                               # (16, WP1)

        # conv2: same stacking trick on the stride-(64,2) sub-grid.
        rhs2 = jnp.concatenate(
            [p1[:, 2 * W0 * ki + 2 * kj: 2 * W0 * ki + 2 * kj + WC2]
             for ki in range(K) for kj in range(K)], axis=0)       # (400, WC2) bf16
        a2 = jnp.dot(w2_ref[...], rhs2,
                     preferred_element_type=jnp.float32)           # (32, WC2) f32
        a2 = jnp.maximum(a2 + b2_ref[...], 0.0)

        # maxpool2 2x2/2: shifts {0, 2, 64, 66}.
        p2 = jnp.maximum(
            jnp.maximum(a2[:, 0:WP2], a2[:, 2:2 + WP2]),
            jnp.maximum(a2[:, 2 * W0:2 * W0 + WP2],
                        a2[:, 2 * W0 + 2:2 * W0 + 2 + WP2]))       # (32, WP2) f32

        # compact the 25 valid spatial positions per channel (0/1 selection matmul).
        feat = jnp.dot(p2.astype(jnp.bfloat16), sel_ref[...],
                       preferred_element_type=jnp.float32)         # (32, 25) f32
        feat_ref[t] = feat
        return carry

    lax.fori_loop(0, tb, conv_body, 0)

    # ---- classifier, batched over the TB images of this grid step ----
    h = jnp.zeros((tb, NFC1), jnp.float32)
    for c in range(C2):                 # fc1: contract over (channel, spatial)
        fc = feat_ref[:, c, :].astype(jnp.bfloat16)                # (tb, 25)
        h = h + jnp.dot(fc, f1w_ref[c], preferred_element_type=jnp.float32)
    h = jnp.maximum(h + f1b_ref[...], 0.0)                         # (tb, 120)

    h = jnp.dot(h.astype(jnp.bfloat16), f2w_ref[...],
                preferred_element_type=jnp.float32)
    h = jnp.maximum(h + f2b_ref[...], 0.0)                         # (tb, 84)

    o = jnp.dot(h.astype(jnp.bfloat16), f3w_ref[...],
                preferred_element_type=jnp.float32)
    out_ref[...] = o + f3b_ref[...]                                # (tb, 128) lane-dense


# ---------------------------------------------------------------------------
# Wrapper: one-time weight layout prep + the fused pallas_call.
# ---------------------------------------------------------------------------
def _prep_params(p):
    nc = p["fc3_w"].shape[1]
    ncp = ((nc + 127) // 128) * 128
    # conv1: (O,I,Kh,Kw) -> (O,Kh,Kw,Ipad) -> (O, 25*16); column = tap*16 + cin.
    w1 = jnp.transpose(p["conv1_w"], (0, 2, 3, 1))
    w1 = jnp.pad(w1, ((0, 0), (0, 0), (0, 0), (0, CP0 - C0)))
    w1s = w1.reshape(C1, K * K * CP0).astype(jnp.bfloat16)           # (16, 400)
    w2s = jnp.transpose(p["conv2_w"], (0, 2, 3, 1)).reshape(
        C2, K * K * C1).astype(jnp.bfloat16)                         # (32, 400)
    b1 = p["conv1_b"].reshape(C1, 1).astype(jnp.float32)
    b2 = p["conv2_b"].reshape(C2, 1).astype(jnp.float32)
    # 0/1 selection matrix: column j = h*5 + w picks flat pool2 position 128*h + 4*w.
    j = jnp.arange(25)
    r_t = 128 * (j // 5) + 4 * (j % 5)
    sel = (jnp.arange(WP2)[:, None] == r_t[None, :]).astype(jnp.bfloat16)
    f1w = p["fc1_w"].reshape(C2, 25, NFC1).astype(jnp.bfloat16)      # NCHW flatten order
    f1b = p["fc1_b"].reshape(1, -1).astype(jnp.float32)
    f2w = p["fc2_w"].astype(jnp.bfloat16)
    f2b = p["fc2_b"].reshape(1, -1).astype(jnp.float32)
    # fc3 padded to a lane-dense 128-wide output (zero columns beyond num_classes).
    f3w = jnp.zeros((NFC2, ncp), jnp.bfloat16).at[:, :nc].set(
        p["fc3_w"].astype(jnp.bfloat16))
    f3b = jnp.zeros((1, ncp), jnp.float32).at[:, :nc].set(
        p["fc3_b"].astype(jnp.float32))
    return (w1s, b1, w2s, b2, sel, f1w, f1b, f2w, f2b, f3w, f3b)


def lenet_forward(x, params, block_b=8):
    B = x.shape[0]
    nc = params["fc3_w"].shape[1]
    ncp = ((nc + 127) // 128) * 128
    tb = max(1, min(block_b, B))
    bp = ((B + tb - 1) // tb) * tb                    # batch padded to TB multiple

    # bf16 images, channels padded 3 -> 16, reshaped to (num_blocks, TB, 16, 1024).
    xf = x.reshape(B, C0, H0 * W0).astype(jnp.bfloat16)
    xf = jnp.pad(xf, ((0, bp - B), (0, CP0 - C0), (0, 0)))
    xf = xf.reshape(bp // tb, tb, CP0, H0 * W0)

    consts = _prep_params(params)

    def resident(a):
        n = a.ndim
        return pl.BlockSpec(a.shape, lambda b, n=n: (0,) * n)

    in_specs = ([pl.BlockSpec((None, tb, CP0, H0 * W0), lambda b: (b, 0, 0, 0))]
                + [resident(a) for a in consts])

    flops_per_img = 2 * (C1 * (K * K * CP0) * WC1 + C2 * (K * K * C1) * WC2
                         + C2 * WP2 * 25 + C2 * 25 * NFC1 + NFC1 * NFC2
                         + NFC2 * ncp)
    bytes_accessed = int(xf.size * xf.dtype.itemsize + bp * ncp * 4
                         + sum(a.size * a.dtype.itemsize for a in consts))

    out = pl.pallas_call(
        functools.partial(_lenet_kernel, tb=tb),
        out_shape=jax.ShapeDtypeStruct((bp // tb, tb, ncp), jnp.float32),
        grid=(bp // tb,),
        in_specs=in_specs,
        out_specs=pl.BlockSpec((None, tb, ncp), lambda b: (b, 0, 0)),
        scratch_shapes=[pltpu.VMEM((tb, C2, 25), jnp.float32)],
        compiler_params=pltpu.CompilerParams(
            dimension_semantics=("parallel",),
            vmem_limit_bytes=32 * 1024 * 1024),
        cost_estimate=pl.CostEstimate(flops=flops_per_img * bp,
                                      transcendentals=0,
                                      bytes_accessed=bytes_accessed),
    )(xf, *consts)
    return out.reshape(bp, ncp)[:B, :nc]


# ---------------------------------------------------------------------------
# Params (PyTorch layout / PyTorch default init) and a pure-JAX reference.
# ---------------------------------------------------------------------------
def init_params(key, num_classes=10):
    ks = jax.random.split(key, 10)

    def u(k, shape, fan_in):
        bound = 1.0 / jnp.sqrt(fan_in)
        return jax.random.uniform(k, shape, jnp.float32, -bound, bound)

    return {
        "conv1_w": u(ks[0], (C1, C0, K, K), C0 * K * K),
        "conv1_b": u(ks[1], (C1,), C0 * K * K),
        "conv2_w": u(ks[2], (C2, C1, K, K), C1 * K * K),
        "conv2_b": u(ks[3], (C2,), C1 * K * K),
        "fc1_w": u(ks[4], (C2 * 5 * 5, NFC1), C2 * 5 * 5),   # stored as (in, out)
        "fc1_b": u(ks[5], (NFC1,), C2 * 5 * 5),
        "fc2_w": u(ks[6], (NFC1, NFC2), NFC1),
        "fc2_b": u(ks[7], (NFC2,), NFC1),
        "fc3_w": u(ks[8], (NFC2, num_classes), NFC2),
        "fc3_b": u(ks[9], (num_classes,), NFC2),
    }


def _lenet_reference(x, p):
    dn = ("NCHW", "OIHW", "NCHW")
    y = jax.lax.conv_general_dilated(x, p["conv1_w"], (1, 1), "VALID",
                                     dimension_numbers=dn)
    y = jnp.maximum(y + p["conv1_b"][None, :, None, None], 0.0)
    y = jax.lax.reduce_window(y, -jnp.inf, jax.lax.max,
                              (1, 1, 2, 2), (1, 1, 2, 2), "VALID")
    y = jax.lax.conv_general_dilated(y, p["conv2_w"], (1, 1), "VALID",
                                     dimension_numbers=dn)
    y = jnp.maximum(y + p["conv2_b"][None, :, None, None], 0.0)
    y = jax.lax.reduce_window(y, -jnp.inf, jax.lax.max,
                              (1, 1, 2, 2), (1, 1, 2, 2), "VALID")
    y = y.reshape(y.shape[0], -1)                     # NCHW flatten -> (B, 800)
    y = jnp.maximum(y @ p["fc1_w"] + p["fc1_b"], 0.0)
    y = jnp.maximum(y @ p["fc2_w"] + p["fc2_b"], 0.0)
    return y @ p["fc3_w"] + p["fc3_b"]


if __name__ == "__main__":
    key = jax.random.PRNGKey(0)
    k_params, k_x = jax.random.split(key)
    params = init_params(k_params, num_classes=10)
    # 3x32x32 input is required by the module (32*5*5 = 800 flatten size).
    # B=5 with block_b=4 exercises batch padding and a 2-step parallel grid.
    x = jax.random.normal(k_x, (5, 3, 32, 32), jnp.float32)

    fwd = jax.jit(functools.partial(lenet_forward, block_b=4))
    out = jax.block_until_ready(fwd(x, params))
    assert out.shape == (5, 10) and out.dtype == jnp.float32

    ref = jax.block_until_ready(_lenet_reference(x, params))
    err = float(jnp.max(jnp.abs(out - ref)))
    # bf16 matmul operands (f32 accumulation) -> slightly looser tolerance than f32.
    assert err < 1e-1, f"mismatch vs reference: max abs err = {err}"
    print("KERNEL_OK")
</pallas_src>

<mosaic_0001>
module attributes {stable_mosaic.version = 11 : i64} {
  func.func @_lenet_kernel(%arg0: i32, %arg1: memref<1x4x16x1024xbf16, #tpu.memory_space<vmem>>, %arg2: memref<16x400xbf16, #tpu.memory_space<vmem>>, %arg3: memref<16x1xf32, #tpu.memory_space<vmem>>, %arg4: memref<32x400xbf16, #tpu.memory_space<vmem>>, %arg5: memref<32x1xf32, #tpu.memory_space<vmem>>, %arg6: memref<529x25xbf16, #tpu.memory_space<vmem>>, %arg7: memref<32x25x120xbf16, #tpu.memory_space<vmem>>, %arg8: memref<1x120xf32, #tpu.memory_space<vmem>>, %arg9: memref<120x84xbf16, #tpu.memory_space<vmem>>, %arg10: memref<1x84xf32, #tpu.memory_space<vmem>>, %arg11: memref<84x128xbf16, #tpu.memory_space<vmem>>, %arg12: memref<1x128xf32, #tpu.memory_space<vmem>>, %arg13: memref<1x4x128xf32, #tpu.memory_space<vmem>>, %arg14: memref<4x32x25xf32, #tpu.memory_space<vmem>>) attributes {dimension_semantics = [#tpu.dimension_semantics<parallel>], iteration_bounds = array<i64: 2>, scalar_prefetch = 0 : i64, scratch_operands = 1 : i64, tpu.core_type = #tpu.core_type<tc>, window_params = [{transform_indices = @transform_0, window_bounds = array<i64: 1, 4, 16, 1024>}, {pipeline_mode = #tpu.pipeline_mode<synchronous>, transform_indices = @transform_1, window_bounds = array<i64: 16, 400>}, {pipeline_mode = #tpu.pipeline_mode<synchronous>, transform_indices = @transform_2, window_bounds = array<i64: 16, 1>}, {pipeline_mode = #tpu.pipeline_mode<synchronous>, transform_indices = @transform_3, window_bounds = array<i64: 32, 400>}, {pipeline_mode = #tpu.pipeline_mode<synchronous>, transform_indices = @transform_4, window_bounds = array<i64: 32, 1>}, {pipeline_mode = #tpu.pipeline_mode<synchronous>, transform_indices = @transform_5, window_bounds = array<i64: 529, 25>}, {pipeline_mode = #tpu.pipeline_mode<synchronous>, transform_indices = @transform_6, window_bounds = array<i64: 32, 25, 120>}, {pipeline_mode = #tpu.pipeline_mode<synchronous>, transform_indices = @transform_7, window_bounds = array<i64: 1, 120>}, {pipeline_mode = #tpu.pipeline_mode<synchronous>, transform_indices = @transform_8, window_bounds = array<i64: 120, 84>}, {pipeline_mode = #tpu.pipeline_mode<synchronous>, transform_indices = @transform_9, window_bounds = array<i64: 1, 84>}, {pipeline_mode = #tpu.pipeline_mode<synchronous>, transform_indices = @transform_10, window_bounds = array<i64: 84, 128>}, {pipeline_mode = #tpu.pipeline_mode<synchronous>, transform_indices = @transform_11, window_bounds = array<i64: 1, 128>}, {transform_indices = @transform_12, window_bounds = array<i64: 1, 4, 128>}]} {
    %c0_i32 = arith.constant 0 : i32
    %c4_i32 = arith.constant 4 : i32
    %0 = arith.addi %c0_i32, %c4_i32 : i32
    %c1_i32 = arith.constant 1 : i32
    scf.for %arg15 = %c0_i32 to %0 step %c1_i32  : i32 {
      %c0_210 = arith.constant 0 : index
      %248 = arith.index_cast %arg15 : i32 to index
      %c0_211 = arith.constant 0 : index
      %c0_212 = arith.constant 0 : index
      %249 = vector.load %arg1[%c0_210, %248, %c0_211, %c0_212] : memref<1x4x16x1024xbf16, #tpu.memory_space<vmem>>, vector<1x1x16x1024xbf16>
      %250 = vector.shape_cast %249 : vector<1x1x16x1024xbf16> to vector<16x1024xbf16>
      %251 = vector.extract_strided_slice %250 {offsets = [0, 0], sizes = [16, 892], strides = [1, 1]} : vector<16x1024xbf16> to vector<16x892xbf16>
      %252 = vector.extract_strided_slice %250 {offsets = [0, 1], sizes = [16, 892], strides = [1, 1]} : vector<16x1024xbf16> to vector<16x892xbf16>
      %253 = vector.extract_strided_slice %250 {offsets = [0, 2], sizes = [16, 892], strides = [1, 1]} : vector<16x1024xbf16> to vector<16x892xbf16>
      %254 = vector.extract_strided_slice %250 {offsets = [0, 3], sizes = [16, 892], strides = [1, 1]} : vector<16x1024xbf16> to vector<16x892xbf16>
      %255 = vector.extract_strided_slice %250 {offsets = [0, 4], sizes = [16, 892], strides = [1, 1]} : vector<16x1024xbf16> to vector<16x892xbf16>
      %256 = vector.extract_strided_slice %250 {offsets = [0, 32], sizes = [16, 892], strides = [1, 1]} : vector<16x1024xbf16> to vector<16x892xbf16>
      %257 = vector.extract_strided_slice %250 {offsets = [0, 33], sizes = [16, 892], strides = [1, 1]} : vector<16x1024xbf16> to vector<16x892xbf16>
      %258 = vector.extract_strided_slice %250 {offsets = [0, 34], sizes = [16, 892], strides = [1, 1]} : vector<16x1024xbf16> to vector<16x892xbf16>
      %259 = vector.extract_strided_slice %250 {offsets = [0, 35], sizes = [16, 892], strides = [1, 1]} : vector<16x1024xbf16> to vector<16x892xbf16>
      %260 = vector.extract_strided_slice %250 {offsets = [0, 36], sizes = [16, 892], strides = [1, 1]} : vector<16x1024xbf16> to vector<16x892xbf16>
      %261 = vector.extract_strided_slice %250 {offsets = [0, 64], sizes = [16, 892], strides = [1, 1]} : vector<16x1024xbf16> to vector<16x892xbf16>
      %262 = vector.extract_strided_slice %250 {offsets = [0, 65], sizes = [16, 892], strides = [1, 1]} : vector<16x1024xbf16> to vector<16x892xbf16>
      %263 = vector.extract_strided_slice %250 {offsets = [0, 66], sizes = [16, 892], strides = [1, 1]} : vector<16x1024xbf16> to vector<16x892xbf16>
      %264 = vector.extract_strided_slice %250 {offsets = [0, 67], sizes = [16, 892], strides = [1, 1]} : vector<16x1024xbf16> to vector<16x892xbf16>
      %265 = vector.extract_strided_slice %250 {offsets = [0, 68], sizes = [16, 892], strides = [1, 1]} : vector<16x1024xbf16> to vector<16x892xbf16>
      %266 = vector.extract_strided_slice %250 {offsets = [0, 96], sizes = [16, 892], strides = [1, 1]} : vector<16x1024xbf16> to vector<16x892xbf16>
      %267 = vector.extract_strided_slice %250 {offsets = [0, 97], sizes = [16, 892], strides = [1, 1]} : vector<16x1024xbf16> to vector<16x892xbf16>
      %268 = vector.extract_strided_slice %250 {offsets = [0, 98], sizes = [16, 892], strides = [1, 1]} : vector<16x1024xbf16> to vector<16x892xbf16>
      %269 = vector.extract_strided_slice %250 {offsets = [0, 99], sizes = [16, 892], strides = [1, 1]} : vector<16x1024xbf16> to vector<16x892xbf16>
      %270 = vector.extract_strided_slice %250 {offsets = [0, 100], sizes = [16, 892], strides = [1, 1]} : vector<16x1024xbf16> to vector<16x892xbf16>
      %271 = vector.extract_strided_slice %250 {offsets = [0, 128], sizes = [16, 892], strides = [1, 1]} : vector<16x1024xbf16> to vector<16x892xbf16>
      %272 = vector.extract_strided_slice %250 {offsets = [0, 129], sizes = [16, 892], strides = [1, 1]} : vector<16x1024xbf16> to vector<16x892xbf16>
      %273 = vector.extract_strided_slice %250 {offsets = [0, 130], sizes = [16, 892], strides = [1, 1]} : vector<16x1024xbf16> to vector<16x892xbf16>
      %274 = vector.extract_strided_slice %250 {offsets = [0, 131], sizes = [16, 892], strides = [1, 1]} : vector<16x1024xbf16> to vector<16x892xbf16>
      %275 = vector.extract_strided_slice %250 {offsets = [0, 132], sizes = [16, 892], strides = [1, 1]} : vector<16x1024xbf16> to vector<16x892xbf16>
      %276 = tpu.concatenate %251, %252, %253, %254, %255, %256, %257, %258, %259, %260, %261, %262, %263, %264, %265, %266 in 0 : vector<16x892xbf16>, vector<16x892xbf16>, vector<16x892xbf16>, vector<16x892xbf16>, vector<16x892xbf16>, vector<16x892xbf16>, vector<16x892xbf16>, vector<16x892xbf16>, vector<16x892xbf16>, vector<16x892xbf16>, vector<16x892xbf16>, vector<16x892xbf16>, vector<16x892xbf16>, vector<16x892xbf16>, vector<16x892xbf16>, vector<16x892xbf16> -> vector<256x892xbf16>
      %277 = tpu.concatenate %267, %268, %269, %270, %271, %272, %273, %274, %275 in 0 : vector<16x892xbf16>, vector<16x892xbf16>, vector<16x892xbf16>, vector<16x892xbf16>, vector<16x892xbf16>, vector<16x892xbf16>, vector<16x892xbf16>, vector<16x892xbf16>, vector<16x892xbf16> -> vector<144x892xbf16>
      %278 = tpu.concatenate %276, %277 in 0 : vector<256x892xbf16>, vector<144x892xbf16> -> vector<400x892xbf16>
      %c0_213 = arith.constant 0 : index
      %c0_214 = arith.constant 0 : index
      %279 = vector.load %arg2[%c0_213, %c0_214] : memref<16x400xbf16, #tpu.memory_space<vmem>>, vector<16x400xbf16>
      %cst_215 = arith.constant dense<0.000000e+00> : vector<16x892xf32>
      %280 = tpu.matmul %279, %278, %cst_215 {dimension_numbers = #tpu.dot_dimension_numbers<[1], [0], [0], [1], [0, 0, 1, 1], [], []>} : vector<16x400xbf16>, vector<400x892xbf16>, vector<16x892xf32> -> vector<16x892xf32>
      %c0_216 = arith.constant 0 : index
      %c0_217 = arith.constant 0 : index
      %281 = vector.load %arg3[%c0_216, %c0_217] : memref<16x1xf32, #tpu.memory_space<vmem>>, vector<16x1xf32>
      %282 = vector.broadcast %281 : vector<16x1xf32> to vector<16x892xf32>
      %283 = arith.addf %280, %282 : vector<16x892xf32>
      %cst_218 = arith.constant 0.000000e+00 : f32
      %284 = vector.broadcast %cst_218 : f32 to vector<16x892xf32>
      %285 = arith.maximumf %283, %284 : vector<16x892xf32>
      %286 = vector.extract_strided_slice %285 {offsets = [0, 0], sizes = [16, 859], strides = [1, 1]} : vector<16x892xf32> to vector<16x859xf32>
      %287 = vector.extract_strided_slice %285 {offsets = [0, 1], sizes = [16, 859], strides = [1, 1]} : vector<16x892xf32> to vector<16x859xf32>
      %288 = arith.maximumf %286, %287 : vector<16x859xf32>
      %289 = vector.extract_strided_slice %285 {offsets = [0, 32], sizes = [16, 859], strides = [1, 1]} : vector<16x892xf32> to vector<16x859xf32>
      %290 = vector.extract_strided_slice %285 {offsets = [0, 33], sizes = [16, 859], strides = [1, 1]} : vector<16x892xf32> to vector<16x859xf32>
      %291 = arith.maximumf %289, %290 : vector<16x859xf32>
      %292 = arith.maximumf %288, %291 : vector<16x859xf32>
      %293 = arith.truncf %292 : vector<16x859xf32> to vector<16x859xbf16>
      %294 = vector.extract_strided_slice %293 {offsets = [0, 0], sizes = [16, 595], strides = [1, 1]} : vector<16x859xbf16> to vector<16x595xbf16>
      %295 = vector.extract_strided_slice %293 {offsets = [0, 2], sizes = [16, 595], strides = [1, 1]} : vector<16x859xbf16> to vector<16x595xbf16>
      %296 = vector.extract_strided_slice %293 {offsets = [0, 4], sizes = [16, 595], strides = [1, 1]} : vector<16x859xbf16> to vector<16x595xbf16>
      %297 = vector.extract_strided_slice %293 {offsets = [0, 6], sizes = [16, 595], strides = [1, 1]} : vector<16x859xbf16> to vector<16x595xbf16>
      %298 = vector.extract_strided_slice %293 {offsets = [0, 8], sizes = [16, 595], strides = [1, 1]} : vector<16x859xbf16> to vector<16x595xbf16>
      %299 = vector.extract_strided_slice %293 {offsets = [0, 64], sizes = [16, 595], strides = [1, 1]} : vector<16x859xbf16> to vector<16x595xbf16>
      %300 = vector.extract_strided_slice %293 {offsets = [0, 66], sizes = [16, 595], strides = [1, 1]} : vector<16x859xbf16> to vector<16x595xbf16>
      %301 = vector.extract_strided_slice %293 {offsets = [0, 68], sizes = [16, 595], strides = [1, 1]} : vector<16x859xbf16> to vector<16x595xbf16>
      %302 = vector.extract_strided_slice %293 {offsets = [0, 70], sizes = [16, 595], strides = [1, 1]} : vector<16x859xbf16> to vector<16x595xbf16>
      %303 = vector.extract_strided_slice %293 {offsets = [0, 72], sizes = [16, 595], strides = [1, 1]} : vector<16x859xbf16> to vector<16x595xbf16>
      %304 = vector.extract_strided_slice %293 {offsets = [0, 128], sizes = [16, 595], strides = [1, 1]} : vector<16x859xbf16> to vector<16x595xbf16>
      %305 = vector.extract_strided_slice %293 {offsets = [0, 130], sizes = [16, 595], strides = [1, 1]} : vector<16x859xbf16> to vector<16x595xbf16>
      %306 = vector.extract_strided_slice %293 {offsets = [0, 132], sizes = [16, 595], strides = [1, 1]} : vector<16x859xbf16> to vector<16x595xbf16>
      %307 = vector.extract_strided_slice %293 {offsets = [0, 134], sizes = [16, 595], strides = [1, 1]} : vector<16x859xbf16> to vector<16x595xbf16>
      %308 = vector.extract_strided_slice %293 {offsets = [0, 136], sizes = [16, 595], strides = [1, 1]} : vector<16x859xbf16> to vector<16x595xbf16>
      %309 = vector.extract_strided_slice %293 {offsets = [0, 192], sizes = [16, 595], strides = [1, 1]} : vector<16x859xbf16> to vector<16x595xbf16>
      %310 = vector.extract_strided_slice %293 {offsets = [0, 194], sizes = [16, 595], strides = [1, 1]} : vector<16x859xbf16> to vector<16x595xbf16>
      %311 = vector.extract_strided_slice %293 {offsets = [0, 196], sizes = [16, 595], strides = [1, 1]} : vector<16x859xbf16> to vector<16x595xbf16>
      %312 = vector.extract_strided_slice %293 {offsets = [0, 198], sizes = [16, 595], strides = [1, 1]} : vector<16x859xbf16> to vector<16x595xbf16>
      %313 = vector.extract_strided_slice %293 {offsets = [0, 200], sizes = [16, 595], strides = [1, 1]} : vector<16x859xbf16> to vector<16x595xbf16>
      %314 = vector.extract_strided_slice %293 {offsets = [0, 256], sizes = [16, 595], strides = [1, 1]} : vector<16x859xbf16> to vector<16x595xbf16>
      %315 = vector.extract_strided_slice %293 {offsets = [0, 258], sizes = [16, 595], strides = [1, 1]} : vector<16x859xbf16> to vector<16x595xbf16>
      %316 = vector.extract_strided_slice %293 {offsets = [0, 260], sizes = [16, 595], strides = [1, 1]} : vector<16x859xbf16> to vector<16x595xbf16>
      %317 = vector.extract_strided_slice %293 {offsets = [0, 262], sizes = [16, 595], strides = [1, 1]} : vector<16x859xbf16> to vector<16x595xbf16>
      %318 = vector.extract_strided_slice %293 {offsets = [0, 264], sizes = [16, 595], strides = [1, 1]} : vector<16x859xbf16> to vector<16x595xbf16>
      %319 = tpu.concatenate %294, %295, %296, %297, %298, %299, %300, %301, %302, %303, %304, %305, %306, %307, %308, %309 in 0 : vector<16x595xbf16>, vector<16x595xbf16>, vector<16x595xbf16>, vector<16x595xbf16>, vector<16x595xbf16>, vector<16x595xbf16>, vector<16x595xbf16>, vector<16x595xbf16>, vector<16x595xbf16>, vector<16x595xbf16>, vector<16x595xbf16>, vector<16x595xbf16>, vector<16x595xbf16>, vector<16x595xbf16>, vector<16x595xbf16>, vector<16x595xbf16> -> vector<256x595xbf16>
      %320 = tpu.concatenate %310, %311, %312, %313, %314, %315, %316, %317, %318 in 0 : vector<16x595xbf16>, vector<16x595xbf16>, vector<16x595xbf16>, vector<16x595xbf16>, vector<16x595xbf16>, vector<16x595xbf16>, vector<16x595xbf16>, vector<16x595xbf16>, vector<16x595xbf16> -> vector<144x595xbf16>
      %321 = tpu.concatenate %319, %320 in 0 : vector<256x595xbf16>, vector<144x595xbf16> -> vector<400x595xbf16>
      %c0_219 = arith.constant 0 : index
      %c0_220 = arith.constant 0 : index
      %322 = vector.load %arg4[%c0_219, %c0_220] : memref<32x400xbf16, #tpu.memory_space<vmem>>, vector<32x400xbf16>
      %cst_221 = arith.constant dense<0.000000e+00> : vector<32x595xf32>
      %323 = tpu.matmul %322, %321, %cst_221 {dimension_numbers = #tpu.dot_dimension_numbers<[1], [0], [0], [1], [0, 0, 1, 1], [], []>} : vector<32x400xbf16>, vector<400x595xbf16>, vector<32x595xf32> -> vector<32x595xf32>
      %c0_222 = arith.constant 0 : index
      %c0_223 = arith.constant 0 : index
      %324 = vector.load %arg5[%c0_222, %c0_223] : memref<32x1xf32, #tpu.memory_space<vmem>>, vector<32x1xf32>
      %325 = vector.broadcast %324 : vector<32x1xf32> to vector<32x595xf32>
      %326 = arith.addf %323, %325 : vector<32x595xf32>
      %cst_224 = arith.constant 0.000000e+00 : f32
      %327 = vector.broadcast %cst_224 : f32 to vector<32x595xf32>
      %328 = arith.maximumf %326, %327 : vector<32x595xf32>
      %329 = vector.extract_strided_slice %328 {offsets = [0, 0], sizes = [32, 529], strides = [1, 1]} : vector<32x595xf32> to vector<32x529xf32>
      %330 = vector.extract_strided_slice %328 {offsets = [0, 2], sizes = [32, 529], strides = [1, 1]} : vector<32x595xf32> to vector<32x529xf32>
      %331 = arith.maximumf %329, %330 : vector<32x529xf32>
      %332 = vector.extract_strided_slice %328 {offsets = [0, 64], sizes = [32, 529], strides = [1, 1]} : vector<32x595xf32> to vector<32x529xf32>
      %333 = vector.extract_strided_slice %328 {offsets = [0, 66], sizes = [32, 529], strides = [1, 1]} : vector<32x595xf32> to vector<32x529xf32>
      %334 = arith.maximumf %332, %333 : vector<32x529xf32>
      %335 = arith.maximumf %331, %334 : vector<32x529xf32>
      %336 = arith.truncf %335 : vector<32x529xf32> to vector<32x529xbf16>
      %c0_225 = arith.constant 0 : index
      %c0_226 = arith.constant 0 : index
      %337 = vector.load %arg6[%c0_225, %c0_226] : memref<529x25xbf16, #tpu.memory_space<vmem>>, vector<529x25xbf16>
      %cst_227 = arith.constant dense<0.000000e+00> : vector<32x25xf32>
      %338 = tpu.matmul %336, %337, %cst_227 {dimension_numbers = #tpu.dot_dimension_numbers<[1], [0], [0], [1], [0, 0, 1, 1], [], []>} : vector<32x529xbf16>, vector<529x25xbf16>, vector<32x25xf32> -> vector<32x25xf32>
      %339 = arith.index_cast %arg15 : i32 to index
      %c0_228 = arith.constant 0 : index
      %c0_229 = arith.constant 0 : index
      %340 = vector.load %arg14[%339, %c0_228, %c0_229] : memref<4x32x25xf32, #tpu.memory_space<vmem>>, vector<1x32x25xf32>
      %341 = vector.shape_cast %340 : vector<1x32x25xf32> to vector<32x25xf32>
      %342 = vector.shape_cast %338 : vector<32x25xf32> to vector<1x32x25xf32>
      tpu.vector_store %arg14[%339, %c0_228, %c0_229], %342 {strides = array<i32>} : memref<4x32x25xf32, #tpu.memory_space<vmem>>, vector<1x32x25xf32>,
    }
    %c4_i32_0 = arith.constant 4 : i32
    %cst = arith.constant 0.000000e+00 : f32
    %1 = vector.broadcast %cst : f32 to vector<4x120xf32>
    %c0 = arith.constant 0 : index
    %c0_1 = arith.constant 0 : index
    %c0_2 = arith.constant 0 : index
    %2 = vector.load %arg14[%c0, %c0_1, %c0_2] : memref<4x32x25xf32, #tpu.memory_space<vmem>>, vector<4x1x25xf32>
    %3 = vector.shape_cast %2 : vector<4x1x25xf32> to vector<4x25xf32>
    %4 = arith.truncf %3 : vector<4x25xf32> to vector<4x25xbf16>
    %c0_3 = arith.constant 0 : index
    %c0_4 = arith.constant 0 : index
    %c0_5 = arith.constant 0 : index
    %5 = vector.load %arg7[%c0_3, %c0_4, %c0_5] : memref<32x25x120xbf16, #tpu.memory_space<vmem>>, vector<1x25x120xbf16>
    %6 = vector.shape_cast %5 : vector<1x25x120xbf16> to vector<25x120xbf16>
    %cst_6 = arith.constant dense<0.000000e+00> : vector<4x120xf32>
    %7 = tpu.matmul %4, %6, %cst_6 {dimension_numbers = #tpu.dot_dimension_numbers<[1], [0], [0], [1], [0, 0, 1, 1], [], []>} : vector<4x25xbf16>, vector<25x120xbf16>, vector<4x120xf32> -> vector<4x120xf32>
    %8 = arith.addf %1, %7 : vector<4x120xf32>
    %c0_7 = arith.constant 0 : index
    %c1 = arith.constant 1 : index
    %c0_8 = arith.constant 0 : index
    %9 = vector.load %arg14[%c0_7, %c1, %c0_8] : memref<4x32x25xf32, #tpu.memory_space<vmem>>, vector<4x1x25xf32>
    %10 = vector.shape_cast %9 : vector<4x1x25xf32> to vector<4x25xf32>
    %11 = arith.truncf %10 : vector<4x25xf32> to vector<4x25xbf16>
    %c1_9 = arith.constant 1 : index
    %c0_10 = arith.constant 0 : index
    %c0_11 = arith.constant 0 : index
    %12 = vector.load %arg7[%c1_9, %c0_10, %c0_11] : memref<32x25x120xbf16, #tpu.memory_space<vmem>>, vector<1x25x120xbf16>
    %13 = vector.shape_cast %12 : vector<1x25x120xbf16> to vector<25x120xbf16>
    %cst_12 = arith.constant dense<0.000000e+00> : vector<4x120xf32>
    %14 = tpu.matmul %11, %13, %cst_12 {dimension_numbers = #tpu.dot_dimension_numbers<[1], [0], [0], [1], [0, 0, 1, 1], [], []>} : vector<4x25xbf16>, vector<25x120xbf16>, vector<4x120xf32> -> vector<4x120xf32>
    %15 = arith.addf %8, %14 : vector<4x120xf32>
    %c0_13 = arith.constant 0 : index
    %c2 = arith.constant 2 : index
    %c0_14 = arith.constant 0 : index
    %16 = vector.load %arg14[%c0_13, %c2, %c0_14] : memref<4x32x25xf32, #tpu.memory_space<vmem>>, vector<4x1x25xf32>
    %17 = vector.shape_cast %16 : vector<4x1x25xf32> to vector<4x25xf32>
    %18 = arith.truncf %17 : vector<4x25xf32> to vector<4x25xbf16>
    %c2_15 = arith.constant 2 : index
    %c0_16 = arith.constant 0 : index
    %c0_17 = arith.constant 0 : index
    %19 = vector.load %arg7[%c2_15, %c0_16, %c0_17] : memref<32x25x120xbf16, #tpu.memory_space<vmem>>, vector<1x25x120xbf16>
    %20 = vector.shape_cast %19 : vector<1x25x120xbf16> to vector<25x120xbf16>
    %cst_18 = arith.constant dense<0.000000e+00> : vector<4x120xf32>
    %21 = tpu.matmul %18, %20, %cst_18 {dimension_numbers = #tpu.dot_dimension_numbers<[1], [0], [0], [1], [0, 0, 1, 1], [], []>} : vector<4x25xbf16>, vector<25x120xbf16>, vector<4x120xf32> -> vector<4x120xf32>
    %22 = arith.addf %15, %21 : vector<4x120xf32>
    %c0_19 = arith.constant 0 : index
    %c3 = arith.constant 3 : index
    %c0_20 = arith.constant 0 : index
    %23 = vector.load %arg14[%c0_19, %c3, %c0_20] : memref<4x32x25xf32, #tpu.memory_space<vmem>>, vector<4x1x25xf32>
    %24 = vector.shape_cast %23 : vector<4x1x25xf32> to vector<4x25xf32>
    %25 = arith.truncf %24 : vector<4x25xf32> to vector<4x25xbf16>
    %c3_21 = arith.constant 3 : index
    %c0_22 = arith.constant 0 : index
    %c0_23 = arith.constant 0 : index
    %26 = vector.load %arg7[%c3_21, %c0_22, %c0_23] : memref<32x25x120xbf16, #tpu.memory_space<vmem>>, vector<1x25x120xbf16>
    %27 = vector.shape_cast %26 : vector<1x25x120xbf16> to vector<25x120xbf16>
    %cst_24 = arith.constant dense<0.000000e+00> : vector<4x120xf32>
    %28 = tpu.matmul %25, %27, %cst_24 {dimension_numbers = #tpu.dot_dimension_numbers<[1], [0], [0], [1], [0, 0, 1, 1], [], []>} : vector<4x25xbf16>, vector<25x120xbf16>, vector<4x120xf32> -> vector<4x120xf32>
    %29 = arith.addf %22, %28 : vector<4x120xf32>
    %c0_25 = arith.constant 0 : index
    %c4 = arith.constant 4 : index
    %c0_26 = arith.constant 0 : index
    %30 = vector.load %arg14[%c0_25, %c4, %c0_26] : memref<4x32x25xf32, #tpu.memory_space<vmem>>, vector<4x1x25xf32>
    %31 = vector.shape_cast %30 : vector<4x1x25xf32> to vector<4x25xf32>
    %32 = arith.truncf %31 : vector<4x25xf32> to vector<4x25xbf16>
    %c4_27 = arith.constant 4 : index
    %c0_28 = arith.constant 0 : index
    %c0_29 = arith.constant 0 : index
    %33 = vector.load %arg7[%c4_27, %c0_28, %c0_29] : memref<32x25x120xbf16, #tpu.memory_space<vmem>>, vector<1x25x120xbf16>
    %34 = vector.shape_cast %33 : vector<1x25x120xbf16> to vector<25x120xbf16>
    %cst_30 = arith.constant dense<0.000000e+00> : vector<4x120xf32>
    %35 = tpu.matmul %32, %34, %cst_30 {dimension_numbers = #tpu.dot_dimension_numbers<[1], [0], [0], [1], [0, 0, 1, 1], [], []>} : vector<4x25xbf16>, vector<25x120xbf16>, vector<4x120xf32> -> vector<4x120xf32>
    %36 = arith.addf %29, %35 : vector<4x120xf32>
    %c0_31 = arith.constant 0 : index
    %c5 = arith.constant 5 : index
    %c0_32 = arith.constant 0 : index
    %37 = vector.load %arg14[%c0_31, %c5, %c0_32] : memref<4x32x25xf32, #tpu.memory_space<vmem>>, vector<4x1x25xf32>
    %38 = vector.shape_cast %37 : vector<4x1x25xf32> to vector<4x25xf32>
    %39 = arith.truncf %38 : vector<4x25xf32> to vector<4x25xbf16>
    %c5_33 = arith.constant 5 : index
    %c0_34 = arith.constant 0 : index
    %c0_35 = arith.constant 0 : index
    %40 = vector.load %arg7[%c5_33, %c0_34, %c0_35] : memref<32x25x120xbf16, #tpu.memory_space<vmem>>, vector<1x25x120xbf16>
    %41 = vector.shape_cast %40 : vector<1x25x120xbf16> to vector<25x120xbf16>
    %cst_36 = arith.constant dense<0.000000e+00> : vector<4x120xf32>
    %42 = tpu.matmul %39, %41, %cst_36 {dimension_numbers = #tpu.dot_dimension_numbers<[1], [0], [0], [1], [0, 0, 1, 1], [], []>} : vector<4x25xbf16>, vector<25x120xbf16>, vector<4x120xf32> -> vector<4x120xf32>
    %43 = arith.addf %36, %42 : vector<4x120xf32>
    %c0_37 = arith.constant 0 : index
    %c6 = arith.constant 6 : index
    %c0_38 = arith.constant 0 : index
    %44 = vector.load %arg14[%c0_37, %c6, %c0_38] : memref<4x32x25xf32, #tpu.memory_space<vmem>>, vector<4x1x25xf32>
    %45 = vector.shape_cast %44 : vector<4x1x25xf32> to vector<4x25xf32>
    %46 = arith.truncf %45 : vector<4x25xf32> to vector<4x25xbf16>
    %c6_39 = arith.constant 6 : index
    %c0_40 = arith.constant 0 : index
    %c0_41 = arith.constant 0 : index
    %47 = vector.load %arg7[%c6_39, %c0_40, %c0_41] : memref<32x25x120xbf16, #tpu.memory_space<vmem>>, vector<1x25x120xbf16>
    %48 = vector.shape_cast %47 : vector<1x25x120xbf16> to vector<25x120xbf16>
    %cst_42 = arith.constant dense<0.000000e+00> : vector<4x120xf32>
    %49 = tpu.matmul %46, %48, %cst_42 {dimension_numbers = #tpu.dot_dimension_numbers<[1], [0], [0], [1], [0, 0, 1, 1], [], []>} : vector<4x25xbf16>, vector<25x120xbf16>, vector<4x120xf32> -> vector<4x120xf32>
    %50 = arith.addf %43, %49 : vector<4x120xf32>
    %c0_43 = arith.constant 0 : index
    %c7 = arith.constant 7 : index
    %c0_44 = arith.constant 0 : index
    %51 = vector.load %arg14[%c0_43, %c7, %c0_44] : memref<4x32x25xf32, #tpu.memory_space<vmem>>, vector<4x1x25xf32>
    %52 = vector.shape_cast %51 : vector<4x1x25xf32> to vector<4x25xf32>
    %53 = arith.truncf %52 : vector<4x25xf32> to vector<4x25xbf16>
    %c7_45 = arith.constant 7 : index
    %c0_46 = arith.constant 0 : index
    %c0_47 = arith.constant 0 : index
    %54 = vector.load %arg7[%c7_45, %c0_46, %c0_47] : memref<32x25x120xbf16, #tpu.memory_space<vmem>>, vector<1x25x120xbf16>
    %55 = vector.shape_cast %54 : vector<1x25x120xbf16> to vector<25x120xbf16>
    %cst_48 = arith.constant dense<0.000000e+00> : vector<4x120xf32>
    %56 = tpu.matmul %53, %55, %cst_48 {dimension_numbers = #tpu.dot_dimension_numbers<[1], [0], [0], [1], [0, 0, 1, 1], [], []>} : vector<4x25xbf16>, vector<25x120xbf16>, vector<4x120xf32> -> vector<4x120xf32>
    %57 = arith.addf %50, %56 : vector<4x120xf32>
    %c0_49 = arith.constant 0 : index
    %c8 = arith.constant 8 : index
    %c0_50 = arith.constant 0 : index
    %58 = vector.load %arg14[%c0_49, %c8, %c0_50] : memref<4x32x25xf32, #tpu.memory_space<vmem>>, vector<4x1x25xf32>
    %59 = vector.shape_cast %58 : vector<4x1x25xf32> to vector<4x25xf32>
    %60 = arith.truncf %59 : vector<4x25xf32> to vector<4x25xbf16>
    %c8_51 = arith.constant 8 : index
    %c0_52 = arith.constant 0 : index
    %c0_53 = arith.constant 0 : index
    %61 = vector.load %arg7[%c8_51, %c0_52, %c0_53] : memref<32x25x120xbf16, #tpu.memory_space<vmem>>, vector<1x25x120xbf16>
    %62 = vector.shape_cast %61 : vector<1x25x120xbf16> to vector<25x120xbf16>
    %cst_54 = arith.constant dense<0.000000e+00> : vector<4x120xf32>
    %63 = tpu.matmul %60, %62, %cst_54 {dimension_numbers = #tpu.dot_dimension_numbers<[1], [0], [0], [1], [0, 0, 1, 1], [], []>} : vector<4x25xbf16>, vector<25x120xbf16>, vector<4x120xf32> -> vector<4x120xf32>
    %64 = arith.addf %57, %63 : vector<4x120xf32>
    %c0_55 = arith.constant 0 : index
    %c9 = arith.constant 9 : index
    %c0_56 = arith.constant 0 : index
    %65 = vector.load %arg14[%c0_55, %c9, %c0_56] : memref<4x32x25xf32, #tpu.memory_space<vmem>>, vector<4x1x25xf32>
    %66 = vector.shape_cast %65 : vector<4x1x25xf32> to vector<4x25xf32>
    %67 = arith.truncf %66 : vector<4x25xf32> to vector<4x25xbf16>
    %c9_57 = arith.constant 9 : index
    %c0_58 = arith.constant 0 : index
    %c0_59 = arith.constant 0 : index
    %68 = vector.load %arg7[%c9_57, %c0_58, %c0_59] : memref<32x25x120xbf16, #tpu.memory_space<vmem>>, vector<1x25x120xbf16>
    %69 = vector.shape_cast %68 : vector<1x25x120xbf16> to vector<25x120xbf16>
    %cst_60 = arith.constant dense<0.000000e+00> : vector<4x120xf32>
    %70 = tpu.matmul %67, %69, %cst_60 {dimension_numbers = #tpu.dot_dimension_numbers<[1], [0], [0], [1], [0, 0, 1, 1], [], []>} : vector<4x25xbf16>, vector<25x120xbf16>, vector<4x120xf32> -> vector<4x120xf32>
    %71 = arith.addf %64, %70 : vector<4x120xf32>
    %c0_61 = arith.constant 0 : index
    %c10 = arith.constant 10 : index
    %c0_62 = arith.constant 0 : index
    %72 = vector.load %arg14[%c0_61, %c10, %c0_62] : memref<4x32x25xf32, #tpu.memory_space<vmem>>, vector<4x1x25xf32>
    %73 = vector.shape_cast %72 : vector<4x1x25xf32> to vector<4x25xf32>
    %74 = arith.truncf %73 : vector<4x25xf32> to vector<4x25xbf16>
    %c10_63 = arith.constant 10 : index
    %c0_64 = arith.constant 0 : index
    %c0_65 = arith.constant 0 : index
    %75 = vector.load %arg7[%c10_63, %c0_64, %c0_65] : memref<32x25x120xbf16, #tpu.memory_space<vmem>>, vector<1x25x120xbf16>
    %76 = vector.shape_cast %75 : vector<1x25x120xbf16> to vector<25x120xbf16>
    %cst_66 = arith.constant dense<0.000000e+00> : vector<4x120xf32>
    %77 = tpu.matmul %74, %76, %cst_66 {dimension_numbers = #tpu.dot_dimension_numbers<[1], [0], [0], [1], [0, 0, 1, 1], [], []>} : vector<4x25xbf16>, vector<25x120xbf16>, vector<4x120xf32> -> vector<4x120xf32>
    %78 = arith.addf %71, %77 : vector<4x120xf32>
    %c0_67 = arith.constant 0 : index
    %c11 = arith.constant 11 : index
    %c0_68 = arith.constant 0 : index
    %79 = vector.load %arg14[%c0_67, %c11, %c0_68] : memref<4x32x25xf32, #tpu.memory_space<vmem>>, vector<4x1x25xf32>
    %80 = vector.shape_cast %79 : vector<4x1x25xf32> to vector<4x25xf32>
    %81 = arith.truncf %80 : vector<4x25xf32> to vector<4x25xbf16>
    %c11_69 = arith.constant 11 : index
    %c0_70 = arith.constant 0 : index
    %c0_71 = arith.constant 0 : index
    %82 = vector.load %arg7[%c11_69, %c0_70, %c0_71] : memref<32x25x120xbf16, #tpu.memory_space<vmem>>, vector<1x25x120xbf16>
    %83 = vector.shape_cast %82 : vector<1x25x120xbf16> to vector<25x120xbf16>
    %cst_72 = arith.constant dense<0.000000e+00> : vector<4x120xf32>
    %84 = tpu.matmul %81, %83, %cst_72 {dimension_numbers = #tpu.dot_dimension_numbers<[1], [0], [0], [1], [0, 0, 1, 1], [], []>} : vector<4x25xbf16>, vector<25x120xbf16>, vector<4x120xf32> -> vector<4x120xf32>
    %85 = arith.addf %78, %84 : vector<4x120xf32>
    %c0_73 = arith.constant 0 : index
    %c12 = arith.constant 12 : index
    %c0_74 = arith.constant 0 : index
    %86 = vector.load %arg14[%c0_73, %c12, %c0_74] : memref<4x32x25xf32, #tpu.memory_space<vmem>>, vector<4x1x25xf32>
    %87 = vector.shape_cast %86 : vector<4x1x25xf32> to vector<4x25xf32>
    %88 = arith.truncf %87 : vector<4x25xf32> to vector<4x25xbf16>
    %c12_75 = arith.constant 12 : index
    %c0_76 = arith.constant 0 : index
    %c0_77 = arith.constant 0 : index
    %89 = vector.load %arg7[%c12_75, %c0_76, %c0_77] : memref<32x25x120xbf16, #tpu.memory_space<vmem>>, vector<1x25x120xbf16>
    %90 = vector.shape_cast %89 : vector<1x25x120xbf16> to vector<25x120xbf16>
    %cst_78 = arith.constant dense<0.000000e+00> : vector<4x120xf32>
    %91 = tpu.matmul %88, %90, %cst_78 {dimension_numbers = #tpu.dot_dimension_numbers<[1], [0], [0], [1], [0, 0, 1, 1], [], []>} : vector<4x25xbf16>, vector<25x120xbf16>, vector<4x120xf32> -> vector<4x120xf32>
    %92 = arith.addf %85, %91 : vector<4x120xf32>
    %c0_79 = arith.constant 0 : index
    %c13 = arith.constant 13 : index
    %c0_80 = arith.constant 0 : index
    %93 = vector.load %arg14[%c0_79, %c13, %c0_80] : memref<4x32x25xf32, #tpu.memory_space<vmem>>, vector<4x1x25xf32>
    %94 = vector.shape_cast %93 : vector<4x1x25xf32> to vector<4x25xf32>
    %95 = arith.truncf %94 : vector<4x25xf32> to vector<4x25xbf16>
    %c13_81 = arith.constant 13 : index
    %c0_82 = arith.constant 0 : index
    %c0_83 = arith.constant 0 : index
    %96 = vector.load %arg7[%c13_81, %c0_82, %c0_83] : memref<32x25x120xbf16, #tpu.memory_space<vmem>>, vector<1x25x120xbf16>
    %97 = vector.shape_cast %96 : vector<1x25x120xbf16> to vector<25x120xbf16>
    %cst_84 = arith.constant dense<0.000000e+00> : vector<4x120xf32>
    %98 = tpu.matmul %95, %97, %cst_84 {dimension_numbers = #tpu.dot_dimension_numbers<[1], [0], [0], [1], [0, 0, 1, 1], [], []>} : vector<4x25xbf16>, vector<25x120xbf16>, vector<4x120xf32> -> vector<4x120xf32>
    %99 = arith.addf %92, %98 : vector<4x120xf32>
    %c0_85 = arith.constant 0 : index
    %c14 = arith.constant 14 : index
    %c0_86 = arith.constant 0 : index
    %100 = vector.load %arg14[%c0_85, %c14, %c0_86] : memref<4x32x25xf32, #tpu.memory_space<vmem>>, vector<4x1x25xf32>
    %101 = vector.shape_cast %100 : vector<4x1x25xf32> to vector<4x25xf32>
    %102 = arith.truncf %101 : vector<4x25xf32> to vector<4x25xbf16>
    %c14_87 = arith.constant 14 : index
    %c0_88 = arith.constant 0 : index
    %c0_89 = arith.constant 0 : index
    %103 = vector.load %arg7[%c14_87, %c0_88, %c0_89] : memref<32x25x120xbf16, #tpu.memory_space<vmem>>, vector<1x25x120xbf16>
    %104 = vector.shape_cast %103 : vector<1x25x120xbf16> to vector<25x120xbf16>
    %cst_90 = arith.constant dense<0.000000e+00> : vector<4x120xf32>
    %105 = tpu.matmul %102, %104, %cst_90 {dimension_numbers = #tpu.dot_dimension_numbers<[1], [0], [0], [1], [0, 0, 1, 1], [], []>} : vector<4x25xbf16>, vector<25x120xbf16>, vector<4x120xf32> -> vector<4x120xf32>
    %106 = arith.addf %99, %105 : vector<4x120xf32>
    %c0_91 = arith.constant 0 : index
    %c15 = arith.constant 15 : index
    %c0_92 = arith.constant 0 : index
    %107 = vector.load %arg14[%c0_91, %c15, %c0_92] : memref<4x32x25xf32, #tpu.memory_space<vmem>>, vector<4x1x25xf32>
    %108 = vector.shape_cast %107 : vector<4x1x25xf32> to vector<4x25xf32>
    %109 = arith.truncf %108 : vector<4x25xf32> to vector<4x25xbf16>
    %c15_93 = arith.constant 15 : index
    %c0_94 = arith.constant 0 : index
    %c0_95 = arith.constant 0 : index
    %110 = vector.load %arg7[%c15_93, %c0_94, %c0_95] : memref<32x25x120xbf16, #tpu.memory_space<vmem>>, vector<1x25x120xbf16>
    %111 = vector.shape_cast %110 : vector<1x25x120xbf16> to vector<25x120xbf16>
    %cst_96 = arith.constant dense<0.000000e+00> : vector<4x120xf32>
    %112 = tpu.matmul %109, %111, %cst_96 {dimension_numbers = #tpu.dot_dimension_numbers<[1], [0], [0], [1], [0, 0, 1, 1], [], []>} : vector<4x25xbf16>, vector<25x120xbf16>, vector<4x120xf32> -> vector<4x120xf32>
    %113 = arith.addf %106, %112 : vector<4x120xf32>
    %c0_97 = arith.constant 0 : index
    %c16 = arith.constant 16 : index
    %c0_98 = arith.constant 0 : index
    %114 = vector.load %arg14[%c0_97, %c16, %c0_98] : memref<4x32x25xf32, #tpu.memory_space<vmem>>, vector<4x1x25xf32>
    %115 = vector.shape_cast %114 : vector<4x1x25xf32> to vector<4x25xf32>
    %116 = arith.truncf %115 : vector<4x25xf32> to vector<4x25xbf16>
    %c16_99 = arith.constant 16 : index
    %c0_100 = arith.constant 0 : index
    %c0_101 = arith.constant 0 : index
    %117 = vector.load %arg7[%c16_99, %c0_100, %c0_101] : memref<32x25x120xbf16, #tpu.memory_space<vmem>>, vector<1x25x120xbf16>
    %118 = vector.shape_cast %117 : vector<1x25x120xbf16> to vector<25x120xbf16>
    %cst_102 = arith.constant dense<0.000000e+00> : vector<4x120xf32>
    %119 = tpu.matmul %116, %118, %cst_102 {dimension_numbers = #tpu.dot_dimension_numbers<[1], [0], [0], [1], [0, 0, 1, 1], [], []>} : vector<4x25xbf16>, vector<25x120xbf16>, vector<4x120xf32> -> vector<4x120xf32>
    %120 = arith.addf %113, %119 : vector<4x120xf32>
    %c0_103 = arith.constant 0 : index
    %c17 = arith.constant 17 : index
    %c0_104 = arith.constant 0 : index
    %121 = vector.load %arg14[%c0_103, %c17, %c0_104] : memref<4x32x25xf32, #tpu.memory_space<vmem>>, vector<4x1x25xf32>
    %122 = vector.shape_cast %121 : vector<4x1x25xf32> to vector<4x25xf32>
    %123 = arith.truncf %122 : vector<4x25xf32> to vector<4x25xbf16>
    %c17_105 = arith.constant 17 : index
    %c0_106 = arith.constant 0 : index
    %c0_107 = arith.constant 0 : index
    %124 = vector.load %arg7[%c17_105, %c0_106, %c0_107] : memref<32x25x120xbf16, #tpu.memory_space<vmem>>, vector<1x25x120xbf16>
    %125 = vector.shape_cast %124 : vector<1x25x120xbf16> to vector<25x120xbf16>
    %cst_108 = arith.constant dense<0.000000e+00> : vector<4x120xf32>
    %126 = tpu.matmul %123, %125, %cst_108 {dimension_numbers = #tpu.dot_dimension_numbers<[1], [0], [0], [1], [0, 0, 1, 1], [], []>} : vector<4x25xbf16>, vector<25x120xbf16>, vector<4x120xf32> -> vector<4x120xf32>
    %127 = arith.addf %120, %126 : vector<4x120xf32>
    %c0_109 = arith.constant 0 : index
    %c18 = arith.constant 18 : index
    %c0_110 = arith.constant 0 : index
    %128 = vector.load %arg14[%c0_109, %c18, %c0_110] : memref<4x32x25xf32, #tpu.memory_space<vmem>>, vector<4x1x25xf32>
    %129 = vector.shape_cast %128 : vector<4x1x25xf32> to vector<4x25xf32>
    %130 = arith.truncf %129 : vector<4x25xf32> to vector<4x25xbf16>
    %c18_111 = arith.constant 18 : index
    %c0_112 = arith.constant 0 : index
    %c0_113 = arith.constant 0 : index
    %131 = vector.load %arg7[%c18_111, %c0_112, %c0_113] : memref<32x25x120xbf16, #tpu.memory_space<vmem>>, vector<1x25x120xbf16>
    %132 = vector.shape_cast %131 : vector<1x25x120xbf16> to vector<25x120xbf16>
    %cst_114 = arith.constant dense<0.000000e+00> : vector<4x120xf32>
    %133 = tpu.matmul %130, %132, %cst_114 {dimension_numbers = #tpu.dot_dimension_numbers<[1], [0], [0], [1], [0, 0, 1, 1], [], []>} : vector<4x25xbf16>, vector<25x120xbf16>, vector<4x120xf32> -> vector<4x120xf32>
    %134 = arith.addf %127, %133 : vector<4x120xf32>
    %c0_115 = arith.constant 0 : index
    %c19 = arith.constant 19 : index
    %c0_116 = arith.constant 0 : index
    %135 = vector.load %arg14[%c0_115, %c19, %c0_116] : memref<4x32x25xf32, #tpu.memory_space<vmem>>, vector<4x1x25xf32>
    %136 = vector.shape_cast %135 : vector<4x1x25xf32> to vector<4x25xf32>
    %137 = arith.truncf %136 : vector<4x25xf32> to vector<4x25xbf16>
    %c19_117 = arith.constant 19 : index
    %c0_118 = arith.constant 0 : index
    %c0_119 = arith.constant 0 : index
    %138 = vector.load %arg7[%c19_117, %c0_118, %c0_119] : memref<32x25x120xbf16, #tpu.memory_space<vmem>>, vector<1x25x120xbf16>
    %139 = vector.shape_cast %138 : vector<1x25x120xbf16> to vector<25x120xbf16>
    %cst_120 = arith.constant dense<0.000000e+00> : vector<4x120xf32>
    %140 = tpu.matmul %137, %139, %cst_120 {dimension_numbers = #tpu.dot_dimension_numbers<[1], [0], [0], [1], [0, 0, 1, 1], [], []>} : vector<4x25xbf16>, vector<25x120xbf16>, vector<4x120xf32> -> vector<4x120xf32>
    %141 = arith.addf %134, %140 : vector<4x120xf32>
    %c0_121 = arith.constant 0 : index
    %c20 = arith.constant 20 : index
    %c0_122 = arith.constant 0 : index
    %142 = vector.load %arg14[%c0_121, %c20, %c0_122] : memref<4x32x25xf32, #tpu.memory_space<vmem>>, vector<4x1x25xf32>
    %143 = vector.shape_cast %142 : vector<4x1x25xf32> to vector<4x25xf32>
    %144 = arith.truncf %143 : vector<4x25xf32> to vector<4x25xbf16>
    %c20_123 = arith.constant 20 : index
    %c0_124 = arith.constant 0 : index
    %c0_125 = arith.constant 0 : index
    %145 = vector.load %arg7[%c20_123, %c0_124, %c0_125] : memref<32x25x120xbf16, #tpu.memory_space<vmem>>, vector<1x25x120xbf16>
    %146 = vector.shape_cast %145 : vector<1x25x120xbf16> to vector<25x120xbf16>
    %cst_126 = arith.constant dense<0.000000e+00> : vector<4x120xf32>
    %147 = tpu.matmul %144, %146, %cst_126 {dimension_numbers = #tpu.dot_dimension_numbers<[1], [0], [0], [1], [0, 0, 1, 1], [], []>} : vector<4x25xbf16>, vector<25x120xbf16>, vector<4x120xf32> -> vector<4x120xf32>
    %148 = arith.addf %141, %147 : vector<4x120xf32>
    %c0_127 = arith.constant 0 : index
    %c21 = arith.constant 21 : index
    %c0_128 = arith.constant 0 : index
    %149 = vector.load %arg14[%c0_127, %c21, %c0_128] : memref<4x32x25xf32, #tpu.memory_space<vmem>>, vector<4x1x25xf32>
    %150 = vector.shape_cast %149 : vector<4x1x25xf32> to vector<4x25xf32>
    %151 = arith.truncf %150 : vector<4x25xf32> to vector<4x25xbf16>
    %c21_129 = arith.constant 21 : index
    %c0_130 = arith.constant 0 : index
    %c0_131 = arith.constant 0 : index
    %152 = vector.load %arg7[%c21_129, %c0_130, %c0_131] : memref<32x25x120xbf16, #tpu.memory_space<vmem>>, vector<1x25x120xbf16>
    %153 = vector.shape_cast %152 : vector<1x25x120xbf16> to vector<25x120xbf16>
    %cst_132 = arith.constant dense<0.000000e+00> : vector<4x120xf32>
    %154 = tpu.matmul %151, %153, %cst_132 {dimension_numbers = #tpu.dot_dimension_numbers<[1], [0], [0], [1], [0, 0, 1, 1], [], []>} : vector<4x25xbf16>, vector<25x120xbf16>, vector<4x120xf32> -> vector<4x120xf32>
    %155 = arith.addf %148, %154 : vector<4x120xf32>
    %c0_133 = arith.constant 0 : index
    %c22 = arith.constant 22 : index
    %c0_134 = arith.constant 0 : index
    %156 = vector.load %arg14[%c0_133, %c22, %c0_134] : memref<4x32x25xf32, #tpu.memory_space<vmem>>, vector<4x1x25xf32>
    %157 = vector.shape_cast %156 : vector<4x1x25xf32> to vector<4x25xf32>
    %158 = arith.truncf %157 : vector<4x25xf32> to vector<4x25xbf16>
    %c22_135 = arith.constant 22 : index
    %c0_136 = arith.constant 0 : index
    %c0_137 = arith.constant 0 : index
    %159 = vector.load %arg7[%c22_135, %c0_136, %c0_137] : memref<32x25x120xbf16, #tpu.memory_space<vmem>>, vector<1x25x120xbf16>
    %160 = vector.shape_cast %159 : vector<1x25x120xbf16> to vector<25x120xbf16>
    %cst_138 = arith.constant dense<0.000000e+00> : vector<4x120xf32>
    %161 = tpu.matmul %158, %160, %cst_138 {dimension_numbers = #tpu.dot_dimension_numbers<[1], [0], [0], [1], [0, 0, 1, 1], [], []>} : vector<4x25xbf16>, vector<25x120xbf16>, vector<4x120xf32> -> vector<4x120xf32>
    %162 = arith.addf %155, %161 : vector<4x120xf32>
    %c0_139 = arith.constant 0 : index
    %c23 = arith.constant 23 : index
    %c0_140 = arith.constant 0 : index
    %163 = vector.load %arg14[%c0_139, %c23, %c0_140] : memref<4x32x25xf32, #tpu.memory_space<vmem>>, vector<4x1x25xf32>
    %164 = vector.shape_cast %163 : vector<4x1x25xf32> to vector<4x25xf32>
    %165 = arith.truncf %164 : vector<4x25xf32> to vector<4x25xbf16>
    %c23_141 = arith.constant 23 : index
    %c0_142 = arith.constant 0 : index
    %c0_143 = arith.constant 0 : index
    %166 = vector.load %arg7[%c23_141, %c0_142, %c0_143] : memref<32x25x120xbf16, #tpu.memory_space<vmem>>, vector<1x25x120xbf16>
    %167 = vector.shape_cast %166 : vector<1x25x120xbf16> to vector<25x120xbf16>
    %cst_144 = arith.constant dense<0.000000e+00> : vector<4x120xf32>
    %168 = tpu.matmul %165, %167, %cst_144 {dimension_numbers = #tpu.dot_dimension_numbers<[1], [0], [0], [1], [0, 0, 1, 1], [], []>} : vector<4x25xbf16>, vector<25x120xbf16>, vector<4x120xf32> -> vector<4x120xf32>
    %169 = arith.addf %162, %168 : vector<4x120xf32>
    %c0_145 = arith.constant 0 : index
    %c24 = arith.constant 24 : index
    %c0_146 = arith.constant 0 : index
    %170 = vector.load %arg14[%c0_145, %c24, %c0_146] : memref<4x32x25xf32, #tpu.memory_space<vmem>>, vector<4x1x25xf32>
    %171 = vector.shape_cast %170 : vector<4x1x25xf32> to vector<4x25xf32>
    %172 = arith.truncf %171 : vector<4x25xf32> to vector<4x25xbf16>
    %c24_147 = arith.constant 24 : index
    %c0_148 = arith.constant 0 : index
    %c0_149 = arith.constant 0 : index
    %173 = vector.load %arg7[%c24_147, %c0_148, %c0_149] : memref<32x25x120xbf16, #tpu.memory_space<vmem>>, vector<1x25x120xbf16>
    %174 = vector.shape_cast %173 : vector<1x25x120xbf16> to vector<25x120xbf16>
    %cst_150 = arith.constant dense<0.000000e+00> : vector<4x120xf32>
    %175 = tpu.matmul %172, %174, %cst_150 {dimension_numbers = #tpu.dot_dimension_numbers<[1], [0], [0], [1], [0, 0, 1, 1], [], []>} : vector<4x25xbf16>, vector<25x120xbf16>, vector<4x120xf32> -> vector<4x120xf32>
    %176 = arith.addf %169, %175 : vector<4x120xf32>
    %c0_151 = arith.constant 0 : index
    %c25 = arith.constant 25 : index
    %c0_152 = arith.constant 0 : index
    %177 = vector.load %arg14[%c0_151, %c25, %c0_152] : memref<4x32x25xf32, #tpu.memory_space<vmem>>, vector<4x1x25xf32>
    %178 = vector.shape_cast %177 : vector<4x1x25xf32> to vector<4x25xf32>
    %179 = arith.truncf %178 : vector<4x25xf32> to vector<4x25xbf16>
    %c25_153 = arith.constant 25 : index
    %c0_154 = arith.constant 0 : index
    %c0_155 = arith.constant 0 : index
    %180 = vector.load %arg7[%c25_153, %c0_154, %c0_155] : memref<32x25x120xbf16, #tpu.memory_space<vmem>>, vector<1x25x120xbf16>
    %181 = vector.shape_cast %180 : vector<1x25x120xbf16> to vector<25x120xbf16>
    %cst_156 = arith.constant dense<0.000000e+00> : vector<4x120xf32>
    %182 = tpu.matmul %179, %181, %cst_156 {dimension_numbers = #tpu.dot_dimension_numbers<[1], [0], [0], [1], [0, 0, 1, 1], [], []>} : vector<4x25xbf16>, vector<25x120xbf16>, vector<4x120xf32> -> vector<4x120xf32>
    %183 = arith.addf %176, %182 : vector<4x120xf32>
    %c0_157 = arith.constant 0 : index
    %c26 = arith.constant 26 : index
    %c0_158 = arith.constant 0 : index
    %184 = vector.load %arg14[%c0_157, %c26, %c0_158] : memref<4x32x25xf32, #tpu.memory_space<vmem>>, vector<4x1x25xf32>
    %185 = vector.shape_cast %184 : vector<4x1x25xf32> to vector<4x25xf32>
    %186 = arith.truncf %185 : vector<4x25xf32> to vector<4x25xbf16>
    %c26_159 = arith.constant 26 : index
    %c0_160 = arith.constant 0 : index
    %c0_161 = arith.constant 0 : index
    %187 = vector.load %arg7[%c26_159, %c0_160, %c0_161] : memref<32x25x120xbf16, #tpu.memory_space<vmem>>, vector<1x25x120xbf16>
    %188 = vector.shape_cast %187 : vector<1x25x120xbf16> to vector<25x120xbf16>
    %cst_162 = arith.constant dense<0.000000e+00> : vector<4x120xf32>
    %189 = tpu.matmul %186, %188, %cst_162 {dimension_numbers = #tpu.dot_dimension_numbers<[1], [0], [0], [1], [0, 0, 1, 1], [], []>} : vector<4x25xbf16>, vector<25x120xbf16>, vector<4x120xf32> -> vector<4x120xf32>
    %190 = arith.addf %183, %189 : vector<4x120xf32>
    %c0_163 = arith.constant 0 : index
    %c27 = arith.constant 27 : index
    %c0_164 = arith.constant 0 : index
    %191 = vector.load %arg14[%c0_163, %c27, %c0_164] : memref<4x32x25xf32, #tpu.memory_space<vmem>>, vector<4x1x25xf32>
    %192 = vector.shape_cast %191 : vector<4x1x25xf32> to vector<4x25xf32>
    %193 = arith.truncf %192 : vector<4x25xf32> to vector<4x25xbf16>
    %c27_165 = arith.constant 27 : index
    %c0_166 = arith.constant 0 : index
    %c0_167 = arith.constant 0 : index
    %194 = vector.load %arg7[%c27_165, %c0_166, %c0_167] : memref<32x25x120xbf16, #tpu.memory_space<vmem>>, vector<1x25x120xbf16>
    %195 = vector.shape_cast %194 : vector<1x25x120xbf16> to vector<25x120xbf16>
    %cst_168 = arith.constant dense<0.000000e+00> : vector<4x120xf32>
    %196 = tpu.matmul %193, %195, %cst_168 {dimension_numbers = #tpu.dot_dimension_numbers<[1], [0], [0], [1], [0, 0, 1, 1], [], []>} : vector<4x25xbf16>, vector<25x120xbf16>, vector<4x120xf32> -> vector<4x120xf32>
    %197 = arith.addf %190, %196 : vector<4x120xf32>
    %c0_169 = arith.constant 0 : index
    %c28 = arith.constant 28 : index
    %c0_170 = arith.constant 0 : index
    %198 = vector.load %arg14[%c0_169, %c28, %c0_170] : memref<4x32x25xf32, #tpu.memory_space<vmem>>, vector<4x1x25xf32>
    %199 = vector.shape_cast %198 : vector<4x1x25xf32> to vector<4x25xf32>
    %200 = arith.truncf %199 : vector<4x25xf32> to vector<4x25xbf16>
    %c28_171 = arith.constant 28 : index
    %c0_172 = arith.constant 0 : index
    %c0_173 = arith.constant 0 : index
    %201 = vector.load %arg7[%c28_171, %c0_172, %c0_173] : memref<32x25x120xbf16, #tpu.memory_space<vmem>>, vector<1x25x120xbf16>
    %202 = vector.shape_cast %201 : vector<1x25x120xbf16> to vector<25x120xbf16>
    %cst_174 = arith.constant dense<0.000000e+00> : vector<4x120xf32>
    %203 = tpu.matmul %200, %202, %cst_174 {dimension_numbers = #tpu.dot_dimension_numbers<[1], [0], [0], [1], [0, 0, 1, 1], [], []>} : vector<4x25xbf16>, vector<25x120xbf16>, vector<4x120xf32> -> vector<4x120xf32>
    %204 = arith.addf %197, %203 : vector<4x120xf32>
    %c0_175 = arith.constant 0 : index
    %c29 = arith.constant 29 : index
    %c0_176 = arith.constant 0 : index
    %205 = vector.load %arg14[%c0_175, %c29, %c0_176] : memref<4x32x25xf32, #tpu.memory_space<vmem>>, vector<4x1x25xf32>
    %206 = vector.shape_cast %205 : vector<4x1x25xf32> to vector<4x25xf32>
    %207 = arith.truncf %206 : vector<4x25xf32> to vector<4x25xbf16>
    %c29_177 = arith.constant 29 : index
    %c0_178 = arith.constant 0 : index
    %c0_179 = arith.constant 0 : index
    %208 = vector.load %arg7[%c29_177, %c0_178, %c0_179] : memref<32x25x120xbf16, #tpu.memory_space<vmem>>, vector<1x25x120xbf16>
    %209 = vector.shape_cast %208 : vector<1x25x120xbf16> to vector<25x120xbf16>
    %cst_180 = arith.constant dense<0.000000e+00> : vector<4x120xf32>
    %210 = tpu.matmul %207, %209, %cst_180 {dimension_numbers = #tpu.dot_dimension_numbers<[1], [0], [0], [1], [0, 0, 1, 1], [], []>} : vector<4x25xbf16>, vector<25x120xbf16>, vector<4x120xf32> -> vector<4x120xf32>
    %211 = arith.addf %204, %210 : vector<4x120xf32>
    %c0_181 = arith.constant 0 : index
    %c30 = arith.constant 30 : index
    %c0_182 = arith.constant 0 : index
    %212 = vector.load %arg14[%c0_181, %c30, %c0_182] : memref<4x32x25xf32, #tpu.memory_space<vmem>>, vector<4x1x25xf32>
    %213 = vector.shape_cast %212 : vector<4x1x25xf32> to vector<4x25xf32>
    %214 = arith.truncf %213 : vector<4x25xf32> to vector<4x25xbf16>
    %c30_183 = arith.constant 30 : index
    %c0_184 = arith.constant 0 : index
    %c0_185 = arith.constant 0 : index
    %215 = vector.load %arg7[%c30_183, %c0_184, %c0_185] : memref<32x25x120xbf16, #tpu.memory_space<vmem>>, vector<1x25x120xbf16>
    %216 = vector.shape_cast %215 : vector<1x25x120xbf16> to vector<25x120xbf16>
    %cst_186 = arith.constant dense<0.000000e+00> : vector<4x120xf32>
    %217 = tpu.matmul %214, %216, %cst_186 {dimension_numbers = #tpu.dot_dimension_numbers<[1], [0], [0], [1], [0, 0, 1, 1], [], []>} : vector<4x25xbf16>, vector<25x120xbf16>, vector<4x120xf32> -> vector<4x120xf32>
    %218 = arith.addf %211, %217 : vector<4x120xf32>
    %c0_187 = arith.constant 0 : index
    %c31 = arith.constant 31 : index
    %c0_188 = arith.constant 0 : index
    %219 = vector.load %arg14[%c0_187, %c31, %c0_188] : memref<4x32x25xf32, #tpu.memory_space<vmem>>, vector<4x1x25xf32>
    %220 = vector.shape_cast %219 : vector<4x1x25xf32> to vector<4x25xf32>
    %221 = arith.truncf %220 : vector<4x25xf32> to vector<4x25xbf16>
    %c31_189 = arith.constant 31 : index
    %c0_190 = arith.constant 0 : index
    %c0_191 = arith.constant 0 : index
    %222 = vector.load %arg7[%c31_189, %c0_190, %c0_191] : memref<32x25x120xbf16, #tpu.memory_space<vmem>>, vector<1x25x120xbf16>
    %223 = vector.shape_cast %222 : vector<1x25x120xbf16> to vector<25x120xbf16>
    %cst_192 = arith.constant dense<0.000000e+00> : vector<4x120xf32>
    %224 = tpu.matmul %221, %223, %cst_192 {dimension_numbers = #tpu.dot_dimension_numbers<[1], [0], [0], [1], [0, 0, 1, 1], [], []>} : vector<4x25xbf16>, vector<25x120xbf16>, vector<4x120xf32> -> vector<4x120xf32>
    %225 = arith.addf %218, %224 : vector<4x120xf32>
    %c0_193 = arith.constant 0 : index
    %c0_194 = arith.constant 0 : index
    %226 = vector.load %arg8[%c0_193, %c0_194] : memref<1x120xf32, #tpu.memory_space<vmem>>, vector<1x120xf32>
    %227 = vector.broadcast %226 : vector<1x120xf32> to vector<4x120xf32>
    %228 = arith.addf %225, %227 : vector<4x120xf32>
    %cst_195 = arith.constant 0.000000e+00 : f32
    %229 = vector.broadcast %cst_195 : f32 to vector<4x120xf32>
    %230 = arith.maximumf %228, %229 : vector<4x120xf32>
    %231 = arith.truncf %230 : vector<4x120xf32> to vector<4x120xbf16>
    %c0_196 = arith.constant 0 : index
    %c0_197 = arith.constant 0 : index
    %232 = vector.load %arg9[%c0_196, %c0_197] : memref<120x84xbf16, #tpu.memory_space<vmem>>, vector<120x84xbf16>
    %cst_198 = arith.constant dense<0.000000e+00> : vector<4x84xf32>
    %233 = tpu.matmul %231, %232, %cst_198 {dimension_numbers = #tpu.dot_dimension_numbers<[1], [0], [0], [1], [0, 0, 1, 1], [], []>} : vector<4x120xbf16>, vector<120x84xbf16>, vector<4x84xf32> -> vector<4x84xf32>
    %c0_199 = arith.constant 0 : index
    %c0_200 = arith.constant 0 : index
    %234 = vector.load %arg10[%c0_199, %c0_200] : memref<1x84xf32, #tpu.memory_space<vmem>>, vector<1x84xf32>
    %235 = vector.broadcast %234 : vector<1x84xf32> to vector<4x84xf32>
    %236 = arith.addf %233, %235 : vector<4x84xf32>
    %cst_201 = arith.constant 0.000000e+00 : f32
    %237 = vector.broadcast %cst_201 : f32 to vector<4x84xf32>
    %238 = arith.maximumf %236, %237 : vector<4x84xf32>
    %239 = arith.truncf %238 : vector<4x84xf32> to vector<4x84xbf16>
    %c0_202 = arith.constant 0 : index
    %c0_203 = arith.constant 0 : index
    %240 = vector.load %arg11[%c0_202, %c0_203] : memref<84x128xbf16, #tpu.memory_space<vmem>>, vector<84x128xbf16>
    %cst_204 = arith.constant dense<0.000000e+00> : vector<4x128xf32>
    %241 = tpu.matmul %239, %240, %cst_204 {dimension_numbers = #tpu.dot_dimension_numbers<[1], [0], [0], [1], [0, 0, 1, 1], [], []>} : vector<4x84xbf16>, vector<84x128xbf16>, vector<4x128xf32> -> vector<4x128xf32>
    %c0_205 = arith.constant 0 : index
    %c0_206 = arith.constant 0 : index
    %242 = vector.load %arg12[%c0_205, %c0_206] : memref<1x128xf32, #tpu.memory_space<vmem>>, vector<1x128xf32>
    %243 = vector.broadcast %242 : vector<1x128xf32> to vector<4x128xf32>
    %244 = arith.addf %241, %243 : vector<4x128xf32>
    %c0_207 = arith.constant 0 : index
    %c0_208 = arith.constant 0 : index
    %c0_209 = arith.constant 0 : index
    %245 = vector.load %arg13[%c0_207, %c0_208, %c0_209] : memref<1x4x128xf32, #tpu.memory_space<vmem>>, vector<1x4x128xf32>
    %246 = vector.shape_cast %245 : vector<1x4x128xf32> to vector<4x128xf32>
    %247 = vector.shape_cast %244 : vector<4x128xf32> to vector<1x4x128xf32>
    tpu.vector_store %arg13[%c0_207, %c0_208, %c0_209], %247 {strides = array<i32>} : memref<1x4x128xf32, #tpu.memory_space<vmem>>, vector<1x4x128xf32>,
    return
  }
  func.func @transform_0(%arg0: i32) -> (i32, i32, i32, i32) {
    %c0_i32 = arith.constant 0 : i32
    %c0_i32_0 = arith.constant 0 : i32
    %c0_i32_1 = arith.constant 0 : i32
    %c0_i32_2 = arith.constant 0 : i32
    return %arg0, %c0_i32, %c0_i32_0, %c0_i32_1 : i32, i32, i32, i32
  }
  func.func @transform_1(%arg0: i32) -> (i32, i32) {
    %c0_i32 = arith.constant 0 : i32
    %c0_i32_0 = arith.constant 0 : i32
    %c0_i32_1 = arith.constant 0 : i32
    return %c0_i32, %c0_i32_0 : i32, i32
  }
  func.func @transform_2(%arg0: i32) -> (i32, i32) {
    %c0_i32 = arith.constant 0 : i32
    %c0_i32_0 = arith.constant 0 : i32
    %c0_i32_1 = arith.constant 0 : i32
    return %c0_i32, %c0_i32_0 : i32, i32
  }
  func.func @transform_3(%arg0: i32) -> (i32, i32) {
    %c0_i32 = arith.constant 0 : i32
    %c0_i32_0 = arith.constant 0 : i32
    %c0_i32_1 = arith.constant 0 : i32
    return %c0_i32, %c0_i32_0 : i32, i32
  }
  func.func @transform_4(%arg0: i32) -> (i32, i32) {
    %c0_i32 = arith.constant 0 : i32
    %c0_i32_0 = arith.constant 0 : i32
    %c0_i32_1 = arith.constant 0 : i32
    return %c0_i32, %c0_i32_0 : i32, i32
  }
  func.func @transform_5(%arg0: i32) -> (i32, i32) {
    %c0_i32 = arith.constant 0 : i32
    %c0_i32_0 = arith.constant 0 : i32
    %c0_i32_1 = arith.constant 0 : i32
    return %c0_i32, %c0_i32_0 : i32, i32
  }
  func.func @transform_6(%arg0: i32) -> (i32, i32, i32) {
    %c0_i32 = arith.constant 0 : i32
    %c0_i32_0 = arith.constant 0 : i32
    %c0_i32_1 = arith.constant 0 : i32
    %c0_i32_2 = arith.constant 0 : i32
    return %c0_i32, %c0_i32_0, %c0_i32_1 : i32, i32, i32
  }
  func.func @transform_7(%arg0: i32) -> (i32, i32) {
    %c0_i32 = arith.constant 0 : i32
    %c0_i32_0 = arith.constant 0 : i32
    %c0_i32_1 = arith.constant 0 : i32
    return %c0_i32, %c0_i32_0 : i32, i32
  }
  func.func @transform_8(%arg0: i32) -> (i32, i32) {
    %c0_i32 = arith.constant 0 : i32
    %c0_i32_0 = arith.constant 0 : i32
    %c0_i32_1 = arith.constant 0 : i32
    return %c0_i32, %c0_i32_0 : i32, i32
  }
  func.func @transform_9(%arg0: i32) -> (i32, i32) {
    %c0_i32 = arith.constant 0 : i32
    %c0_i32_0 = arith.constant 0 : i32
    %c0_i32_1 = arith.constant 0 : i32
    return %c0_i32, %c0_i32_0 : i32, i32
  }
  func.func @transform_10(%arg0: i32) -> (i32, i32) {
    %c0_i32 = arith.constant 0 : i32
    %c0_i32_0 = arith.constant 0 : i32
    %c0_i32_1 = arith.constant 0 : i32
    return %c0_i32, %c0_i32_0 : i32, i32
  }
  func.func @transform_11(%arg0: i32) -> (i32, i32) {
    %c0_i32 = arith.constant 0 : i32
    %c0_i32_0 = arith.constant 0 : i32
    %c0_i32_1 = arith.constant 0 : i32
    return %c0_i32, %c0_i32_0 : i32, i32
  }
  func.func @transform_12(%arg0: i32) -> (i32, i32, i32) {
    %c0_i32 = arith.constant 0 : i32
    %c0_i32_0 = arith.constant 0 : i32
    %c0_i32_1 = arith.constant 0 : i32
    return %arg0, %c0_i32, %c0_i32_0 : i32, i32, i32
  }
}

</mosaic_0001>

<bundles_post_ra>
// kernel: lenet_forward.1
= control target key start
LH: loop header
LB: loop body
LE: loop exit
PB: predicated region body
PF: predicated region fallthrough
CT: control target
= control target key end

     0   :  { %s9788_s0 = inlined_call_operand.vmem [shape: bf16[2,4,16,1024], index: 0, kind: input, shape index: {}]   ;;  %s9789_s1 = inlined_call_operand.vmem [shape: bf16[16,400], index: 1, kind: input, shape index: {}]   ;;  %s9790_s2 = inlined_call_operand.vmem [shape: f32[16,1], index: 2, kind: input, shape index: {}]   ;;  %s9791_s3 = inlined_call_operand.vmem [shape: bf16[32,400], index: 3, kind: input, shape index: {}]   ;;  %s9792_s4 = inlined_call_operand.vmem [shape: f32[32,1], index: 4, kind: input, shape index: {}]   ;;  %s9793_s5 = inlined_call_operand.vmem [shape: bf16[529,25], index: 5, kind: input, shape index: {}]   ;;  %s9794_s6 = inlined_call_operand.vmem [shape: bf16[32,25,120], index: 6, kind: input, shape index: {}]   ;;  %s9795_s7 = inlined_call_operand.vmem [shape: f32[1,120], index: 7, kind: input, shape index: {}]   ;;  %s9796_s8 = inlined_call_operand.vmem [shape: bf16[120,84], index: 8, kind: input, shape index: {}]   ;;  %s9797_s9 = inlined_call_operand.vmem [shape: f32[1,84], index: 9, kind: input, shape index: {}]   ;;  %s9798_s10 = inlined_call_operand.vmem [shape: bf16[84,128], index: 10, kind: input, shape index: {}]   ;;  %s9799_s11 = inlined_call_operand.vmem [shape: f32[1,128], index: 11, kind: input, shape index: {}]   ;;  %s9800_s12 = inlined_call_operand.hbm [shape: f32[2,4,128], index: 12, kind: output, shape index: {}]  }
   0x1   :  { %9855 = sst [smem:[#allocation21_spill]] %s9788_s0 }
   0x2   :  { %9856 = sst [smem:[#allocation22_spill]] %s9797_s9 }
   0x3   :  { %9857 = sst [smem:[#allocation23_spill]] %s9799_s11 }
   0x4   :  { %9858 = sst [smem:[#allocation24_spill]] %s9800_s12 }
   0x5   :  { %17 = vsyncpa [#allocation4], 0 }
   0x6   :  { %19 = vsyncpa [#allocation4 + $0x1], 0  ;;  %s6615_s21 = smov 0   ;;  %s6617_s22 = smov 0  }
   0x7   :  { %s6619_s23 = smov 0   ;;  %s6621_s24 = smov 0  }
   0x8 LB: > { %9859 = sst [smem:[#allocation6_spill]] %s6509_s21  ;;  %s6636_s25 = sadd.s32 4294967295, %s6521_s24   ;;  %s6521_s24 = sphi %s6621_s24, %s9949_s24   ;;  %s6517_s23 = sphi %s6619_s23, %s9952_s23   ;;  %s6513_s22 = sphi %s6617_s22, %s9951_s22   ;;  %s6509_s21 = sphi %s6615_s21, %s9950_s21  }
   0x9   : > { %9860 = sst [smem:[#allocation7_spill]] %s6513_s22  ;;  %s5371_s26 = sadd.s32 4294967294, %s6521_s24  }
   0xa   : > { %9861 = sst [smem:[#allocation8_spill]] %s6517_s23  ;;  %s6640_s27 = sadd.s32 1, %s6521_s24  }
   0xb   : > { %9862 = sst [smem:[#allocation9_spill]] %s6521_s24  ;;  %s289_s28 = sadd.s32 1, %s6517_s23 }
   0xc   : > { %9863 = sst [smem:[#allocation10_spill]] %s6640_s27  ;;  %s286_s29 = ssub.s32 %s6521_s24, %s6640_s27 }
   0xd   : > { %p299_p0 = scmp.ne.s32.totalorder %s6517_s23, %s6513_s22  ;;  %p287_p1 = scmp.eq.s32.totalorder %s286_s29, 0 }
   0xe   : > { %p300_p2 = scmp.eq.s32.totalorder %s6636_s25, 1  ;;  %p305_p3 = scmp.ne.s32.totalorder %s6513_s22, %s6509_s21 }
   0xf   : > { %p306_p4 = scmp.eq.s32.totalorder %s5371_s26, 1  ;;  %p5374_p7 = scmp.ge.s32.totalorder %s6521_s24, 1 }
  0x10   : > { %s6651_s30 = scalar_select %p287_p1, %s6517_s23, %s289_s28  }
  0x11   : > { %p6653_p5 = por %p300_p2, %p299_p0  ;;  %p6657_p6 = por %p306_p4, %p305_p3 }
  0x12   : > { %9864 = sst [smem:[#allocation11_spill]] %s6651_s30  ;;  %p365_p8 = scmp.lt.s32.totalorder %s6521_s24, 3 }
  0x13   : > { %s9865_s13 = scalar_select %p6653_p5, 1, 0 }
  0x14   : > { %s9867_s14 = scalar_select %p6657_p6, 1, 0 }
  0x15   : > { %9866 = sst [smem:[#allocation12_spill]] %s9865_s13  ;;  %p366_p9 = pnand %p5374_p7, %p365_p8 }
  0x16   : > { %9868 = sst [smem:[#allocation13_spill]] %s9867_s14 }
  0x17   : > { %369 = sbr.rel (%p366_p9) target bundleno = 2533 (0x9e5), region = 68 }
  0x1c   : > { %s9801_s15 = sand.u32 1, %s6513_s22   ;;  %p407_p10 = scmp.lt.s32.totalorder %s6636_s25, 1 }
  0x1d   : > { %s6667_s16 = sshll.u32 %s9801_s15, 2  ;;  %s9869_s0 = sld [smem:[#allocation21_spill]] }
  0x1e   : > { %s408_s17 = scalar_select %p407_p10, %s6636_s25, 1 }
  0x1f   : > { %s6676_s29 = smov 0  }
  0x20   : > { %s6078_s18 = sshll.u32 %s408_s17, 8 }
  0x23   : > { %s6673_s26 = scalar_lea.vmem %s9869_s0, %s6078_s18 }
  0x24   : > { %9870 = sst [smem:[#allocation14_spill]] %s6673_s26 }
  0x25 LB: >> { %s9871_s26 = sld [smem:[#allocation14_spill]]  ;;  %s6079_s15 = sshll.u32 %s6525_s29, 6  ;;  %vm659_vm0 = vcmask 769024   ;;  %vm628_vm1 = vcmask 777216   ;;  %vm945_vm2 = vcmask 793600   ;;  %vm9848_vm3 = vcmask 785408   ;;  %s6525_s29 = sphi %s6676_s29, %s418_s29  }
  0x26   : >> { %s9808_s17 = smov 127   ;;  %s9815_s18 = smov 94   ;;  %vm536_vm4 = vcmask 1022976   ;;  %vm508_vm5 = vcmask 1031168   ;;  %vm9853_vm6 = vcmask 1039360   ;;  %vm564_vm7 = vcmask 1014784  }
  0x27   : >> { %s9823_s19 = smov 96   ;;  %s9806_s20 = smov 97   ;;  %vm907_vm8 = vcmask 261120   ;;  %vm1096_vm9 = vcmask 252928   ;;  %vm690_vm10 = vcmask 760832   ;;  %vm876_vm11 = vcmask 490496  }
  0x28   : >> { %s9812_s28 = smov 125   ;;  %s9875_s0 = smov 93   ;;  %vm845_vm12 = vcmask 498688   ;;  %vm9854_vm13 = vcmask 506880   ;;  %vm783_vm14 = vcmask 515072   ;;  %vm752_vm15 = vcmask 523264  }
  0x29   : >> { %s9876_s23 = smov 126   ;;  %s9879_s27 = smov 124  }
  0x2a   : >> { %s9880_s14 = smov 60   ;;  %s9881_s21 = smov 94  }
  0x2b   : >> { %s6683_s30 = scalar_lea.vmem %s9871_s26, %s6079_s15  ;;  %s9802_s15 = smov 95  }
  0x2c   : >> { %v5390_v0 = vld [vmem:[%s6683_s30 + $0x8] sm:$0xf]  ;;  %v5382_v2 = vld [vmem:[%s6683_s30] sm:$0xf]  ;;  %v6080_v5 = vld [vmem:[%s6683_s30 + $0x4] sm:$0xf] }
  0x2d   : >> { %v6085_v1 = vld [vmem:[%s6683_s30 + $0x24] sm:$0xf0]  ;;  %v6084_v4 = vld [vmem:[%s6683_s30 + $0x1c] sm:$0xf0]  ;;  %v5384_v6 = vld [vmem:[%s6683_s30 + $0x20] sm:$0xf0] }
  0x2e   : >> { %v6688_v3 = vor.u32 %v6085_v1, %v5390_v0  ;;  %v6693_v7 = vor.u32 %v6084_v4, %v5382_v2  ;;  %v6695_v8 = vor.u32 %v6080_v5, %v5384_v6  ;;  %v6081_v9 = vld [vmem:[%s6683_s30 + $0xc] sm:$0xf]  ;;  %v5398_v12 = vld [vmem:[%s6683_s30 + $0x10] sm:$0xf]  ;;  %v6082_v15 = vld [vmem:[%s6683_s30 + $0x14] sm:$0xf] }
  0x2f   : >> { %v5392_v10 = vld [vmem:[%s6683_s30 + $0x28] sm:$0xf0]  ;;  %v6086_v13 = vld [vmem:[%s6683_s30 + $0x2c] sm:$0xf0]  ;;  %v5400_v16 = vld [vmem:[%s6683_s30 + $0x30] sm:$0xf0] }
  0x30   : >> { %616 = vrot.lane.b32.xlu2 %v6688_v3, %s9802_s15  ;;  %466 = vrot.lane.b32.xlu1 %v6693_v7, %s9808_s17  ;;  %v6729_v11 = vor.u32 %v6081_v9, %v5392_v10  ;;  %v6751_v14 = vor.u32 %v6086_v13, %v5398_v12  ;;  %v6767_v17 = vor.u32 %v6082_v15, %v5400_v16  ;;  %s9819_s26 = smov 32   ;;  %v5406_v16 = vld [vmem:[%s6683_s30 + $0x18] sm:$0xf]  ;;  %s9840_s24 = smov 92  }
  0x31   : >> { %645 = vrot.lane.b32.xlu0 %v6695_v8, %s9815_s18  ;;  %s9884_s11 = smov 62   ;;  %s9886_s12 = smov 96  }
  0x32   : >> { %s9887_s13 = smov 64   ;;  %s9889_s22 = smov 92  }
  0x38   : >> { %583 = vrot.lane.b32.xlu2 %v6695_v8, %s9823_s19  ;;  %614 = vrot.lane.b32.xlu1 %v6695_v8, %s9802_s15  ;;  %s9804_s15 = smov 126  }
  0x39   : >> { %647 = vrot.lane.b32.xlu0 %v6688_v3, %s9815_s18 }
  0x40   : >> { %933 = vrot.lane.b32.xlu2 %v6688_v3, %s9806_s20  ;;  %931 = vrot.lane.b32.xlu1 %v6695_v8, %s9806_s20  ;;  %s9810_s20 = smov 93  }
  0x41   : >> { %585 = vrot.lane.b32.xlu0 %v6688_v3, %s9823_s19 }
  0x48   : >> { %526 = vrot.lane.b32.xlu2 %v6688_v3, %s9812_s28  ;;  %524 = vrot.lane.b32.xlu1 %v6695_v8, %s9812_s28 }
  0x49   : >> { %522 = vrot.lane.b32.xlu0 %v6693_v7, %s9812_s28 }
  0x50   : >> { %498 = vrot.lane.b32.xlu2 %v6688_v3, %s9804_s15  ;;  %496 = vrot.lane.b32.xlu1 %v6695_v8, %s9804_s15 }
  0x51   : >> { %494 = vrot.lane.b32.xlu0 %v6693_v7, %s9804_s15  ;;  %s9872_s15 = smov 95  }
  0x58   : >> { %649 = vrot.lane.b32.xlu2 %v6729_v11, %s9815_s18  ;;  %470 = vrot.lane.b32.xlu1 %v6688_v3, %s9808_s17 }
  0x59   : >> { %468 = vrot.lane.b32.xlu0 %v6695_v8, %s9808_s17  ;;  %s9873_s17 = smov 97  }
  0x60   : >> { %587 = vrot.lane.b32.xlu2 %v6729_v11, %s9823_s19  ;;  %643 = vrot.lane.b32.xlu1 %v6693_v7, %s9815_s18 }
  0x61   : >> { %618 = vrot.lane.b32.xlu0 %v6729_v11, %s9872_s15 }
  0x68   : >> { %678 = vrot.lane.b32.xlu2 %v6688_v3, %s9810_s20  ;;  %676 = vrot.lane.b32.xlu1 %v6695_v8, %s9810_s20  ;;  %s9817_s20 = smov 124  }
  0x69   : >> { %612 = vrot.lane.b32.xlu0 %v6693_v7, %s9872_s15 }
  0x70   : >> { %528 = vrot.lane.b32.xlu2 %v6729_v11, %s9812_s28  ;;  %651 = vrot.lane.b32.xlu1 %v6751_v14, %s9815_s18  ;;  %s9874_s28 = smov 127  }
  0x71   : >> { %935 = vrot.lane.b32.xlu0 %v6729_v11, %s9873_s17 }
  0x78   : >> { %620 = vrot.lane.b32.xlu2 %v6751_v14, %s9872_s15  ;;  %552 = vrot.lane.b32.xlu1 %v6695_v8, %s9817_s20 }
  0x79   : >> { %581 = vrot.lane.b32.xlu0 %v6693_v7, %s9823_s19 }
  0x80   : >> { %472 = vrot.lane.b32.xlu2 %v6729_v11, %s9874_s28  ;;  %653 = vrot.lane.b32.xlu1 %v6767_v17, %s9815_s18  ;;  %s9836_s18 = smov 31  }
  0x81   : >> { %680 = vrot.lane.b32.xlu0 %v6729_v11, %s9875_s0 }
  0x88   : >> { %893 = vrot.lane.b32.xlu2 %v6695_v8, %s9819_s26  ;;  %589 = vrot.lane.b32.xlu1 %v6751_v14, %s9823_s19 }
  0x89   : >> { %550 = vrot.lane.b32.xlu0 %v6693_v7, %s9817_s20  ;;  %s9821_s20 = smov 60  }
  0x8a   : >> { %v6781_v18 = vpop.permute.xlu2 %616 }
  0x90   : >> { %937 = vrot.lane.b32.xlu2 %v6751_v14, %s9873_s17  ;;  %891 = vrot.lane.b32.xlu1 %v6693_v7, %s9819_s26  ;;  %s9877_s26 = smov 125  }
  0x91   : >> { %500 = vrot.lane.b32.xlu0 %v6729_v11, %s9876_s23 }
  0x92   : >> { %v6789_v19 = vpop.permute.xlu2 %583 }
  0x98   : >> { %1032 = vrot.lane.b32.xlu2 %v6789_v19, %s9836_s18 }
  0x99   : >> { %622 = vrot.lane.b32.xlu0 %v6767_v17, %s9872_s15 }
  0x9a   : >> { %v6795_v20 = vpop.permute.xlu2 %933 }
  0xa2   : >> { %v6797_v21 = vpop.permute.xlu2 %526  ;;  %v6799_v22 = vpop.permute.xlu1 %466 }
  0xa3   : >> { %v646_v23 = vpop.permute.xlu0 %645 }
  0xa4   : >> { %1064 = vrot.lane.b32.xlu1 %v646_v23, %s9836_s18 }
  0xaa   : >> { %v6802_v24 = vpop.permute.xlu2 %498  ;;  %v615_v25 = vpop.permute.xlu1 %614 }
  0xab   : >> { %v6804_v26 = vpop.permute.xlu0 %647  ;;  %v630_v28 = vsel %vm628_vm1, %v615_v25, %v6781_v18 }
  0xac   : >> { %1048 = vrot.lane.b32.xlu1 %v615_v25, %s9836_s18  ;;  %v661_v27 = vsel %vm659_vm0, %v646_v23, %v6804_v26 }
  0xad   : >> { %1066 = vrot.lane.b32.xlu2 %v661_v27, %s9836_s18  ;;  %1318 = vmatpush.bf16.msra.mxu3 %v661_v27 }
  0xb1   : >> { %1319 = vmatpush.bf16.msra.mxu3 %v630_v28 }
  0xb2   : >> { %v6812_v29 = vpop.permute.xlu2 %649  ;;  %v932_v30 = vpop.permute.xlu1 %931 }
  0xb3   : >> { %v6814_v31 = vpop.permute.xlu0 %585  ;;  %1016 = vrot.lane.b32.xlu0 %v932_v30, %s9836_s18  ;;  %v946_v32 = vsel %vm945_vm2, %v932_v30, %v6795_v20  ;;  %v6931_v9 = vsel %vm659_vm0, %v6804_v26, %v6812_v29 }
  0xb4   : >> { %v599_v33 = vsel %vm9848_vm3, %v6789_v19, %v6814_v31  ;;  %1018 = vrot.lane.b32.xlu1 %v946_v32, %s9836_s18 }
  0xb5   : >> { %1050 = vrot.lane.b32.xlu2 %v630_v28, %s9836_s18  ;;  %1320 = vmatpush.bf16.msra.mxu3 %v599_v33 }
  0xba   : >> { %v6824_v34 = vpop.permute.xlu2 %587  ;;  %v525_v35 = vpop.permute.xlu1 %524 }
  0xbb   : >> { %v523_v36 = vpop.permute.xlu0 %522  ;;  %1034 = vrot.lane.b32.xlu0 %v599_v33, %s9836_s18  ;;  %v6835_v38 = vsel %vm536_vm4, %v525_v35, %v6797_v21  ;;  %v6980_v28 = vsel %vm9848_vm3, %v6814_v31, %v6824_v34 }
  0xbc   : >> { %860 = vrot.lane.b32.xlu1 %v6693_v7, %s9821_s20  ;;  %v537_v43 = vsel %vm536_vm4, %v523_v36, %v525_v35 }
  0xbd   : >> { %862 = vrot.lane.b32.xlu2 %v6695_v8, %s9821_s20  ;;  %s9827_s20 = smov 61  }
  0xc2   : >> { %v6831_v37 = vpop.permute.xlu2 %678  ;;  %v497_v39 = vpop.permute.xlu1 %496 }
  0xc3   : >> { %v495_v40 = vpop.permute.xlu0 %494  ;;  %591 = vrot.lane.b32.xlu0 %v6767_v17, %s9823_s19  ;;  %v6860_v48 = vsel %vm508_vm5, %v497_v39, %v6802_v24  ;;  %s9825_s19 = smov 62  }
  0xc4   : >> { %1002 = vrot.lane.b32.xlu1 %v6835_v38, %s9836_s18  ;;  %v509_v52 = vsel %vm508_vm5, %v495_v40, %v497_v39 }
  0xc5   : >> { %530 = vrot.lane.b32.xlu2 %v6751_v14, %s9877_s26 }
  0xca   : >> { %v6843_v41 = vpop.permute.xlu1 %470  ;;  %v6846_v44 = vpop.permute.xlu2 %528 }
  0xcb   : >> { %v469_v42 = vpop.permute.xlu0 %468  ;;  %1000 = vrot.lane.b32.xlu0 %v537_v43, %s9836_s18 }
  0xcc   : >> { %831 = vrot.lane.b32.xlu1 %v6695_v8, %s9827_s20  ;;  %v6887_v57 = vsel %vm9853_vm6, %v469_v42, %v6843_v41  ;;  %v481_v61 = vsel %vm9853_vm6, %v6799_v22, %v469_v42 }
  0xcd   : >> { %939 = vrot.lane.b32.xlu2 %v6767_v17, %s9873_s17 }
  0xd2   : >> { %v644_v45 = vpop.permute.xlu1 %643  ;;  %v6864_v49 = vpop.permute.xlu2 %620 }
  0xd3   : >> { %v6853_v46 = vpop.permute.xlu0 %618  ;;  %829 = vrot.lane.b32.xlu0 %v6693_v7, %s9827_s20  ;;  %v660_v47 = vsel %vm659_vm0, %v644_v45, %v646_v23  ;;  %s9878_s20 = smov 32  }
  0xd4   : >> { %1262 = vmatpush.bf16.msra.mxu0 %v660_v47  ;;  %986 = vrot.lane.b32.xlu1 %v6860_v48, %s9836_s18  ;;  %v6950_v15 = vsel %vm628_vm1, %v6781_v18, %v6853_v46 }
  0xd5   : >> { %502 = vrot.lane.b32.xlu2 %v6751_v14, %s9876_s23 }
  0xda   : >> { %v6868_v50 = vpop.permute.xlu1 %676  ;;  %v6877_v54 = vpop.permute.xlu2 %472 }
  0xdb   : >> { %v613_v51 = vpop.permute.xlu0 %612  ;;  %984 = vrot.lane.b32.xlu0 %v509_v52, %s9836_s18  ;;  %v6997_v31 = vsel %vm690_vm10, %v6868_v50, %v6831_v37 }
  0xdc   : >> { %v629_v53 = vsel %vm628_vm1, %v613_v51, %v615_v25  ;;  %798 = vrot.lane.b32.xlu1 %v6693_v7, %s9825_s19 }
  0xdd   : >> { %1263 = vmatpush.bf16.msra.mxu0 %v629_v53  ;;  %800 = vrot.lane.b32.xlu2 %v6695_v8, %s9825_s19  ;;  %s9832_s19 = smov 63  }
  0xe2   : >> { %v6879_v55 = vpop.permute.xlu1 %651  ;;  %v6893_v58 = vpop.permute.xlu2 %893 }
  0xe3   : >> { %v6881_v56 = vpop.permute.xlu0 %935  ;;  %532 = vrot.lane.b32.xlu0 %v6767_v17, %s9877_s26 }
  0xe4   : >> { %970 = vrot.lane.b32.xlu1 %v6887_v57, %s9836_s18 }
  0xe5   : >> { %474 = vrot.lane.b32.xlu2 %v6751_v14, %s9874_s28 }
  0xea   : >> { %v6895_v59 = vpop.permute.xlu1 %552  ;;  %v6906_v63 = vpop.permute.xlu2 %937 }
  0xeb   : >> { %v582_v60 = vpop.permute.xlu0 %581  ;;  %968 = vrot.lane.b32.xlu0 %v481_v61, %s9836_s18 }
  0xec   : >> { %v598_v62 = vsel %vm9848_vm3, %v582_v60, %v6789_v19  ;;  %504 = vrot.lane.b32.xlu1 %v6767_v17, %s9876_s23  ;;  %v6087_v19 = vld [vmem:[%s6683_s30 + $0x34] sm:$0xf0] }
  0xed   : >> { %1264 = vmatpush.bf16.msra.mxu0 %v598_v62  ;;  %767 = vrot.lane.b32.xlu2 %v6693_v7, %s9832_s19  ;;  %v6959_v23 = vor.u32 %v6087_v19, %v5406_v16  ;;  %v947_v62 = vsel %vm945_vm2, %v6795_v20, %v6881_v56 }
  0xf2   : >> { %v6908_v0 = vpop.permute.xlu1 %653  ;;  %v1033_v6 = vpop.permute.xlu2 %1032 }
  0xf3   : >> { %v6910_v1 = vpop.permute.xlu0 %680  ;;  %895 = vrot.lane.b32.xlu0 %v6688_v3, %s9878_s20 }
  0xf4   : >> { %952 = vrot.lane.b32.xlu1 %v6693_v7, %s9836_s18  ;;  %v7070_v19 = vsel %vm690_vm10, %v6831_v37, %v6910_v1 }
  0xf5   : >> { %954 = vrot.lane.b32.xlu2 %v6695_v8, %s9836_s18 }
  0xfa   : >> { %v6918_v4 = vpop.permute.xlu1 %589 }
  0xfb   : >> { %v551_v2 = vpop.permute.xlu0 %550  ;;  %769 = vrot.lane.b32.xlu0 %v6695_v8, %s9832_s19  ;;  %s9838_s19 = smov 64  }
  0xfc   : >> { %v565_v5 = vsel %vm564_vm7, %v551_v2, %v6895_v59  ;;  %554 = vrot.lane.b32.xlu1 %v6688_v3, %s9879_s27 }
  0xfd   : >> { %1265 = vmatpush.bf16.msra.mxu0 %v565_v5  ;;  %864 = vrot.lane.b32.xlu2 %v6688_v3, %s9880_s14 }
 0x101   : >> { %1266 = vmatpush.bf16.msra.mxu0 %v537_v43 }
 0x102   : >> { %v892_v10 = vpop.permute.xlu1 %891 }
 0x103   : >> { %1068 = vrot.lane.b32.xlu0 %v6931_v9, %s9836_s18  ;;  %v908_v12 = vsel %vm907_vm8, %v892_v10, %v6893_v58  ;;  %v6965_v18 = vpop.permute.xlu0 %500 }
 0x104   : >> { %682 = vrot.lane.b32.xlu1 %v6751_v14, %s9875_s0  ;;  %1276 = vmatpush.bf16.msra.mxu1 %v908_v12 }
 0x105   : >> { %1267 = vmatpush.bf16.msra.mxu0 %v509_v52  ;;  %736 = vrot.lane.b32.xlu2 %v6693_v7, %s9838_s19  ;;  %v7028_v52 = vsel %vm659_vm0, %v6812_v29, %v6879_v55  ;;  %v7047_v29 = vsel %vm536_vm4, %v6797_v21, %v6846_v44 }
 0x107   : >> { %v6941_v13 = vpop.permute.xlu2 %1066 }
 0x109   : >> { %1268 = vmatpush.bf16.msra.mxu0 %v481_v61 }
 0x10b   : >> { %476 = vrot.lane.b32.xlu0 %v6767_v17, %s9874_s28  ;;  %v6982_v30 = vpop.permute.xlu0 %622 }
 0x10c   : >> { %897 = vrot.lane.b32.xlu1 %v6729_v11, %s9878_s20 }
 0x10d   : >> { %1269 = vmatpush.bf16.msra.mxu0 %v6693_v7  ;;  %1052 = vrot.lane.b32.xlu2 %v6950_v15, %s9836_s18  ;;  %s9882_s18 = smov 61  }
 0x10f   : >> { %v6957_v22 = vpop.permute.xlu2 %1050 }
 0x113   : >> { %738 = vrot.lane.b32.xlu0 %v6695_v8, %s9838_s19  ;;  %s9883_s19 = smov 31  }
 0x114   : >> { %655 = vrot.lane.b32.xlu1 %v6959_v23, %s9881_s21 }
 0x115   : >> { %705 = vrot.lane.b32.xlu2 %v6693_v7, %s9840_s24 }
 0x116   : >> { %v1065_v25 = vpop.permute.xlu1 %1064 }
 0x117   : >> { %v6969_v26 = vpop.permute.xlu2 %862  ;;  %v1146_v27 = vsel %vm1096_vm9, %v1065_v25, %v6941_v13  ;;  %v7077_v25 = vsel %vm628_vm1, %v6853_v46, %v6864_v49 }
 0x118   : >> { %1290 = vmatpush.bf16.msra.mxu2 %v1146_v27 }
 0x11b   : >> { %833 = vrot.lane.b32.xlu0 %v6688_v3, %s9882_s18 }
 0x11c   : >> { %866 = vrot.lane.b32.xlu1 %v6729_v11, %s9880_s14 }
 0x11d   : >> { %1036 = vrot.lane.b32.xlu2 %v6980_v28, %s9883_s19 }
 0x11e   : >> { %v1049_v32 = vpop.permute.xlu1 %1048 }
 0x11f   : >> { %v6986_v33 = vpop.permute.xlu2 %530  ;;  %v1139_v35 = vsel %vm1096_vm9, %v1049_v32, %v6957_v22 }
 0x120   : >> { %1291 = vmatpush.bf16.msra.mxu2 %v1139_v35 }
 0x123   : >> { %707 = vrot.lane.b32.xlu0 %v6695_v8, %s9840_s24  ;;  %s9885_s24 = smov 63  }
 0x124   : >> { %1080 = vrot.lane.b32.xlu1 %v6868_v50, %s9883_s19 }
 0x125   : >> { %1082 = vrot.lane.b32.xlu2 %v6997_v31, %s9883_s19  ;;  %v1017_v36 = vpop.permute.xlu0 %1016 }
 0x126   : >> { %v7001_v39 = vpop.permute.xlu1 %1018 }
 0x127   : >> { %v7003_v40 = vpop.permute.xlu2 %939 }
 0x12b   : >> { %802 = vrot.lane.b32.xlu0 %v6688_v3, %s9884_s11 }
 0x12c   : >> { %674 = vrot.lane.b32.xlu1 %v6693_v7, %s9875_s0  ;;  %v1125_v7 = vsel %vm1096_vm9, %v1017_v36, %v7001_v39  ;;  %v7094_v36 = vsel %vm508_vm5, %v6802_v24, %v6965_v18  ;;  %v7116_v24 = vsel %vm9848_vm3, %v6824_v34, %v6918_v4 }
 0x12d   : >> { %835 = vrot.lane.b32.xlu2 %v6729_v11, %s9882_s18  ;;  %v7011_v42 = vpop.permute.xlu0 %1034 }
 0x12e   : >> { %v861_v43 = vpop.permute.xlu1 %860  ;;  %v1132_v45 = vsel %vm1096_vm9, %v1033_v6, %v7011_v42 }
 0x12f   : >> { %v7015_v47 = vpop.permute.xlu2 %502  ;;  %1292 = vmatpush.bf16.msra.mxu2 %v1132_v45  ;;  %v877_v51 = vsel %vm876_vm11, %v861_v43, %v6969_v26  ;;  %v7099_v43 = vsel %vm659_vm0, %v6879_v55, %v6908_v0  ;;  %v6083_v55 = vld [vmem:[%s6683_s30 + $0x1c] sm:$0xf] }
 0x130   : >> { %1277 = vmatpush.bf16.msra.mxu1 %v877_v51  ;;  %9888 = vst [vmem:[#allocation15_spill] sm:$0xff] %v7099_v43 }
 0x133   : >> { %624 = vrot.lane.b32.xlu0 %v6959_v23, %s9872_s15  ;;  %1293 = vmatpush.bf16.msra.mxu2 %v1125_v7 }
 0x134   : >> { %771 = vrot.lane.b32.xlu1 %v6688_v3, %s9885_s24 }
 0x135   : >> { %1070 = vrot.lane.b32.xlu2 %v7028_v52, %s9883_s19  ;;  %v7032_v53 = vpop.permute.xlu0 %591 }
 0x136   : >> { %v7034_v60 = vpop.permute.xlu1 %1002 }
 0x137   : >> { %v7036_v61 = vpop.permute.xlu2 %800 }
 0x13b   : >> { %1020 = vrot.lane.b32.xlu0 %v947_v62, %s9883_s19  ;;  %v5408_v62 = vld [vmem:[%s6683_s30 + $0x38] sm:$0xf0] }
 0x13c   : >> { %804 = vrot.lane.b32.xlu1 %v6729_v11, %s9884_s11 }
 0x13d   : >> { %1004 = vrot.lane.b32.xlu2 %v7047_v29, %s9883_s19  ;;  %v1001_v2 = vpop.permute.xlu0 %1000 }
 0x13e   : >> { %v7051_v5 = vpop.permute.xlu1 %831  ;;  %v1118_v6 = vsel %vm1096_vm9, %v1001_v2, %v7034_v60 }
 0x13f   : >> { %v7055_v20 = vpop.permute.xlu2 %474  ;;  %1294 = vmatpush.bf16.msra.mxu2 %v1118_v6 }
 0x143   : >> { %593 = vrot.lane.b32.xlu0 %v6959_v23, %s9886_s12 }
 0x144   : >> { %556 = vrot.lane.b32.xlu1 %v6729_v11, %s9879_s27 }
 0x145   : >> { %684 = vrot.lane.b32.xlu2 %v6767_v17, %s9875_s0  ;;  %v830_v21 = vpop.permute.xlu0 %829 }
 0x146   : >> { %v7063_v10 = vpop.permute.xlu1 %986  ;;  %v846_v12 = vsel %vm845_vm12, %v830_v21, %v7051_v5 }
 0x147   : >> { %v768_v16 = vpop.permute.xlu2 %767  ;;  %1278 = vmatpush.bf16.msra.mxu1 %v846_v12 }
 0x14b   : >> { %1084 = vrot.lane.b32.xlu0 %v7070_v19, %s9883_s19 }
 0x14c   : >> { %1054 = vrot.lane.b32.xlu1 %v7077_v25, %s9883_s19 }
 0x14d   : >> { %773 = vrot.lane.b32.xlu2 %v6729_v11, %s9885_s24  ;;  %v985_v27 = vpop.permute.xlu0 %984 }
 0x14e   : >> { %v799_v32 = vpop.permute.xlu1 %798  ;;  %v1111_v37 = vsel %vm1096_vm9, %v985_v27, %v7063_v10  ;;  %v7128_v27 = vor.u32 %v6083_v55, %v5408_v62  ;;  %v7147_v55 = vsel %vm628_vm1, %v6864_v49, %v6982_v30 }
 0x14f   : >> { %v7085_v35 = vpop.permute.xlu2 %954  ;;  %1295 = vmatpush.bf16.msra.mxu2 %v1111_v37  ;;  %v815_v46 = vsel %vm9854_vm13, %v799_v32, %v7036_v61  ;;  %9890 = vst [vmem:[#allocation16_spill] sm:$0xff] %v7147_v55 }
 0x150   : >> { %1279 = vmatpush.bf16.msra.mxu1 %v815_v46 }
 0x153   : >> { %740 = vrot.lane.b32.xlu0 %v6688_v3, %s9887_s13 }
 0x154   : >> { %988 = vrot.lane.b32.xlu1 %v7094_v36, %s9883_s19 }
 0x155   : >> { %1072 = vrot.lane.b32.xlu2 %v7099_v43, %s9883_s19  ;;  %v7105_v45 = vpop.permute.xlu0 %532  ;;  %v7197_v43 = vsel %vm9848_vm3, %v6918_v4, %v7032_v53  ;;  %vm721_vm3 = vcmask 752640  }
 0x156   : >> { %v7107_v51 = vpop.permute.xlu1 %970  ;;  %9891 = vst [vmem:[#allocation17_spill] sm:$0xff] %v7197_v43 }
 0x157   : >> { %v7109_v7 = vpop.permute.xlu2 %864 }
 0x15b   : >> { %941 = vrot.lane.b32.xlu0 %v6959_v23, %s9873_s17 }
 0x15c   : >> { %709 = vrot.lane.b32.xlu1 %v6688_v3, %s9889_s22 }
 0x15d   : >> { %1038 = vrot.lane.b32.xlu2 %v7116_v24, %s9883_s19  ;;  %v969_v2 = vpop.permute.xlu0 %968 }
 0x15e   : >> { %v7124_v6 = vpop.permute.xlu1 %504  ;;  %v1104_v21 = vsel %vm1096_vm9, %v969_v2, %v7107_v51 }
 0x15f   : >> { %v737_v12 = vpop.permute.xlu2 %736  ;;  %1296 = vmatpush.bf16.msra.mxu2 %v1104_v21 }
 0x163   : >> { %657 = vrot.lane.b32.xlu0 %v7128_v27, %s9881_s21 }
 0x164   : >> { %686 = vrot.lane.b32.xlu1 %v6959_v23, %s9875_s0 }
 0x165   : >> { %742 = vrot.lane.b32.xlu2 %v6729_v11, %s9887_s13  ;;  %v7136_v34 = vpop.permute.xlu0 %895 }
 0x166   : >> { %v953_v32 = vpop.permute.xlu1 %952 }
 0x167   : >> { %v7138_v37 = vpop.permute.xlu2 %1052  ;;  %v1097_v46 = vsel %vm1096_vm9, %v953_v32, %v7085_v35 }
 0x168   : >> { %1297 = vmatpush.bf16.msra.mxu2 %v1097_v46  ;;  %v7165_v46 = vsel %vm9853_vm6, %v6843_v41, %v6877_v54  ;;  %v5414_v41 = vld [vmem:[%s9789_s1] sm:$0xf] }
 0x16b   : >> { %534 = vrot.lane.b32.xlu0 %v6959_v23, %s9877_s26 }
 0x16c   : >> { %1056 = vrot.lane.b32.xlu1 %v7147_v55, %s9883_s19  ;;  %v948_v55 = vsel %vm945_vm2, %v6881_v56, %v6906_v63 }
 0x16d   : >> { %626 = vrot.lane.b32.xlu2 %v7128_v27, %s9872_s15  ;;  %v7153_v62 = vpop.permute.xlu0 %769  ;;  %s6548_s15 = smov 56  }
 0x16e   : >> { %v7155_v2 = vpop.permute.xlu1 %554  ;;  %v784_v21 = vsel %vm783_vm14, %v768_v16, %v7153_v62 }
 0x16f   : >> { %v706_v32 = vpop.permute.xlu2 %705  ;;  %v566_v49 = vsel %vm564_vm7, %v6895_v59, %v7155_v2  ;;  %1280 = vmatpush.bf16.msra.mxu1 %v784_v21 }
 0x170   : >> { %1321 = vmatpush.bf16.msra.mxu3 %v566_v49 }
 0x173   : >> { %972 = vrot.lane.b32.xlu0 %v7165_v46, %s9883_s19 }
 0x174   : >> { %1322 = vmatpush.bf16.msra.mxu3 %v6835_v38  ;;  %506 = vrot.lane.b32.xlu1 %v6959_v23, %s9876_s23  ;;  %v6090_v38 = vld [vmem:[%s9789_s1 + $0xc] sm:$0xf0] }
 0x175   : >> { %711 = vrot.lane.b32.xlu2 %v6729_v11, %s9889_s22  ;;  %v7174_v16 = vpop.permute.xlu0 %1068  ;;  %v7187_v49 = vor.u32 %v6090_v38, %v5414_v41 }
 0x176   : >> { %v7176_v59 = vpop.permute.xlu1 %682 }
 0x177   : >> { %v7178_v21 = vpop.permute.xlu2 %1036  ;;  %1270 = vmatmul.bf16.vlgmr.msra.gmra.mxu0 %v7187_v49 }
 0x178   : >> { %1323 = vmatpush.bf16.msra.mxu3 %v6860_v48 }
 0x17b   : >> { %1022 = vrot.lane.b32.xlu0 %v948_v55, %s9883_s19  ;;  %v7232_v55 = vsel %vm536_vm4, %v6846_v44, %v6986_v33  ;;  %v949_v44 = vsel %vm945_vm2, %v6906_v63, %v7003_v40 }
 0x17c   : >> { %1324 = vmatpush.bf16.msra.mxu3 %v6887_v57  ;;  %1040 = vrot.lane.b32.xlu1 %v7197_v43, %s9883_s19  ;;  %9892 = vst [vmem:[#allocation18_spill] sm:$0xff] %v7232_v55 }
 0x17d   : >> { %595 = vrot.lane.b32.xlu2 %v7128_v27, %s9886_s12  ;;  %v7204_v48 = vpop.permute.xlu0 %476 }
 0x17e   : >> { %v7206_v56 = vpop.permute.xlu1 %897 }
 0x17f   : >> { %v7208_v41 = vpop.permute.xlu2 %1082 }
 0x180   : >> { %1325 = vmatpush.bf16.msra.mxu3 %v6695_v8 }
 0x183   : >> { %956 = vrot.lane.b32.xlu0 %v6688_v3, %s9883_s19  ;;  %1326 = vmatmul.bf16.vlgmr.msra.gmra.mxu3 %v7187_v49 }
 0x184   : >> { %1374 = vmatpush.bf16.msrb.mxu3 %v6931_v9  ;;  %478 = vrot.lane.b32.xlu1 %v6959_v23, %s9874_s28 }
 0x185   : >> { %899 = vrot.lane.b32.xlu2 %v6751_v14, %s9878_s20  ;;  %v7220_v57 = vpop.permute.xlu0 %738 }
 0x186   : >> { %v7222_v4 = vpop.permute.xlu1 %655  ;;  %v753_v8 = vsel %vm752_vm15, %v737_v12, %v7220_v57 }
 0x187   : >> { %v7226_v9 = vpop.permute.xlu2 %835  ;;  %1281 = vmatpush.bf16.msra.mxu1 %v753_v8 }
 0x188   : >> { %1375 = vmatpush.bf16.msrb.mxu3 %v6950_v15 }
 0x18b   : >> { %1006 = vrot.lane.b32.xlu0 %v7232_v55, %s9883_s19 }
 0x18c   : >> { %1376 = vmatpush.bf16.msrb.mxu3 %v6980_v28  ;;  %558 = vrot.lane.b32.xlu1 %v6751_v14, %s9879_s27  ;;  %v7255_v28 = vsel %vm536_vm4, %v6986_v33, %v7105_v45  ;;  %v909_v33 = vsel %vm907_vm8, %v6893_v58, %v7136_v34  ;;  %v878_v58 = vsel %vm876_vm11, %v6969_v26, %v7109_v7 }
 0x18d   : >> { %943 = vrot.lane.b32.xlu2 %v7128_v27, %s9873_s17  ;;  %v7240_v15 = vpop.permute.xlu0 %833  ;;  %9893 = vst [vmem:[#allocation19_spill] sm:$0xff] %v7255_v28 }
 0x18e   : >> { %v7242_v12 = vpop.permute.xlu1 %866 }
 0x18f   : >> { %v7244_v38 = vpop.permute.xlu2 %1070 }
 0x193   : >> { %1024 = vrot.lane.b32.xlu0 %v949_v44, %s9883_s19 }
 0x194   : >> { %868 = vrot.lane.b32.xlu1 %v6751_v14, %s9880_s14 }
 0x195   : >> { %1008 = vrot.lane.b32.xlu2 %v7255_v28, %s9883_s19  ;;  %v7259_v8 = vpop.permute.xlu0 %707  ;;  %v7273_v28 = vsel %vm508_vm5, %v6965_v18, %v7015_v47 }
 0x196   : >> { %v1081_v43 = vpop.permute.xlu1 %1080  ;;  %v722_v63 = vsel %vm721_vm3, %v706_v32, %v7259_v8  ;;  %v7280_v32 = vsel %vm9853_vm6, %v6877_v54, %v7055_v20  ;;  %v6091_v54 = vld [vmem:[%s9789_s1 + $0x14] sm:$0xf0] }
 0x197   : >> { %v7263_v55 = vpop.permute.xlu2 %1004  ;;  %v1153_v44 = vsel %vm1096_vm9, %v1081_v43, %v7208_v41  ;;  %1282 = vmatpush.bf16.msra.mxu1 %v722_v63  ;;  %9894 = vst [vmem:[#allocation20_spill] sm:$0xff] %v7280_v32  ;;  %v5422_v63 = vld [vmem:[%s9789_s1 + $0x8] sm:$0xf] }
 0x198   : >> { %1311 = vmatpush.bf16.msrb.mxu0 %v1153_v44 }
 0x19b   : >> { %990 = vrot.lane.b32.xlu0 %v7273_v28, %s9883_s19 }
 0x19c   : >> { %1332 = vmatpush.bf16.msra.mxu0 %v909_v33  ;;  %974 = vrot.lane.b32.xlu1 %v7280_v32, %s9883_s19  ;;  %v7301_v33 = vor.u32 %v6091_v54, %v5422_v63  ;;  %v1147_v32 = vsel %vm1096_vm9, %v6941_v13, %v7174_v16  ;;  %v1140_v13 = vsel %vm1096_vm9, %v6957_v22, %v7138_v37 }
 0x19d   : >> { %837 = vrot.lane.b32.xlu2 %v6751_v14, %s9882_s18  ;;  %v7289_v18 = vpop.permute.xlu0 %802  ;;  %v7337_v22 = vsel %vm508_vm5, %v7015_v47, %v7124_v6  ;;  %v7344_v54 = vsel %vm9853_vm6, %v7055_v20, %v7204_v48  ;;  %vm1258_vm6 = vcmask 130048  }
 0x19e   : >> { %v675_v43 = vpop.permute.xlu1 %674  ;;  %1298 = vmatmul.bf16.vlgmr.msra.gmra.mxu2 %v7301_v33 }
 0x19f   : >> { %v7297_v44 = vpop.permute.xlu2 %684  ;;  %v691_v26 = vsel %vm690_vm10, %v675_v43, %v6868_v50  ;;  %v816_v50 = vsel %vm9854_vm13, %v7036_v61, %v7289_v18  ;;  %v1133_v61 = vsel %vm1096_vm9, %v7011_v42, %v7178_v21 }
 0x1a0   : >> { %1333 = vmatpush.bf16.msra.mxu0 %v878_v58  ;;  %1283 = vmatpush.bf16.msra.mxu1 %v691_v26  ;;  %v847_v58 = vsel %vm845_vm12, %v7051_v5, %v7240_v15 }
 0x1a3   : >> { %928 = vrot.lane.b32.xlu0 %v7128_v27, %s9877_s26 }
 0x1a4   : >> { %1334 = vmatpush.bf16.msra.mxu0 %v847_v58  ;;  %1346 = vmatpush.bf16.msrb.mxu1 %v1147_v32  ;;  %v6089_v58 = vld [vmem:[%s9789_s1 + $0xc] sm:$0xf] }
 0x1a5   : >> { %925 = vrot.lane.b32.xlu1 %v7128_v27, %s9876_s23  ;;  %958 = vrot.lane.b32.xlu2 %v6729_v11, %s9883_s19  ;;  %v7322_v5 = vpop.permute.xlu0 %624 }
 0x1a6   : >> { %v7324_v32 = vpop.permute.xlu1 %771 }
 0x1a7   : >> { %v7326_v43 = vpop.permute.xlu2 %773  ;;  %v785_v63 = vsel %vm783_vm14, %v7153_v62, %v7324_v32  ;;  %v7349_v62 = vsel %vm690_vm10, %v6910_v1, %v7176_v59  ;;  %v1119_v1 = vsel %vm1096_vm9, %v7034_v60, %v7263_v55 }
 0x1a8   : >> { %1335 = vmatpush.bf16.msra.mxu0 %v816_v50  ;;  %1347 = vmatpush.bf16.msrb.mxu1 %v1140_v13  ;;  %v5424_v50 = vld [vmem:[%s9789_s1 + $0x18] sm:$0xf0] }
 0x1ab   : >> { %992 = vrot.lane.b32.xlu0 %v7337_v22, %s9883_s19 }
 0x1ac   : >> { %1336 = vmatpush.bf16.msra.mxu0 %v785_v63  ;;  %1348 = vmatpush.bf16.msrb.mxu1 %v1133_v61 }
 0x1ad   : >> { %976 = vrot.lane.b32.xlu1 %v7344_v54, %s9883_s19  ;;  %1086 = vrot.lane.b32.xlu2 %v7349_v62, %s9883_s19  ;;  %v7355_v42 = vpop.permute.xlu0 %1020 }
 0x1ae   : >> { %v7357_v47 = vpop.permute.xlu1 %804  ;;  %v1126_v20 = vsel %vm1096_vm9, %v7001_v39, %v7355_v42  ;;  %v7377_v39 = vor.u32 %v6089_v58, %v5424_v50 }
 0x1af   : >> { %v7362_v26 = vpop.permute.xlu2 %1072 }
 0x1b0   : >> { %1349 = vmatpush.bf16.msrb.mxu1 %v1126_v20  ;;  %5428 = vmatmul.msk.bf16.vlgmr.msrb.gmra.mxu0 %vm1258_vm6, %v7377_v39  ;;  %v7397_v20 = vsel %vm659_vm0, %v6908_v0, %v7222_v4  ;;  %v910_v0 = vsel %vm907_vm8, %v7136_v34, %v7206_v56 }
 0x1b3   : >> { %806 = vrot.lane.b32.xlu0 %v6751_v14, %s9884_s11 }
 0x1b4   : >> { %1350 = vmatpush.bf16.msrb.mxu1 %v1119_v1 }
 0x1b5   : >> { %922 = vrot.lane.b32.xlu1 %v7128_v27, %s9874_s28  ;;  %775 = vrot.lane.b32.xlu2 %v6751_v14, %s9885_s24  ;;  %v7381_v60 = vpop.permute.xlu0 %593 }
 0x1b6   : >> { %v7383_v13 = vpop.permute.xlu1 %556 }
 0x1b7   : >> { %v7387_v63 = vpop.permute.xlu2 %1038  ;;  %v567_v61 = vsel %vm564_vm7, %v7155_v2, %v7383_v13 }
 0x1b8   : >> { %1377 = vmatpush.bf16.msrb.mxu3 %v567_v61 }
 0x1bb   : >> { %901 = vrot.lane.b32.xlu0 %v6767_v17, %s9878_s20 }
 0x1bc   : >> { %1378 = vmatpush.bf16.msrb.mxu3 %v7047_v29  ;;  %v879_v29 = vsel %vm876_vm11, %v7109_v7, %v7242_v12  ;;  %v848_v7 = vsel %vm845_vm12, %v7240_v15, %v7226_v9 }
 0x1bd   : >> { %1074 = vrot.lane.b32.xlu1 %v7397_v20, %s9883_s19  ;;  %560 = vrot.lane.b32.xlu2 %v6767_v17, %s9879_s27  ;;  %v7404_v1 = vpop.permute.xlu0 %1084 }
 0x1be   : >> { %v7406_v2 = vpop.permute.xlu1 %1054  ;;  %v1154_v58 = vsel %vm1096_vm9, %v7208_v41, %v7404_v1 }
 0x1bf   : >> { %v7411_v50 = vpop.permute.xlu2 %742  ;;  %1367 = vmatpush.bf16.msrb.mxu2 %v1154_v58  ;;  %v786_v58 = vsel %vm783_vm14, %v7324_v32, %v7326_v43 }
 0x1c0   : >> { %1379 = vmatpush.bf16.msrb.mxu3 %v7094_v36 }
 0x1c2   : >> { %5429 = vmatmul.msk.bf16.vlgmr.msrb.gmra.mxu2 %vm1258_vm6, %v7377_v39 }
 0x1c3   : >> { %1388 = vmatpush.bf16.msra.mxu2 %v910_v0  ;;  %960 = vrot.lane.b32.xlu0 %v6751_v14, %s9883_s19  ;;  %v6088_v0 = vld [vmem:[%s9789_s1 + $0x4] sm:$0xf] }
 0x1c4   : >> { %1380 = vmatpush.bf16.msrb.mxu3 %v7165_v46 }
 0x1c5   : >> { %688 = vrot.lane.b32.xlu1 %v7128_v27, %s9875_s0  ;;  %744 = vrot.lane.b32.xlu2 %v6751_v14, %s9887_s13  ;;  %v741_v36 = vpop.permute.xlu0 %740 }
 0x1c6   : >> { %v7429_v34 = vpop.permute.xlu1 %988  ;;  %v754_v41 = vsel %vm752_vm15, %v7220_v57, %v741_v36 }
 0x1c7   : >> { %1389 = vmatpush.bf16.msra.mxu2 %v879_v29  ;;  %v7433_v61 = vpop.permute.xlu2 %626  ;;  %1337 = vmatpush.bf16.msra.mxu0 %v754_v41  ;;  %v1112_v46 = vsel %vm1096_vm9, %v7063_v10, %v7429_v34  ;;  %v817_v10 = vsel %vm9854_vm13, %v7289_v18, %v7357_v47  ;;  %v7467_v18 = vsel %vm628_vm1, %v6982_v30, %v7322_v5  ;;  %vm9895_vm13 = vcmask 785408  }
 0x1c8   : >> { %1351 = vmatpush.bf16.msrb.mxu1 %v1112_v46  ;;  %1381 = vmatpush.bf16.msrb.mxu3 %v6688_v3  ;;  %v1148_v30 = vsel %vm1096_vm9, %v7174_v16, %v7244_v38  ;;  %v1141_v16 = vsel %vm1096_vm9, %v7138_v37, %v7406_v2  ;;  %v7511_v41 = vsel %vm690_vm10, %v7176_v59, %v7297_v44 }
 0x1c9   : >> { %v1134_v46 = vsel %vm1096_vm9, %v7178_v21, %v7387_v63  ;;  %v1149_v59 = vsel %vm1096_vm9, %v7244_v38, %v7362_v26 }
 0x1cb   : >> { %1390 = vmatpush.bf16.msra.mxu2 %v848_v7  ;;  %870 = vrot.lane.b32.xlu0 %v6767_v17, %s9880_s14 }
 0x1cc   : >> { %1430 = vmatpush.bf16.msra.mxu3 %v7028_v52 }
 0x1cd   : >> { %1382 = vmatmul.bf16.vlgmr.msrb.gmra.mxu3 %v7187_v49  ;;  %839 = vrot.lane.b32.xlu1 %v6767_v17, %s9882_s18  ;;  %v7453_v3 = vpop.permute.xlu0 %941 }
 0x1ce   : >> { %903 = vrot.lane.b32.xlu2 %v6959_v23, %s9878_s20  ;;  %v710_v52 = vpop.permute.xlu1 %709  ;;  %v950_v37 = vsel %vm945_vm2, %v7003_v40, %v7453_v3 }
 0x1cf   : >> { %1391 = vmatpush.bf16.msra.mxu2 %v817_v10  ;;  %v7456_v57 = vpop.permute.xlu2 %711  ;;  %v723_v15 = vsel %vm721_vm3, %v7259_v8, %v710_v52  ;;  %v7476_v8 = vsel %vm9895_vm13, %v7032_v53, %v7381_v60 }
 0x1d0   : >> { %1431 = vmatpush.bf16.msra.mxu3 %v7077_v25  ;;  %1338 = vmatpush.bf16.msra.mxu0 %v723_v15  ;;  %v755_v25 = vsel %vm752_vm15, %v741_v36, %v7411_v50  ;;  %v724_v29 = vsel %vm721_vm3, %v710_v52, %v7456_v57 }
 0x1d3   : >> { %1392 = vmatpush.bf16.msra.mxu2 %v786_v58  ;;  %1058 = vrot.lane.b32.xlu0 %v7467_v18, %s9883_s19 }
 0x1d4   : >> { %1432 = vmatpush.bf16.msra.mxu3 %v7116_v24  ;;  %1339 = vmatpush.bf16.msra.mxu0 %v6997_v31  ;;  %v5416_v31 = vld [vmem:[%s9789_s1 + $0x10] sm:$0xf0] }
 0x1d5   : >> { %1042 = vrot.lane.b32.xlu1 %v7476_v8, %s9883_s19  ;;  %v7486_v24 = vpop.permute.xlu0 %657  ;;  %v7500_v36 = vor.u32 %v6088_v0, %v5416_v31 }
 0x1d6   : >> { %808 = vrot.lane.b32.xlu2 %v6767_v17, %s9884_s11  ;;  %v7488_v32 = vpop.permute.xlu1 %686 }
 0x1d7   : >> { %1393 = vmatpush.bf16.msra.mxu2 %v755_v25  ;;  %v7490_v53 = vpop.permute.xlu2 %595  ;;  %1284 = vmatmul.bf16.vlgmr.msra.gmra.mxu1 %v7500_v36  ;;  %v7567_v58 = vsel %vm690_vm10, %v7297_v44, %v7488_v32  ;;  %v7587_v44 = vsel %vm628_vm1, %v7322_v5, %v7433_v61  ;;  %vm9898_vm1 = vmmov %vm9895_vm13 }
 0x1d8   : >> { %1402 = vmatpush.bf16.msrb.mxu0 %v1148_v30 }
 0x1d9   : >> { %1340 = vmatmul.bf16.vlgmr.msra.gmra.mxu0 %v7500_v36 }
 0x1db   : >> { %1394 = vmatpush.bf16.msra.mxu2 %v724_v29  ;;  %713 = vrot.lane.b32.xlu0 %v6751_v14, %s9889_s22 }
 0x1dc   : >> { %1403 = vmatpush.bf16.msrb.mxu0 %v1141_v16 }
 0x1dd   : >> { %1088 = vrot.lane.b32.xlu1 %v7511_v41, %s9883_s19  ;;  %v7527_v7 = vpop.permute.xlu0 %534 }
 0x1de   : >> { %1026 = vrot.lane.b32.xlu2 %v950_v37, %s9883_s19  ;;  %v7529_v10 = vpop.permute.xlu1 %1056 }
 0x1df   : >> { %1395 = vmatpush.bf16.msra.mxu2 %v7070_v19  ;;  %v7531_v52 = vpop.permute.xlu2 %899  ;;  %v1142_v40 = vsel %vm1096_vm9, %v7406_v2, %v7529_v10  ;;  %v7544_v19 = vsel %vm659_vm0, %v7222_v4, %v7486_v24  ;;  %v7562_v4 = vsel %vm536_vm4, %v7105_v45, %v7527_v7  ;;  %vm9896_vm0 = vcmask 1039360  }
 0x1e0   : >> { %1404 = vmatpush.bf16.msrb.mxu0 %v1134_v46 }
 0x1e2   : >> { %1396 = vmatmul.bf16.vlgmr.msra.gmra.mxu2 %v7500_v36 }
 0x1e3   : >> { %1458 = vmatpush.bf16.msrb.mxu2 %v1149_v59  ;;  %872 = vrot.lane.b32.xlu0 %v6959_v23, %s9880_s14 }
 0x1e5   : >> { %841 = vrot.lane.b32.xlu1 %v6959_v23, %s9882_s18  ;;  %v7548_v21 = vpop.permute.xlu0 %972 }
 0x1e6   : >> { %1076 = vrot.lane.b32.xlu2 %v7544_v19, %s9883_s19  ;;  %v7550_v38 = vpop.permute.xlu1 %506  ;;  %v1105_v2 = vsel %vm1096_vm9, %v7107_v51, %v7548_v21 }
 0x1e7   : >> { %1459 = vmatpush.bf16.msrb.mxu2 %v1142_v40  ;;  %v7555_v15 = vpop.permute.xlu2 %943  ;;  %1352 = vmatpush.bf16.msrb.mxu1 %v1105_v2  ;;  %v7615_v59 = vsel %vm508_vm5, %v7124_v6, %v7550_v38 }
 0x1eb   : >> { %777 = vrot.lane.b32.xlu0 %v6767_v17, %s9885_s24 }
 0x1ed   : >> { %1010 = vrot.lane.b32.xlu1 %v7562_v4, %s9883_s19  ;;  %v1023_v51 = vpop.permute.xlu0 %1022 }
 0x1ee   : >> { %1090 = vrot.lane.b32.xlu2 %v7567_v58, %s9883_s19  ;;  %v7573_v25 = vpop.permute.xlu1 %1040  ;;  %v1127_v30 = vsel %vm1096_vm9, %v7355_v42, %v1023_v51 }
 0x1ef   : >> { %v7577_v0 = vpop.permute.xlu2 %1008  ;;  %1405 = vmatpush.bf16.msrb.mxu0 %v1127_v30  ;;  %v1135_v45 = vsel %vm1096_vm9, %v7387_v63, %v7573_v25 }
 0x1f0   : >> { %1460 = vmatpush.bf16.msrb.mxu2 %v1135_v45  ;;  %v911_v45 = vsel %vm907_vm8, %v7206_v56, %v7531_v52 }
 0x1f3   : >> { %562 = vrot.lane.b32.xlu0 %v6959_v23, %s9879_s27 }
 0x1f5   : >> { %810 = vrot.lane.b32.xlu1 %v6959_v23, %s9884_s11  ;;  %v957_v42 = vpop.permute.xlu0 %956 }
 0x1f6   : >> { %1060 = vrot.lane.b32.xlu2 %v7587_v44, %s9883_s19  ;;  %v7593_v31 = vpop.permute.xlu1 %478  ;;  %v1098_v63 = vsel %vm1096_vm9, %v7085_v35, %v957_v42 }
 0x1f7   : >> { %v7597_v29 = vpop.permute.xlu2 %837  ;;  %1353 = vmatpush.bf16.msrb.mxu1 %v1098_v63  ;;  %v7622_v40 = vsel %vm9896_vm0, %v7204_v48, %v7593_v31  ;;  %v7647_v63 = vsel %vm9898_vm1, %v7381_v60, %v7490_v53  ;;  %vm9913_vm1 = vmmov %vm9896_vm0 }
 0x1fa   : >> { %1354 = vmatmul.bf16.vlgmr.msrb.gmra.mxu1 %v7301_v33 }
 0x1fb   : >> { %746 = vrot.lane.b32.xlu0 %v6767_v17, %s9887_s13 }
 0x1fd   : >> { %715 = vrot.lane.b32.xlu1 %v6767_v17, %s9889_s22  ;;  %v1007_v5 = vpop.permute.xlu0 %1006 }
 0x1fe   : >> { %779 = vrot.lane.b32.xlu2 %v6959_v23, %s9885_s24  ;;  %v559_v16 = vpop.permute.xlu1 %558  ;;  %v1120_v37 = vsel %vm1096_vm9, %v7263_v55, %v1007_v5  ;;  %v9897_v55 = vld [vmem:[#allocation18_spill] sm:$0xff] }
 0x1ff   : >> { %v7608_v35 = vpop.permute.xlu2 %958  ;;  %1406 = vmatpush.bf16.msrb.mxu0 %v1120_v37  ;;  %v568_v46 = vsel %vm564_vm7, %v7383_v13, %v559_v16 }
 0x200   : >> { %1433 = vmatpush.bf16.msra.mxu3 %v568_v46  ;;  %v9900_v46 = vld [vmem:[#allocation15_spill] sm:$0xff] }
 0x203   : >> { %994 = vrot.lane.b32.xlu0 %v7615_v59, %s9883_s19 }
 0x204   : >> { %1434 = vmatpush.bf16.msra.mxu3 %v9897_v55  ;;  %v951_v55 = vsel %vm945_vm2, %v7453_v3, %v7555_v15  ;;  %vm9904_vm2 = vcmask 506880  }
 0x205   : >> { %978 = vrot.lane.b32.xlu1 %v7622_v40, %s9883_s19  ;;  %v7627_v13 = vpop.permute.xlu0 %1024  ;;  %vm9907_vm13 = vmmov %vm9904_vm2 }
 0x206   : >> { %748 = vrot.lane.b32.xlu2 %v6959_v23, %s9887_s13  ;;  %v7631_v6 = vpop.permute.xlu1 %868  ;;  %v1128_v2 = vsel %vm1096_vm9, %v1023_v51, %v7627_v13  ;;  %v1121_v51 = vsel %vm1096_vm9, %v1007_v5, %v7577_v0 }
 0x207   : >> { %v7635_v30 = vpop.permute.xlu2 %1086  ;;  %1461 = vmatpush.bf16.msrb.mxu2 %v1128_v2  ;;  %v880_v56 = vsel %vm876_vm11, %v7242_v12, %v7631_v6  ;;  %v849_v12 = vsel %vm845_vm12, %v7226_v9, %v7597_v29 }
 0x208   : >> { %1435 = vmatpush.bf16.msra.mxu3 %v7273_v28  ;;  %v1155_v48 = vsel %vm1096_vm9, %v7404_v1, %v7635_v30  ;;  %v9899_v28 = vld [vmem:[#allocation20_spill] sm:$0xff] }
 0x209   : >> { %1423 = vmatpush.bf16.msra.mxu1 %v1155_v48  ;;  %v1099_v48 = vsel %vm1096_vm9, %v957_v42, %v7608_v35 }
 0x20b   : >> { %1044 = vrot.lane.b32.xlu0 %v7647_v63, %s9883_s19  ;;  %1462 = vmatpush.bf16.msrb.mxu2 %v1121_v51 }
 0x20c   : >> { %1436 = vmatpush.bf16.msra.mxu3 %v9899_v28  ;;  %5430 = vmatmul.msk.bf16.vlgmr.msra.gmra.mxu1 %vm1258_vm6, %v7377_v39 }
 0x20d   : >> { %1444 = vmatpush.bf16.msrb.mxu1 %v911_v45  ;;  %962 = vrot.lane.b32.xlu1 %v6767_v17, %s9883_s19  ;;  %v991_v1 = vpop.permute.xlu0 %990 }
 0x20e   : >> { %717 = vrot.lane.b32.xlu2 %v6959_v23, %s9889_s22  ;;  %v975_v60 = vpop.permute.xlu1 %974  ;;  %v1113_v5 = vsel %vm1096_vm9, %v7429_v34, %v991_v1 }
 0x20f   : >> { %v7665_v37 = vpop.permute.xlu2 %775  ;;  %1407 = vmatpush.bf16.msrb.mxu0 %v1113_v5  ;;  %v1106_v2 = vsel %vm1096_vm9, %v7548_v21, %v975_v60  ;;  %v9902_v21 = vld [vmem:[#allocation17_spill] sm:$0xff] }
 0x210   : >> { %1437 = vmatpush.bf16.msra.mxu3 %v6729_v11  ;;  %v9901_v11 = vld [vmem:[#allocation16_spill] sm:$0xff] }
 0x211   : >> { %1445 = vmatpush.bf16.msrb.mxu1 %v880_v56 }
 0x213   : >> { %1028 = vrot.lane.b32.xlu0 %v951_v55, %s9883_s19  ;;  %1408 = vmatpush.bf16.msrb.mxu0 %v1106_v2 }
 0x214   : >> { %1486 = vmatpush.bf16.msrb.mxu3 %v9900_v46  ;;  %v9903_v46 = vld [vmem:[#allocation19_spill] sm:$0xff] }
 0x215   : >> { %1446 = vmatpush.bf16.msrb.mxu1 %v849_v12  ;;  %1438 = vmatmul.bf16.vlgmr.msra.gmra.mxu3 %v7187_v49  ;;  %v7680_v34 = vpop.permute.xlu0 %928 }
 0x216   : >> { %v930_v51 = vsel %vm536_vm4, %v7527_v7, %v7680_v34  ;;  %vm9905_vm4 = vmmov %vm9896_vm0 }
 0x217   : >> { %v926_v9 = vpop.permute.xlu1 %925  ;;  %v7684_v45 = vpop.permute.xlu2 %560  ;;  %1409 = vmatpush.bf16.msrb.mxu0 %v1099_v48 }
 0x218   : >> { %1487 = vmatpush.bf16.msrb.mxu3 %v9901_v11  ;;  %v927_v3 = vsel %vm508_vm5, %v7550_v38, %v926_v9  ;;  %v569_v42 = vsel %vm564_vm7, %v559_v16, %v7684_v45 }
 0x219   : >> { %996 = vrot.lane.b32.xlu1 %v927_v3, %s9883_s19 }
 0x21a   : >> { %1410 = vmatmul.bf16.vlgmr.msrb.gmra.mxu0 %v7301_v33 }
 0x21b   : >> { %1012 = vrot.lane.b32.xlu0 %v930_v51, %s9883_s19 }
 0x21c   : >> { %1488 = vmatpush.bf16.msrb.mxu3 %v9902_v21 }
 0x21d   : >> { %v7697_v28 = vpop.permute.xlu0 %992 }
 0x21e   : >> { %v1114_v5 = vsel %vm1096_vm9, %v991_v1, %v7697_v28 }
 0x21f   : >> { %v7699_v56 = vpop.permute.xlu1 %976  ;;  %v7703_v12 = vpop.permute.xlu2 %744  ;;  %1463 = vmatpush.bf16.msrb.mxu2 %v1114_v5 }
 0x220   : >> { %1489 = vmatpush.bf16.msrb.mxu3 %v569_v42  ;;  %v1107_v55 = vsel %vm1096_vm9, %v975_v60, %v7699_v56  ;;  %v756_v3 = vsel %vm752_vm15, %v7411_v50, %v7703_v12 }
 0x221   : >> { %964 = vrot.lane.b32.xlu1 %v6959_v23, %s9883_s19 }
 0x223   : >> { %905 = vrot.lane.b32.xlu0 %v7128_v27, %s9878_s20  ;;  %1464 = vmatpush.bf16.msrb.mxu2 %v1107_v55 }
 0x224   : >> { %1490 = vmatpush.bf16.msrb.mxu3 %v9903_v46 }
 0x225   : >> { %v7713_v16 = vpop.permute.xlu0 %806 }
 0x226   : >> { %v818_v2 = vsel %vm9904_vm2, %v7357_v47, %v7713_v16 }
 0x227   : >> { %v7715_v1 = vpop.permute.xlu1 %922  ;;  %1447 = vmatpush.bf16.msrb.mxu1 %v818_v2 }
 0x228   : >> { %1491 = vmatpush.bf16.msrb.mxu3 %v7337_v22  ;;  %v7720_v11 = vpop.permute.xlu2 %903  ;;  %v924_v60 = vsel %vm9905_vm4, %v7593_v31, %v7715_v1  ;;  %v787_v22 = vsel %vm783_vm14, %v7326_v43, %v7665_v37  ;;  %vm9915_vm4 = vmmov %vm9896_vm0 }
 0x229   : >> { %980 = vrot.lane.b32.xlu2 %v924_v60, %s9883_s19  ;;  %874 = vrot.lane.b32.xlu1 %v7128_v27, %s9880_s14 }
 0x22b   : >> { %1448 = vmatpush.bf16.msrb.mxu1 %v787_v22 }
 0x22c   : >> { %1492 = vmatpush.bf16.msrb.mxu3 %v7344_v54 }
 0x22d   : >> { %v902_v47 = vpop.permute.xlu0 %901 }
 0x22e   : >> { %v913_v21 = vsel %vm907_vm8, %v902_v47, %v7720_v11 }
 0x22f   : >> { %v7733_v48 = vpop.permute.xlu1 %1074  ;;  %1449 = vmatpush.bf16.msrb.mxu1 %v756_v3 }
 0x230   : >> { %1493 = vmatpush.bf16.msrb.mxu3 %v6751_v14  ;;  %v7740_v51 = vpop.permute.xlu2 %808  ;;  %v6544_v14 = vmov 0  }
 0x231   : >> { %1078 = vrot.lane.b32.xlu2 %v7486_v24, %s9883_s19  ;;  %1046 = vrot.lane.b32.xlu1 %v7490_v53, %s9883_s19 }
 0x232   : >> { %6280 = vset.pattern.permute.xlu1 %v6544_v14  ;;  %6279 = vset.pattern.permute.xlu0 %v6544_v14 }
 0x233   : >> { %1494 = vmatmul.bf16.vlgmr.msrb.gmra.mxu3 %v7187_v49  ;;  %6351 = vset.pattern.permute.xlu2 %v6544_v14 }
 0x234   : >> { %1556 = vmatpush.bf16.msra.mxu3 %v913_v21  ;;  %v1227_v21 = vld [vmem:[%s9790_s2] sm:$0xff] }
 0x235   : >> { %v7750_v43 = vpop.permute.xlu0 %960 }
 0x236   : >> { %v1100_v50 = vsel %vm1096_vm9, %v7608_v35, %v7750_v43 }
 0x237   : >> { %v689_v54 = vpop.permute.xlu1 %688  ;;  %1465 = vmatpush.bf16.msrb.mxu2 %v1100_v50 }
 0x238   : >> { %v7755_v24 = vpop.permute.xlu2 %1026  ;;  %v7759_v53 = vsel %vm690_vm10, %v7488_v32, %v689_v54  ;;  %vm9906_vm10 = vmmov %vm9904_vm2 }
 0x239   : >> { %1062 = vrot.lane.b32.xlu2 %v7433_v61, %s9883_s19  ;;  %781 = vrot.lane.b32.xlu1 %v7128_v27, %s9885_s24 }
 0x23a   : >> { %1092 = vrot.lane.b32.xlu0 %v7759_v53, %s9883_s19  ;;  %1466 = vmatmul.bf16.vlgmr.msrb.gmra.mxu2 %v7301_v33 }
 0x23d   : >> { %v871_v42 = vpop.permute.xlu0 %870 }
 0x23f   : >> { %v840_v35 = vpop.permute.xlu1 %839 }
 0x240   : >> { %v7768_v5 = vpop.permute.xlu2 %1076 }
 0x241   : >> { %812 = vrot.lane.b32.xlu2 %v7128_v27, %s9884_s11  ;;  %998 = vrot.lane.b32.xlu1 %v926_v9, %s9883_s19  ;;  %v1228_v9 = vld [vmem:[%s9790_s2 + $0x8] sm:$0xff] }
 0x242   : >> { %843 = vrot.lane.b32.xlu0 %v7128_v27, %s9882_s18 }
 0x245   : >> { %v7775_v61 = vpop.permute.xlu0 %1058 }
 0x247   : >> { %v7777_v32 = vpop.permute.xlu1 %1042 }
 0x248   : >> { %v7779_v46 = vpop.permute.xlu2 %1090 }
 0x249   : >> { %966 = vrot.lane.b32.xlu1 %v7128_v27, %s9883_s19  ;;  %1014 = vrot.lane.b32.xlu2 %v7680_v34, %s9883_s19 }
 0x24a   : >> { %1030 = vrot.lane.b32.xlu0 %v7555_v15, %s9883_s19  ;;  %v912_v15 = vsel %vm907_vm8, %v7531_v52, %v902_v47 }
 0x24d   : >> { %v7787_v55 = vpop.permute.xlu0 %713 }
 0x24e   : >> { %v725_v60 = vsel %vm721_vm3, %v7456_v57, %v7787_v55  ;;  %v1150_v57 = vsel %vm1096_vm9, %v7362_v26, %v7733_v48  ;;  %v1143_v26 = vsel %vm1096_vm9, %v7529_v10, %v7775_v61  ;;  %v819_v10 = vsel %vm9906_vm10, %v7713_v16, %v7740_v51  ;;  %vm9916_vm10 = vmmov %vm9896_vm0 }
 0x24f   : >> { %v1089_v2 = vpop.permute.xlu1 %1088  ;;  %1450 = vmatpush.bf16.msrb.mxu1 %v725_v60 }
 0x250   : >> { %v1156_v22 = vsel %vm1096_vm9, %v7635_v30, %v1089_v2  ;;  %v1157_v34 = vsel %vm1096_vm9, %v1089_v2, %v7779_v46  ;;  %v7805_v3 = vpop.permute.xlu2 %1060 }
 0x251   : >> { %1236 = vperm.xlu1 %6280, %v1228_v9   ;;  %1479 = vmatpush.bf16.msra.mxu0 %v1156_v22 }
 0x252   : >> { %750 = vrot.lane.b32.xlu0 %v7128_v27, %s9887_s13  ;;  %719 = vrot.lane.b32.xlu2 %v7128_v27, %s9889_s22  ;;  %v881_v27 = vsel %vm876_vm11, %v7631_v6, %v871_v42  ;;  %v850_v6 = vsel %vm845_vm12, %v7597_v29, %v840_v35 }
 0x253   : >> { %1535 = vmatpush.bf16.msra.mxu2 %v1157_v34  ;;  %1451 = vmatpush.bf16.msrb.mxu1 %v7349_v62 }
 0x254   : >> { %5431 = vmatmul.msk.bf16.vlgmr.msra.gmra.mxu0 %vm1258_vm6, %v7377_v39 }
 0x255   : >> { %1500 = vmatpush.bf16.msrb.mxu0 %v912_v15  ;;  %v7816_v52 = vpop.permute.xlu0 %872 }
 0x256   : >> { %5432 = vmatmul.msk.bf16.vlgmr.msra.gmra.mxu2 %vm1258_vm6, %v7377_v39  ;;  %1452 = vmatmul.bf16.vlgmr.msrb.gmra.mxu1 %v7500_v36  ;;  %v882_v62 = vsel %vm876_vm11, %v871_v42, %v7816_v52 }
 0x257   : >> { %1542 = vmatpush.bf16.msrb.mxu2 %v7397_v20  ;;  %1514 = vmatpush.bf16.msra.mxu1 %v1150_v57  ;;  %v7820_v20 = vpop.permute.xlu1 %841 }
 0x258   : >> { %1557 = vmatpush.bf16.msra.mxu3 %v882_v62  ;;  %v851_v30 = vsel %vm845_vm12, %v840_v35, %v7820_v20  ;;  %v7836_v47 = vpop.permute.xlu2 %779 }
 0x259   : >> { %1501 = vmatpush.bf16.msrb.mxu0 %v881_v27 }
 0x25a   : >> { %982 = vrot.lane.b32.xlu0 %v7715_v1, %s9883_s19  ;;  %1094 = vrot.lane.b32.xlu2 %v689_v54, %s9883_s19  ;;  %s6547_s19 = smov 122  }
 0x25b   : >> { %1543 = vmatpush.bf16.msrb.mxu2 %v7467_v18  ;;  %1515 = vmatpush.bf16.msra.mxu1 %v1143_v26  ;;  %v1136_v18 = vsel %vm1096_vm9, %v7573_v25, %v7777_v32 }
 0x25c   : >> { %1558 = vmatpush.bf16.msra.mxu3 %v851_v30 }
 0x25d   : >> { %1502 = vmatpush.bf16.msrb.mxu0 %v850_v6  ;;  %v778_v1 = vpop.permute.xlu0 %777 }
 0x25e   : >> { %v788_v25 = vsel %vm783_vm14, %v7665_v37, %v778_v1 }
 0x25f   : >> { %1544 = vmatpush.bf16.msrb.mxu2 %v7476_v8  ;;  %1516 = vmatpush.bf16.msra.mxu1 %v1136_v18  ;;  %v7845_v29 = vpop.permute.xlu1 %1010  ;;  %v1129_v8 = vsel %vm1096_vm9, %v7627_v13, %v7755_v24  ;;  %v7932_v18 = vpop.f32.mrf.mxu2 }
 0x260   : >> { %v1122_v16 = vsel %vm1096_vm9, %v7577_v0, %v7845_v29  ;;  %v7858_v54 = vpop.permute.xlu2 %748  ;;  %v789_v0 = vsel %vm783_vm14, %v778_v1, %v7836_v47 }
 0x261   : >> { %1503 = vmatpush.bf16.msrb.mxu0 %v819_v10 }
 0x262   : >> { %1231 = vperm.xlu0 %6279, %v1227_v21   ;;  %v7938_v21 = vpop.f32.mrf.mxu1 }
 0x263   : >> { %1517 = vmatpush.bf16.msra.mxu1 %v1129_v8 }
 0x265   : >> { %1504 = vmatpush.bf16.msrb.mxu0 %v788_v25  ;;  %v7860_v50 = vpop.permute.xlu0 %562 }
 0x266   : >> { %v570_v13 = vsel %vm564_vm7, %v7684_v45, %v7860_v50 }
 0x267   : >> { %1518 = vmatpush.bf16.msra.mxu1 %v1122_v16  ;;  %v7862_v42 = vpop.permute.xlu1 %810  ;;  %1545 = vmatpush.bf16.msrb.mxu2 %v570_v13 }
 0x268   : >> { %v820_v37 = vsel %vm9907_vm13, %v7740_v51, %v7862_v42  ;;  %v7877_v60 = vpop.permute.xlu2 %717  ;;  %vm9917_vm13 = vmmov %vm9896_vm0 }
 0x269   : >> { %1559 = vmatpush.bf16.msra.mxu3 %v820_v37 }
 0x26a   : >> { %v7949_v37 = vpop.f32.mrf.mxu1 }
 0x26b   : >> { %1546 = vmatpush.bf16.msrb.mxu2 %v7562_v4 }
 0x26d   : >> { %1560 = vmatpush.bf16.msra.mxu3 %v789_v0  ;;  %v747_v35 = vpop.permute.xlu0 %746 }
 0x26e   : >> { %v757_v2 = vsel %vm752_vm15, %v7703_v12, %v747_v35  ;;  %v758_v45 = vsel %vm752_vm15, %v747_v35, %v7858_v54  ;;  %v7953_v35 = vpop.f32.mrf.mxu3 }
 0x26f   : >> { %v716_v9 = vpop.permute.xlu1 %715  ;;  %1505 = vmatpush.bf16.msrb.mxu0 %v757_v2  ;;  %1547 = vmatpush.bf16.msrb.mxu2 %v7615_v59  ;;  %v1151_v59 = vsel %vm1096_vm9, %v7733_v48, %v7768_v5 }
 0x270   : >> { %v727_v51 = vsel %vm721_vm3, %v716_v9, %v7877_v60  ;;  %v726_v4 = vsel %vm721_vm3, %v7787_v55, %v716_v9  ;;  %v7907_v55 = vpop.f32.mrf.mxu0 }
 0x271   : >> { %1561 = vmatpush.bf16.msra.mxu3 %v758_v45 }
 0x273   : >> { %1506 = vmatpush.bf16.msrb.mxu0 %v726_v4  ;;  %1548 = vmatpush.bf16.msrb.mxu2 %v7622_v40 }
 0x275   : >> { %1562 = vmatpush.bf16.msra.mxu3 %v727_v51  ;;  %v995_v12 = vpop.permute.xlu0 %994 }
 0x276   : >> { %v1115_v34 = vsel %vm1096_vm9, %v7697_v28, %v995_v12  ;;  %v1144_v28 = vsel %vm1096_vm9, %v7775_v61, %v7805_v3 }
 0x277   : >> { %v979_v22 = vpop.permute.xlu1 %978  ;;  %1507 = vmatpush.bf16.msrb.mxu0 %v7511_v41  ;;  %1519 = vmatpush.bf16.msra.mxu1 %v1115_v34  ;;  %v7958_v4 = vpop.f32.mrf.mxu1 }
 0x278   : >> { %1549 = vmatpush.bf16.msrb.mxu2 %v6767_v17  ;;  %v1108_v40 = vsel %vm1096_vm9, %v7699_v56, %v979_v22  ;;  %v7919_v27 = vpop.f32.mrf.mxu0 }
 0x279   : >> { %1563 = vmatpush.bf16.msra.mxu3 %v7567_v58 }
 0x27a   : >> { %1508 = vmatmul.bf16.vlgmr.msrb.gmra.mxu0 %v7500_v36 }
 0x27b   : >> { %1570 = vmatpush.bf16.msra.mxu0 %v1151_v59  ;;  %1520 = vmatpush.bf16.msra.mxu1 %v1108_v40  ;;  %v7964_v59 = vpop.f32.mrf.mxu3 }
 0x27c   : >> { %1564 = vmatmul.bf16.vlgmr.msra.gmra.mxu3 %v7500_v36  ;;  %1550 = vmatmul.bf16.vlgmr.msrb.gmra.mxu2 %v7187_v49 }
 0x27d   : >> { %v1045_v41 = vpop.permute.xlu0 %1044 }
 0x27e   : >> { %v1137_v17 = vsel %vm1096_vm9, %v7777_v32, %v1045_v41 }
 0x27f   : >> { %1571 = vmatpush.bf16.msra.mxu0 %v1144_v28  ;;  %v963_v58 = vpop.permute.xlu1 %962 }
 0x280   : >> { %v1101_v56 = vsel %vm1096_vm9, %v7750_v43, %v963_v58  ;;  %v7940_v8 = vpop.f32.mrf.mxu0 }
 0x281   : >> { %1521 = vmatpush.bf16.msra.mxu1 %v1101_v56 }
 0x283   : >> { %1572 = vmatpush.bf16.msra.mxu0 %v1137_v17  ;;  %v7905_v48 = vpop.permute.xlu2 %980 }
 0x284   : >> { %1522 = vmatmul.bf16.vlgmr.msra.gmra.mxu1 %v7301_v33 }
 0x285   : >> { %v7910_v61 = vpop.permute.xlu0 %1028 }
 0x286   : >> { %v1130_v15 = vsel %vm1096_vm9, %v7755_v24, %v7910_v61 }
 0x287   : >> { %1573 = vmatpush.bf16.msra.mxu0 %v1130_v15  ;;  %v1383_v15 = vpop.f32.mrf.mxu3 }
 0x288   : >> { %v7951_v0 = vpop.f32.mrf.mxu0 }
 0x28b   : >> { %v1079_v57 = vpop.permute.xlu2 %1078  ;;  %v7915_v32 = vpop.permute.xlu1 %996 }
 0x28c   : >> { %v1152_v43 = vsel %vm1096_vm9, %v7768_v5, %v1079_v57  ;;  %v1116_v24 = vsel %vm1096_vm9, %v995_v12, %v7915_v32 }
 0x28d   : >> { %1626 = vmatpush.bf16.msrb.mxu3 %v1152_v43  ;;  %v7921_v62 = vpop.permute.xlu0 %1012 }
 0x28e   : >> { %v1123_v26 = vsel %vm1096_vm9, %v7845_v29, %v7921_v62  ;;  %v1109_v29 = vsel %vm1096_vm9, %v979_v22, %v7905_v48 }
 0x28f   : >> { %1574 = vmatpush.bf16.msra.mxu0 %v1123_v26 }
 0x293   : >> { %v1063_v6 = vpop.permute.xlu2 %1062  ;;  %v7926_v30 = vpop.permute.xlu1 %964  ;;  %1575 = vmatpush.bf16.msra.mxu0 %v1116_v24 }
 0x294   : >> { %v1145_v5 = vsel %vm1096_vm9, %v7805_v3, %v1063_v6  ;;  %v1102_v25 = vsel %vm1096_vm9, %v963_v58, %v7926_v30  ;;  %v1385_v24 = vpop.f32.mrf.mxu3 }
 0x295   : >> { %1627 = vmatpush.bf16.msrb.mxu3 %v1145_v5  ;;  %v906_v10 = vpop.permute.xlu0 %905 }
 0x296   : >> { %v914_v1 = vsel %vm907_vm8, %v7720_v11, %v906_v10  ;;  %v7947_v11 = vpop.f32.mrf.mxu2  ;;  %vm9908_vm8 = vmmov %vm9904_vm2 }
 0x297   : >> { %1576 = vmatpush.bf16.msra.mxu0 %v1109_v29  ;;  %1612 = vmatpush.bf16.msra.mxu2 %v914_v1  ;;  %vm9914_vm2 = vmmov %vm9896_vm0 }
 0x29b   : >> { %v813_v3 = vpop.permute.xlu2 %812  ;;  %v875_v16 = vpop.permute.xlu1 %874  ;;  %1577 = vmatpush.bf16.msra.mxu0 %v1102_v25 }
 0x29c   : >> { %v883_v13 = vsel %vm876_vm11, %v7816_v52, %v875_v16  ;;  %v7960_v52 = vpop.f32.mrf.mxu0 }
 0x29d   : >> { %1613 = vmatpush.bf16.msra.mxu2 %v883_v13 }
 0x29e   : >> { %1578 = vmatmul.bf16.vlgmr.msra.gmra.mxu0 %v7301_v33  ;;  %v7956_v51 = vpop.f32.mrf.mxu2 }
 0x2a3   : >> { %v1047_v9 = vpop.permute.xlu1 %1046  ;;  %v1015_v2 = vpop.permute.xlu2 %1014 }
 0x2a4   : >> { %v1138_v45 = vsel %vm1096_vm9, %v1045_v41, %v1047_v9  ;;  %v7975_v56 = vpop.f32.mrf.mxu0 }
 0x2a5   : >> { %1628 = vmatpush.bf16.msrb.mxu3 %v1138_v45 }
 0x2a6   : >> { %v7970_v28 = vpop.f32.mrf.mxu2 }
 0x2ab   : >> { %v782_v40 = vpop.permute.xlu1 %781 }
 0x2ac   : >> { %v720_v12 = vpop.permute.xlu2 %719  ;;  %v1093_v22 = vpop.permute.xlu0 %1092  ;;  %v790_v43 = vsel %vm783_vm14, %v7836_v47, %v782_v40  ;;  %vm9912_vm14 = vmmov %vm9896_vm0 }
 0x2ad   : >> { %v1158_v34 = vsel %vm1096_vm9, %v7779_v46, %v1093_v22 }
 0x2ae   : >> { %1591 = vmatpush.bf16.msrb.mxu1 %v1158_v34 }
 0x2b1   : >> { %5433 = vmatmul.msk.bf16.vlgmr.msrb.gmra.mxu1 %vm1258_vm6, %v7377_v39 }
 0x2b2   : >> { %1598 = vmatpush.bf16.msra.mxu1 %v7544_v19  ;;  %v7977_v19 = vpop.f32.mrf.mxu1 }
 0x2b3   : >> { %v999_v57 = vpop.permute.xlu1 %998 }
 0x2b4   : >> { %v1095_v41 = vpop.permute.xlu2 %1094  ;;  %v844_v58 = vpop.permute.xlu0 %843 }
 0x2b5   : >> { %v1159_v17 = vsel %vm1096_vm9, %v1093_v22, %v1095_v41  ;;  %v852_v46 = vsel %vm845_vm12, %v7820_v20, %v844_v58  ;;  %vm9911_vm12 = vmmov %vm9896_vm0 }
 0x2b6   : >> { %1599 = vmatpush.bf16.msra.mxu1 %v7587_v44  ;;  %1614 = vmatpush.bf16.msra.mxu2 %v852_v46  ;;  %v821_v44 = vsel %vm9908_vm8, %v7862_v42, %v813_v3  ;;  %v1411_v42 = vpop.f32.mrf.mxu0  ;;  %vm9918_vm8 = vmmov %vm9896_vm0 }
 0x2b7   : >> { %1647 = vmatpush.bf16.msrb.mxu0 %v1159_v17 }
 0x2ba   : >> { %1600 = vmatpush.bf16.msra.mxu1 %v7647_v63  ;;  %5434 = vmatmul.msk.bf16.vlgmr.msrb.gmra.mxu0 %vm1258_vm6, %v7377_v39  ;;  %v1397_v63 = vpop.f32.mrf.mxu2  ;;  %v1425_v6 = vpop.f32.mrf.mxu1  ;;  %v1124_v39 = vsel %vm1096_vm9, %v7921_v62, %v1015_v2  ;;  %v728_v62 = vsel %vm721_vm3, %v7877_v60, %v720_v12  ;;  %vm9909_vm3 = vmmov %vm9896_vm0 }
 0x2bb   : >> { %1615 = vmatpush.bf16.msra.mxu2 %v821_v44  ;;  %v967_v5 = vpop.permute.xlu1 %966 }
 0x2bc   : >> { %v1031_v20 = vpop.permute.xlu0 %1030  ;;  %v1103_v60 = vsel %vm1096_vm9, %v7926_v30, %v967_v5 }
 0x2bd   : >> { %v1131_v26 = vsel %vm1096_vm9, %v7910_v61, %v1031_v20  ;;  %v1117_v61 = vsel %vm1096_vm9, %v7915_v32, %v999_v57 }
 0x2be   : >> { %1601 = vmatpush.bf16.msra.mxu1 %v7860_v50  ;;  %1629 = vmatpush.bf16.msrb.mxu3 %v1131_v26  ;;  %v1413_v10 = vpop.f32.mrf.mxu0 }
 0x2bf   : >> { %1616 = vmatpush.bf16.msra.mxu2 %v790_v43 }
 0x2c2   : >> { %1602 = vmatpush.bf16.msra.mxu1 %v7527_v7  ;;  %1630 = vmatpush.bf16.msrb.mxu3 %v1124_v39  ;;  %v1399_v7 = vpop.f32.mrf.mxu2  ;;  %v1427_v1 = vpop.f32.mrf.mxu1 }
 0x2c4   : >> { %v751_v50 = vpop.permute.xlu0 %750 }
 0x2c5   : >> { %v759_v47 = vsel %vm752_vm15, %v7858_v54, %v751_v50 }
 0x2c6   : >> { %1603 = vmatpush.bf16.msra.mxu1 %v7550_v38  ;;  %1617 = vmatpush.bf16.msra.mxu2 %v759_v47  ;;  %v1439_v38 = vpop.f32.mrf.mxu3 }
 0x2c7   : >> { %1631 = vmatpush.bf16.msrb.mxu3 %v1117_v61 }
 0x2ca   : >> { %1604 = vmatpush.bf16.msra.mxu1 %v7593_v31  ;;  %1618 = vmatpush.bf16.msra.mxu2 %v728_v62  ;;  %v8005_v31 = vpop.permute.xlu1 %1236 }
 0x2cb   : >> { %v1386_v32 = vadd.f32 %v1385_v24, %v8005_v31  ;;  %v1330_v41 = vadd.f32 %v7964_v59, %v8005_v31 }
 0x2cc   : >> { %v983_v29 = vpop.permute.xlu0 %982 }
 0x2cd   : >> { %v1110_v54 = vsel %vm1096_vm9, %v7905_v48, %v983_v29  ;;  %v1400_v16 = vadd.f32 %v1399_v7, %v1386_v32  ;;  %vm9910_vm9 = vmmov %vm9896_vm0 }
 0x2ce   : >> { %1605 = vmatpush.bf16.msra.mxu1 %v6959_v23  ;;  %1619 = vmatpush.bf16.msra.mxu2 %v7759_v53  ;;  %v1467_v23 = vpop.f32.mrf.mxu2  ;;  %v1441_v9 = vpop.f32.mrf.mxu3 }
 0x2cf   : >> { %1632 = vmatpush.bf16.msrb.mxu3 %v1110_v54  ;;  %v1442_v45 = vadd.f32 %v1441_v9, %v8005_v31  ;;  %v1414_v12 = vadd.f32 %v1413_v10, %v1400_v16 }
 0x2d1   : >> { %1606 = vmatmul.bf16.vlgmr.msra.gmra.mxu1 %v7187_v49  ;;  %1620 = vmatmul.bf16.vlgmr.msra.gmra.mxu2 %v7500_v36  ;;  %v1481_v25 = vpop.f32.mrf.mxu0 }
 0x2d3   : >> { %1633 = vmatpush.bf16.msrb.mxu3 %v1103_v60  ;;  %v1453_v48 = vpop.f32.mrf.mxu1 }
 0x2d4   : >> { %v8011_v3 = vpop.permute.xlu0 %1231 }
 0x2d5   : >> { %v1328_v49 = vadd.f32 %v7953_v35, %v8011_v3  ;;  %v1440_v53 = vadd.f32 %v1439_v38, %v8011_v3  ;;  %v1384_v13 = vadd.f32 %v1383_v15, %v8011_v3  ;;  %v1274_v35 = vadd.f32 %v7919_v27, %v8005_v31 }
 0x2d6   : >> { %1634 = vmatmul.bf16.vlgmr.msrb.gmra.mxu3 %v7301_v33  ;;  %v1469_v46 = vpop.f32.mrf.mxu2  ;;  %v8032_v15 = vadd.f32 %v1427_v1, %v1414_v12  ;;  %v1495_v61 = vpop.f32.mrf.mxu3  ;;  %v1272_v60 = vadd.f32 %v7907_v55, %v8011_v3 }
 0x2d7   : >> { %v1454_v36 = vadd.f32 %v1453_v48, %v1440_v53  ;;  %v1398_v2 = vadd.f32 %v1397_v63, %v1384_v13  ;;  %v1342_v30 = vadd.f32 %v7960_v52, %v1328_v49  ;;  %v1288_v43 = vadd.f32 %v7949_v37, %v1274_v35 }
 0x2d8   : >> { %v1663_v26 = vmax.f32 %v8032_v15, 0.0  ;;  %v1496_v1 = vadd.f32 %v1495_v61, %v8011_v3  ;;  %v1286_v13 = vadd.f32 %v7938_v21, %v1272_v60 }
 0x2d9   : >> { %v1468_v22 = vadd.f32 %v1467_v23, %v1454_v36  ;;  %v1412_v34 = vadd.f32 %v1411_v42, %v1398_v2  ;;  %v1356_v40 = vadd.f32 %v7958_v4, %v1342_v30  ;;  %v1483_v27 = vpop.f32.mrf.mxu0 }
 0x2da   : >> { %v1300_v55 = vadd.f32 %v7932_v18, %v1286_v13 }
 0x2db   : >> { %v8025_v58 = vadd.f32 %v1425_v6, %v1412_v34  ;;  %v8027_v33 = vadd.f32 %v1481_v25, %v1468_v22  ;;  %v8030_v17 = vadd.f32 %v7956_v51, %v1356_v40  ;;  %v1455_v52 = vpop.f32.mrf.mxu1  ;;  %v1344_v51 = vadd.f32 %v7975_v56, %v1330_v41 }
 0x2dc   : >> { %v1456_v57 = vadd.f32 %v1455_v52, %v1442_v45  ;;  %v1302_v6 = vadd.f32 %v7947_v11, %v1288_v43  ;;  %v8082_v52 = vadd.f32 %v7940_v8, %v1300_v55 }
 0x2dd   : >> { %v1656_v44 = vmax.f32 %v8025_v58, 0.0  ;;  %v1657_v4 = vmax.f32 %v8027_v33, 0.0  ;;  %v1358_v39 = vadd.f32 %v7977_v19, %v1344_v51 }
 0x2de   : >> { %v1470_v20 = vadd.f32 %v1469_v46, %v1456_v57  ;;  %v8054_v37 = vadd.f32 %v7951_v0, %v1302_v6  ;;  %v1537_v19 = vpop.f32.mrf.mxu2  ;;  %v1497_v62 = vpop.f32.mrf.mxu3 }
 0x2df   : >> { %v6281_v59 = vpack.i.bf16 %v1657_v4, %v1656_v44  ;;  %v8057_v56 = vadd.f32 %v7970_v28, %v1358_v39  ;;  %v1498_v16 = vadd.f32 %v1497_v62, %v8005_v31 }
 0x2e0   : >> { %v8044_v63 = vadd.f32 %v1483_v27, %v1470_v20  ;;  %v1661_v50 = vmax.f32 %v8054_v37, 0.0  ;;  %v1655_v20 = vmax.f32 %v8030_v17, 0.0 }
 0x2e1   : >> { %6282 = vrot.lane.b32.xlu2 %v6281_v59, %s9874_s28  ;;  %v1662_v47 = vmax.f32 %v8057_v56, 0.0  ;;  %v1654_v59 = vmax.f32 %v8082_v52, 0.0 }
 0x2e2   : >> { %v1664_v42 = vmax.f32 %v8044_v63, 0.0 }
 0x2e3   : >> { %v6306_v11 = vpack.i.bf16 %v1662_v47, %v1661_v50  ;;  %v6301_v39 = vpack.i.bf16 %v1655_v20, %v1654_v59 }
 0x2e4   : >> { %v6291_v24 = vpack.i.bf16 %v1664_v42, %v1663_v26 }
 0x2e6   : >> { %v1539_v7 = vpop.f32.mrf.mxu2 }
 0x2e9   : >> { %6292 = vrot.lane.b32.xlu2 %v6291_v24, %s9874_s28 }
 0x2f1   : >> { %6307 = vrot.lane.b32.xlu2 %v6306_v11, %s9874_s28 }
 0x2f7   : >> { %v1509_v5 = vpop.f32.mrf.mxu0 }
 0x2f8   : >> { %v1510_v54 = vadd.f32 %v1509_v5, %v1496_v1 }
 0x2ff   : >> { %v1511_v10 = vpop.f32.mrf.mxu0  ;;  %v1551_v28 = vpop.f32.mrf.mxu2 }
 0x300   : >> { %v1552_v38 = vadd.f32 %v1551_v28, %v8011_v3  ;;  %v1565_v29 = vpop.f32.mrf.mxu3  ;;  %v1512_v36 = vadd.f32 %v1511_v10, %v1498_v16 }
 0x301   : >> { %v1523_v0 = vpop.f32.mrf.mxu1 }
 0x302   : >> { %v1566_v23 = vadd.f32 %v1565_v29, %v1552_v38  ;;  %v1524_v48 = vadd.f32 %v1523_v0, %v1510_v54 }
 0x304   : >> { %v8071_v9 = vadd.f32 %v1537_v19, %v1524_v48 }
 0x306   : >> { %v1658_v22 = vmax.f32 %v8071_v9, 0.0 }
 0x307   : >> { %v1553_v49 = vpop.f32.mrf.mxu2 }
 0x308   : >> { %v1554_v2 = vadd.f32 %v1553_v49, %v8005_v31  ;;  %v1567_v30 = vpop.f32.mrf.mxu3 }
 0x309   : >> { %v1525_v32 = vpop.f32.mrf.mxu1 }
 0x30a   : >> { %v1526_v34 = vadd.f32 %v1525_v32, %v1512_v36  ;;  %v1568_v40 = vadd.f32 %v1567_v30, %v1554_v2 }
 0x30c   : >> { %v8084_v46 = vadd.f32 %v1539_v7, %v1526_v34 }
 0x30e   : >> { %v1665_v43 = vmax.f32 %v8084_v46, 0.0 }
 0x31b   : >> { %v1579_v25 = vpop.f32.mrf.mxu0 }
 0x31c   : >> { %v1580_v53 = vadd.f32 %v1579_v25, %v1566_v23 }
 0x323   : >> { %v1581_v41 = vpop.f32.mrf.mxu0 }
 0x324   : >> { %v1582_v57 = vadd.f32 %v1581_v41, %v1568_v40 }
 0x32e   : >> { %v1593_v45 = vpop.f32.mrf.mxu1 }
 0x32f   : >> { %v8074_v12 = vadd.f32 %v1593_v45, %v1580_v53 }
 0x331   : >> { %v1659_v35 = vmax.f32 %v8074_v12, 0.0 }
 0x333   : >> { %v6286_v21 = vpack.i.bf16 %v1659_v35, %v1658_v22 }
 0x335   : >> { %6287 = vrot.lane.b32.xlu1 %v6286_v21, %s9874_s28 }
 0x336   : >> { %v1595_v27 = vpop.f32.mrf.mxu1 }
 0x337   : >> { %v8087_v18 = vadd.f32 %v1595_v27, %v1582_v57  ;;  %v1649_v29 = vpop.f32.mrf.mxu0 }
 0x339   : >> { %v1666_v51 = vmax.f32 %v8087_v18, 0.0 }
 0x33b   : >> { %v6296_v8 = vpack.i.bf16 %v1666_v51, %v1665_v43  ;;  %v8097_v6 = vpop.permute.xlu2 %6282 }
 0x33c   : >> { %v6284_v52 = vunpack.i.l.bf16 %v8097_v6 }
 0x33d   : >> { %6297 = vrot.lane.b32.xlu0 %v6296_v8, %s9874_s28  ;;  %6302 = vrot.lane.b32.xlu1 %v6301_v39, %s9874_s28 }
 0x33f   : >> { %v1651_v16 = vpop.f32.mrf.mxu0 }
 0x343   : >> { %v6293_v24 = vpop.permute.xlu2 %6292 }
 0x344   : >> { %v6295_v56 = vunpack.i.h.bf16 %v6293_v24  ;;  %v6294_v11 = vunpack.i.l.bf16 %v6293_v24 }
 0x346   : >> { %v1719_v17 = vsel %vm9909_vm3, %v6294_v11, %v6295_v56  ;;  %vm9919_vm3 = vmmov %vm9896_vm0 }
 0x34b   : >> { %v6308_v19 = vpop.permute.xlu2 %6307 }
 0x34c   : >> { %v6310_v61 = vunpack.i.h.bf16 %v6308_v19  ;;  %v6309_v5 = vunpack.i.l.bf16 %v6308_v19  ;;  %v6285_v19 = vunpack.i.h.bf16 %v8097_v6 }
 0x34e   : >> { %v1717_v7 = vsel %vm9910_vm9, %v6309_v5, %v6310_v61  ;;  %v1718_v0 = vsel %vm9911_vm12, %v6310_v61, %v6294_v11  ;;  %v1607_v28 = vpop.f32.mrf.mxu1  ;;  %vm9920_vm9 = vcmask 785408  }
 0x34f   : >> { %v8106_v62 = vmax.f32 %v1661_v50, %v1717_v7  ;;  %v8108_v10 = vmax.f32 %v1662_v47, %v1718_v0  ;;  %v1608_v32 = vadd.f32 %v1607_v28, %v8011_v3  ;;  %vm9921_vm12 = vmmov %vm9920_vm9 }
 0x351   : >> { %v6321_v1 = vpack.i.bf16 %v8108_v10, %v8106_v62 }
 0x353   : >> { %6322 = vrot.lane.b32.xlu2 %v6321_v1, %s9886_s12 }
 0x354   : >> { %v1621_v38 = vpop.f32.mrf.mxu2 }
 0x355   : >> { %v1622_v23 = vadd.f32 %v1621_v38, %v1608_v32 }
 0x356   : >> { %v1609_v60 = vpop.f32.mrf.mxu1 }
 0x357   : >> { %v1610_v37 = vadd.f32 %v1609_v60, %v8005_v31  ;;  %v8119_v31 = vmax.f32 %v1663_v26, %v1719_v17 }
 0x359   : >> { %v1635_v54 = vpop.f32.mrf.mxu3 }
 0x35a   : >> { %v1636_v50 = vadd.f32 %v1635_v54, %v1622_v23 }
 0x35c   : >> { %v1623_v25 = vpop.f32.mrf.mxu2  ;;  %v1650_v49 = vadd.f32 %v1649_v29, %v1636_v50 }
 0x35d   : >> { %v1624_v48 = vadd.f32 %v1623_v25, %v1610_v37 }
 0x35e   : >> { %v1660_v9 = vmax.f32 %v1650_v49, 0.0 }
 0x361   : >> { %v1637_v47 = vpop.f32.mrf.mxu3 }
 0x362   : >> { %v1638_v53 = vadd.f32 %v1637_v47, %v1624_v48 }
 0x364   : >> { %v1652_v13 = vadd.f32 %v1651_v16, %v1638_v53 }
 0x366   : >> { %v1667_v36 = vmax.f32 %v1652_v13, 0.0 }
 0x368   : >> { %v6311_v2 = vpack.i.bf16 %v1667_v36, %v1660_v9 }
 0x36a   : >> { %6312 = vrot.lane.b32.xlu0 %v6311_v2, %s9874_s28  ;;  %s6546_s28 = smov 58  }
 0x3a7   : >> { %v6288_v30 = vpop.permute.xlu1 %6287 }
 0x3a8   : >> { %v6290_v45 = vunpack.i.h.bf16 %v6288_v30  ;;  %v6289_v3 = vunpack.i.l.bf16 %v6288_v30 }
 0x3aa   : >> { %v1715_v55 = vsel %vm9912_vm14, %v6289_v3, %v6290_v45  ;;  %v1714_v0 = vsel %vm9916_vm10, %v6285_v19, %v6289_v3  ;;  %vm9922_vm14 = vmmov %vm9920_vm9 }
 0x3ab   : >> { %v8121_v34 = vmax.f32 %v1658_v22, %v1715_v55  ;;  %v1740_v63 = vmax.f32 %v1657_v4, %v1714_v0 }
 0x3ad   : >> { %v6331_v40 = vpack.i.bf16 %v8119_v31, %v8121_v34  ;;  %v6323_v54 = vpop.permute.xlu2 %6322 }
 0x3ae   : >> { %v6325_v60 = vunpack.i.h.bf16 %v6323_v54  ;;  %v6324_v18 = vunpack.i.l.bf16 %v6323_v54 }
 0x3af   : >> { %6332 = vrot.lane.b32.xlu2 %v6331_v40, %s9886_s12  ;;  %v6303_v41 = vpop.permute.xlu1 %6302  ;;  %v6298_v21 = vpop.permute.xlu0 %6297 }
 0x3b0   : >> { %v6305_v57 = vunpack.i.h.bf16 %v6303_v41  ;;  %v6304_v27 = vunpack.i.l.bf16 %v6303_v41  ;;  %v6300_v8 = vunpack.i.h.bf16 %v6298_v21  ;;  %v6299_v39 = vunpack.i.l.bf16 %v6298_v21 }
 0x3b1   : >> { %v1800_v37 = vsel %vm9921_vm12, %v6324_v18, %v6325_v60  ;;  %vm9932_vm12 = vcmask 506880  }
 0x3b2   : >> { %v1712_v24 = vsel %vm9896_vm0, %v6305_v57, %v6284_v52  ;;  %v1711_v15 = vsel %vm9913_vm1, %v6304_v27, %v6305_v57  ;;  %v1720_v11 = vsel %vm9914_vm2, %v6295_v56, %v6299_v39  ;;  %v1721_v17 = vsel %vm9915_vm4, %v6299_v39, %v6300_v8  ;;  %vm9923_vm0 = vmmov %vm9920_vm9 }
 0x3b3   : >> { %v1738_v26 = vmax.f32 %v1655_v20, %v1712_v24  ;;  %v1737_v22 = vmax.f32 %v1654_v59, %v1711_v15  ;;  %v8134_v61 = vmax.f32 %v1664_v42, %v1720_v11  ;;  %v8138_v5 = vmax.f32 %v1665_v43, %v1721_v17  ;;  %vm9924_vm1 = vmmov %vm9923_vm0 }
 0x3b4   : >> { %v1713_v20 = vsel %vm9917_vm13, %v6284_v52, %v6285_v19  ;;  %v1827_v47 = vmax.f32 %v8106_v62, %v1800_v37  ;;  %vm9925_vm2 = vmmov %vm9923_vm0 }
 0x3b5   : >> { %v6316_v7 = vpack.i.bf16 %v1738_v26, %v1737_v22  ;;  %v6336_v59 = vpack.i.bf16 %v8138_v5, %v8134_v61  ;;  %v1739_v42 = vmax.f32 %v1656_v44, %v1713_v20  ;;  %vm9926_vm4 = vmmov %vm9923_vm0 }
 0x3b6   : >> { %vm9927_vm10 = vmmov %vm9923_vm0 }
 0x3b7   : >> { %6317 = vrot.lane.b32.xlu1 %v6316_v7, %s9886_s12  ;;  %6337 = vrot.lane.b32.xlu0 %v6336_v59, %s9886_s12  ;;  %v6326_v46 = vpack.i.bf16 %v1740_v63, %v1739_v42  ;;  %vm9928_vm13 = vmmov %vm9923_vm0 }
 0x3bf   : >> { %6327 = vrot.lane.b32.xlu1 %v6326_v46, %s9886_s12 }
 0x3dc   : >> { %v6313_v43 = vpop.permute.xlu0 %6312 }
 0x3dd   : >> { %v6315_v6 = vunpack.i.h.bf16 %v6313_v43  ;;  %v6314_v56 = vunpack.i.l.bf16 %v6313_v43 }
 0x3df   : >> { %v8151_v28 = vmax.f32 %v1667_v36, %v6315_v6  ;;  %v1716_v1 = vsel %vm9918_vm8, %v6290_v45, %v6314_v56  ;;  %v8154_v38 = vmax.f32 %v1660_v9, %v6314_v56  ;;  %v1722_v29 = vsel %vm9919_vm3, %v6300_v8, %v6315_v6  ;;  %vm9929_vm8 = vmmov %vm9923_vm0 }
 0x3e0   : >> { %v8159_v33 = vmax.f32 %v1659_v35, %v1716_v1  ;;  %v8163_v58 = vmax.f32 %v1666_v51, %v1722_v29  ;;  %vm9930_vm3 = vmmov %vm9923_vm0 }
 0x3e2   : >> { %v6341_v44 = vpack.i.bf16 %v8154_v38, %v8159_v33  ;;  %v6346_v4 = vpack.i.bf16 %v8151_v28, %v8163_v58 }
 0x3e4   : >> { %6347 = vrot.lane.b32.xlu1 %v6346_v4, %s9886_s12  ;;  %6342 = vrot.lane.b32.xlu0 %v6341_v44, %s9886_s12  ;;  %s6545_s12 = smov 120  }
 0x409   : >> { %v8171_v32 = vpop.permute.xlu2 %6332 }
 0x40a   : >> { %v6335_v12 = vunpack.i.h.bf16 %v8171_v32 }
 0x40c   : >> { %v1801_v51 = vsel %vm9920_vm9, %v6325_v60, %v6335_v12  ;;  %vm9931_vm9 = vmmov %vm9923_vm0 }
 0x40d   : >> { %v1828_v50 = vmax.f32 %v8108_v10, %v1801_v51  ;;  %v6334_v10 = vunpack.i.l.bf16 %v8171_v32 }
 0x40f   : >> { %v1838_v53 = vpack.c.bf16 %v1828_v50, %v1827_v47 }
 0x411   : >> { %v1853_v30 = vunpack.c.l.b16 %v1838_v53  ;;  %v1854_v3 = vunpack.c.h.b16 %v1838_v53 }
 0x429   : >> { %v6318_v35 = vpop.permute.xlu1 %6317  ;;  %v6338_v45 = vpop.permute.xlu0 %6337 }
 0x42a   : >> { %v6320_v23 = vunpack.i.h.bf16 %v6318_v35  ;;  %v6319_v25 = vunpack.i.l.bf16 %v6318_v35  ;;  %v6340_v21 = vunpack.i.h.bf16 %v6338_v45  ;;  %v6339_v52 = vunpack.i.l.bf16 %v6338_v45 }
 0x42c   : >> { %v1794_v16 = vsel %vm9922_vm14, %v6319_v25, %v6320_v23  ;;  %v1802_v39 = vsel %vm9926_vm4, %v6335_v12, %v6339_v52  ;;  %v1803_v24 = vsel %vm9927_vm10, %v6339_v52, %v6340_v21  ;;  %vm1936_vm14 = vcmask 982016   ;;  %vm9933_vm4 = vmmov %vm9932_vm12 }
 0x42d   : >> { %v1820_v9 = vmax.f32 %v1737_v22, %v1794_v16  ;;  %v1829_v22 = vmax.f32 %v8119_v31, %v1802_v39  ;;  %v1830_v11 = vmax.f32 %v8134_v61, %v1803_v24  ;;  %vm9934_vm10 = vmmov %vm9933_vm4 }
 0x42f   : >> { %v1839_v19 = vpack.c.bf16 %v1830_v11, %v1829_v22 }
 0x431   : >> { %v6328_v48 = vpop.permute.xlu1 %6327  ;;  %v1856_v0 = vunpack.c.h.b16 %v1839_v19  ;;  %v1855_v61 = vunpack.c.l.b16 %v1839_v19 }
 0x432   : >> { %v6329_v49 = vunpack.i.l.bf16 %v6328_v48  ;;  %v6330_v55 = vunpack.i.h.bf16 %v6328_v48 }
 0x434   : >> { %v1795_v13 = vsel %vm9923_vm0, %v6320_v23, %v6329_v49  ;;  %v1797_v27 = vsel %vm9924_vm1, %v6330_v55, %v6334_v10  ;;  %v1796_v8 = vsel %vm9925_vm2, %v6329_v49, %v6330_v55  ;;  %vm1916_vm0 = vcmask 998400  }
 0x435   : >> { %v1821_v36 = vmax.f32 %v1738_v26, %v1795_v13  ;;  %v1823_v15 = vmax.f32 %v1740_v63, %v1797_v27  ;;  %v1822_v26 = vmax.f32 %v1739_v42, %v1796_v8  ;;  %vm2050_vm1 = vcmask 457728  }
 0x436   : >> { %vm2027_vm2 = vcmask 474112  }
 0x437   : >> { %v1834_v2 = vpack.c.bf16 %v1821_v36, %v1820_v9  ;;  %v1835_v17 = vpack.c.bf16 %v1823_v15, %v1822_v26 }
 0x439   : >> { %v1848_v40 = vunpack.c.l.b16 %v1834_v2  ;;  %v1849_v41 = vunpack.c.h.b16 %v1834_v2  ;;  %v1851_v7 = vunpack.c.h.b16 %v1835_v17  ;;  %v1850_v31 = vunpack.c.l.b16 %v1835_v17 }
 0x43b   : >> { %v8181_v62 = vpack.c.b16 %v1853_v30, %v1848_v40  ;;  %v8183_v57 = vpack.c.b16 %v1854_v3, %v1849_v41  ;;  %v8203_v59 = vpack.c.b16 %v1856_v0, %v1851_v7  ;;  %v8211_v20 = vpack.c.b16 %v1855_v61, %v1850_v31 }
 0x43d   : >> { %1995 = vrot.lane.b32.xlu2 %v8183_v57, %s9880_s14  ;;  %1993 = vrot.lane.b32.xlu1 %v8181_v62, %s9880_s14 }
 0x43e   : >> { %1926 = vrot.lane.b32.xlu0 %v8181_v62, %s6545_s12 }
 0x445   : >> { %1951 = vrot.lane.b32.xlu2 %v8183_v57, %s9887_s13  ;;  %1971 = vrot.lane.b32.xlu1 %v8181_v62, %s9884_s11 }
 0x446   : >> { %2017 = vrot.lane.b32.xlu0 %v8183_v57, %s6546_s28 }
 0x44d   : >> { %1973 = vrot.lane.b32.xlu2 %v8183_v57, %s9884_s11  ;;  %1949 = vrot.lane.b32.xlu1 %v8181_v62, %s9887_s13 }
 0x44e   : >> { %1912 = vrot.lane.b32.xlu0 %v8203_v59, %s6547_s19 }
 0x455   : >> { %1928 = vrot.lane.b32.xlu2 %v8183_v57, %s6545_s12  ;;  %1889 = vrot.lane.b32.xlu1 %v8183_v57, %s9879_s27 }
 0x456   : >> { %v6348_v63 = vpop.permute.xlu1 %6347  ;;  %v6343_v42 = vpop.permute.xlu0 %6342  ;;  %1891 = vrot.lane.b32.xlu0 %v8211_v20, %s9879_s27 }
 0x457   : >> { %v6350_v46 = vunpack.i.h.bf16 %v6348_v63  ;;  %v6349_v43 = vunpack.i.l.bf16 %v6348_v63  ;;  %v6345_v6 = vunpack.i.h.bf16 %v6343_v42  ;;  %v6344_v56 = vunpack.i.l.bf16 %v6343_v42 }
 0x459   : >> { %v1804_v1 = vsel %vm9928_vm13, %v6340_v21, %v6349_v43  ;;  %v1805_v29 = vsel %vm9929_vm8, %v6349_v43, %v6350_v46  ;;  %v1798_v54 = vsel %vm9930_vm3, %v6334_v10, %v6344_v56  ;;  %v1799_v32 = vsel %vm9931_vm9, %v6344_v56, %v6345_v6  ;;  %vm9935_vm13 = vmmov %vm9933_vm4 }
 0x45a   : >> { %v1831_v44 = vmax.f32 %v8138_v5, %v1804_v1  ;;  %v1832_v4 = vmax.f32 %v8163_v58, %v1805_v29  ;;  %v1824_v12 = vmax.f32 %v8121_v34, %v1798_v54  ;;  %v1825_v35 = vmax.f32 %v8159_v33, %v1799_v32  ;;  %v5437_v1 = vld [vmem:[%s9791_s3] sm:$0xf]  ;;  %v6094_v29 = vld [vmem:[%s9791_s3 + $0xc] sm:$0xf0]  ;;  %vm9937_vm8 = vmmov %vm9933_vm4 }
 0x45b   : >> { %v1833_v48 = vmax.f32 %v8151_v28, %v6350_v46  ;;  %v1826_v47 = vmax.f32 %v8154_v38, %v6345_v6  ;;  %v8405_v54 = vor.u32 %v6094_v29, %v5437_v1 }
 0x45c   : >> { %v1840_v60 = vpack.c.bf16 %v1832_v4, %v1831_v44  ;;  %v1836_v18 = vpack.c.bf16 %v1825_v35, %v1824_v12  ;;  %v2138_v44 = vld [vmem:[%s9792_s4 + $0x10] sm:$0xff]  ;;  %v2137_v4 = vld [vmem:[%s9792_s4 + $0x8] sm:$0xff] }
 0x45d   : >> { %1908 = vrot.lane.b32.xlu2 %v8183_v57, %s6547_s19  ;;  %1906 = vrot.lane.b32.xlu1 %v8181_v62, %s6547_s19  ;;  %v1841_v9 = vpack.c.bf16 %v1833_v48, %v1833_v48  ;;  %v1837_v36 = vpack.c.bf16 %v1826_v47, %v1826_v47 }
 0x45e   : >> { %v1857_v51 = vunpack.c.l.b16 %v1840_v60  ;;  %v1947_v5 = vunpack.c.h.b16 %v1840_v60  ;;  %1953 = vrot.lane.b32.xlu0 %v8211_v20, %s9887_s13  ;;  %v1852_v58 = vunpack.c.l.b16 %v1836_v18  ;;  %v1946_v23 = vunpack.c.h.b16 %v1836_v18 }
 0x45f   : >> { %v2085_v28 = vunpack.c.l.b16 %v1841_v9  ;;  %v2084_v38 = vunpack.c.l.b16 %v1837_v36  ;;  %v5445_v9 = vld [vmem:[%s9791_s3 + $0x8] sm:$0xf]  ;;  %v6095_v36 = vld [vmem:[%s9791_s3 + $0x14] sm:$0xf0] }
 0x460   : >> { %v8233_v25 = vpack.c.b16 %v1857_v51, %v1852_v58  ;;  %v8235_v34 = vpack.c.b16 %v1947_v5, %v1946_v23  ;;  %v6093_v5 = vld [vmem:[%s9791_s3 + $0xc] sm:$0xf]  ;;  %v5447_v58 = vld [vmem:[%s9791_s3 + $0x18] sm:$0xf0] }
 0x461   : >> { %v8319_v55 = vpack.c.b16 %v2085_v28, %v2084_v38 }
 0x465   : >> { %2040 = vrot.lane.b32.xlu2 %v8183_v57, %s6548_s15  ;;  %1893 = vrot.lane.b32.xlu1 %v8203_v59, %s9879_s27 }
 0x466   : >> { %1872 = vrot.lane.b32.xlu0 %v8211_v20, %s9876_s23 }
 0x46d   : >> { %1874 = vrot.lane.b32.xlu1 %v8203_v59, %s9876_s23  ;;  %1910 = vrot.lane.b32.xlu2 %v8211_v20, %s6547_s19 }
 0x46e   : >> { %1930 = vrot.lane.b32.xlu0 %v8211_v20, %s6545_s12 }
 0x475   : >> { %2019 = vrot.lane.b32.xlu1 %v8211_v20, %s6546_s28  ;;  %1870 = vrot.lane.b32.xlu2 %v8183_v57, %s9876_s23 }
 0x476   : >> { %2042 = vrot.lane.b32.xlu0 %v8211_v20, %s6548_s15 }
 0x47d   : >> { %1997 = vrot.lane.b32.xlu1 %v8211_v20, %s9880_s14  ;;  %1887 = vrot.lane.b32.xlu2 %v8181_v62, %s9879_s27 }
 0x47e   : >> { %1932 = vrot.lane.b32.xlu0 %v8203_v59, %s6545_s12 }
 0x485   : >> { %2038 = vrot.lane.b32.xlu1 %v8181_v62, %s6548_s15  ;;  %1868 = vrot.lane.b32.xlu2 %v8181_v62, %s9876_s23 }
 0x486   : >> { %1975 = vrot.lane.b32.xlu0 %v8211_v20, %s9884_s11 }
 0x48d   : >> { %1914 = vrot.lane.b32.xlu1 %v8233_v25, %s6547_s19  ;;  %2015 = vrot.lane.b32.xlu2 %v8181_v62, %s6546_s28 }
 0x48e   : >> { %1955 = vrot.lane.b32.xlu0 %v8203_v59, %s9887_s13 }
 0x495   : >> { %2044 = vrot.lane.b32.xlu1 %v8203_v59, %s6548_s15  ;;  %1895 = vrot.lane.b32.xlu2 %v8233_v25, %s9879_s27 }
 0x496   : >> { %1876 = vrot.lane.b32.xlu0 %v8233_v25, %s9876_s23 }
 0x497   : >> { %v8279_v33 = vpop.permute.xlu2 %1995 }
 0x49d   : >> { %1934 = vrot.lane.b32.xlu1 %v8233_v25, %s6545_s12  ;;  %2021 = vrot.lane.b32.xlu2 %v8203_v59, %s6546_s28 }
 0x49e   : >> { %1999 = vrot.lane.b32.xlu0 %v8203_v59, %s9880_s14 }
 0x49f   : >> { %v1952_v37 = vpop.permute.xlu2 %1951 }
 0x4a5   : >> { %2072 = vrot.lane.b32.xlu1 %v8235_v34, %s6547_s19  ;;  %1977 = vrot.lane.b32.xlu2 %v8203_v59, %s9884_s11 }
 0x4a6   : >> { %1957 = vrot.lane.b32.xlu0 %v8233_v25, %s9887_s13 }
 0x4a7   : >> { %v8293_v50 = vpop.permute.xlu2 %1973 }
 0x4ad   : >> { %2046 = vrot.lane.b32.xlu1 %v8233_v25, %s6548_s15  ;;  %2067 = vrot.lane.b32.xlu2 %v8235_v34, %s9879_s27 }
 0x4ae   : >> { %2062 = vrot.lane.b32.xlu0 %v8235_v34, %s9876_s23 }
 0x4af   : >> { %v8303_v16 = vpop.permute.xlu2 %1928  ;;  %v1994_v49 = vpop.permute.xlu1 %1993 }
 0x4b0   : >> { %v2005_v53 = vsel %vm876_vm11, %v1994_v49, %v8279_v33  ;;  %v1927_v13 = vpop.permute.xlu0 %1926  ;;  %v5453_v49 = vld [vmem:[%s9791_s3 + $0x20] sm:$0xf] }
 0x4b1   : >> { %2204 = vmatpush.bf16.msra.mxu0 %v2005_v53  ;;  %v1937_v52 = vsel %vm1936_vm14, %v1927_v13, %v8303_v16  ;;  %v6098_v53 = vld [vmem:[%s9791_s3 + $0x2c] sm:$0xf0] }
 0x4b5   : >> { %2077 = vrot.lane.b32.xlu1 %v8235_v34, %s6545_s12  ;;  %2023 = vrot.lane.b32.xlu2 %v8233_v25, %s6546_s28 }
 0x4b6   : >> { %2001 = vrot.lane.b32.xlu0 %v8233_v25, %s9880_s14 }
 0x4b7   : >> { %v8313_v2 = vpop.permute.xlu2 %1908  ;;  %v1972_v30 = vpop.permute.xlu1 %1971 }
 0x4b8   : >> { %v8315_v45 = vpop.permute.xlu0 %2017  ;;  %v1983_v3 = vsel %vm9932_vm12, %v1972_v30, %v8293_v50 }
 0x4b9   : >> { %2205 = vmatpush.bf16.msra.mxu0 %v1983_v3  ;;  %v8484_v3 = vor.u32 %v6095_v36, %v5445_v9 }
 0x4bd   : >> { %2118 = vrot.lane.b32.xlu1 %v8319_v55, %s6547_s19  ;;  %1979 = vrot.lane.b32.xlu2 %v8233_v25, %s9884_s11 }
 0x4be   : >> { %1959 = vrot.lane.b32.xlu0 %v8235_v34, %s9887_s13 }
 0x4bf   : >> { %v8327_v40 = vpop.permute.xlu2 %2040  ;;  %v1950_v41 = vpop.permute.xlu1 %1949 }
 0x4c0   : >> { %v8329_v10 = vpop.permute.xlu0 %1912  ;;  %v1961_v21 = vsel %vm752_vm15, %v1950_v41, %v1952_v37  ;;  %v6092_v41 = vld [vmem:[%s9791_s3 + $0x4] sm:$0xf] }
 0x4c1   : >> { %2206 = vmatpush.bf16.msra.mxu0 %v1961_v21  ;;  %v5439_v21 = vld [vmem:[%s9791_s3 + $0x10] sm:$0xf0] }
 0x4c5   : >> { %2207 = vmatpush.bf16.msra.mxu0 %v1937_v52  ;;  %2048 = vrot.lane.b32.xlu1 %v8235_v34, %s6548_s15  ;;  %v8494_v52 = vor.u32 %v6092_v41, %v5439_v21 }
 0x4c6   : >> { %2108 = vrot.lane.b32.xlu0 %v8319_v55, %s9876_s23  ;;  %2113 = vrot.lane.b32.xlu2 %v8319_v55, %s9879_s27 }
 0x4c7   : >> { %v1890_v27 = vpop.permute.xlu1 %1889  ;;  %v1911_v8 = vpop.permute.xlu2 %1910 }
 0x4c8   : >> { %v1892_v39 = vpop.permute.xlu0 %1891  ;;  %v8342_v24 = vsel %vm1916_vm0, %v1911_v8, %v8329_v10  ;;  %v8410_v32 = vsel %vm1916_vm0, %v8313_v2, %v1911_v8 }
 0x4c9   : >> { %2242 = vmatpush.bf16.msrb.mxu2 %v8342_v24  ;;  %v8420_v60 = vsel %vm564_vm7, %v1890_v27, %v1892_v39 }
 0x4cd   : >> { %2123 = vrot.lane.b32.xlu1 %v8319_v55, %s6545_s12 }
 0x4ce   : >> { %2003 = vrot.lane.b32.xlu0 %v8235_v34, %s9880_s14  ;;  %2025 = vrot.lane.b32.xlu2 %v8235_v34, %s6546_s28 }
 0x4cf   : >> { %v1907_v15 = vpop.permute.xlu1 %1906  ;;  %v1871_v26 = vpop.permute.xlu2 %1870 }
 0x4d0   : >> { %v8351_v22 = vpop.permute.xlu0 %1953  ;;  %v1917_v11 = vsel %vm1916_vm0, %v1907_v15, %v8313_v2 }
 0x4d1   : >> { %v8357_v17 = vsel %vm752_vm15, %v1952_v37, %v8351_v22  ;;  %2208 = vmatpush.bf16.msra.mxu0 %v1917_v11 }
 0x4d2   : >> { %2223 = vmatpush.bf16.msrb.mxu1 %v8357_v17 }
 0x4d5   : >> { %2103 = vrot.lane.b32.xlu1 %v8319_v55, %s6548_s15  ;;  %s5611_s15 = sshll.u32 %s6525_s29, 5  ;;  %s418_s29 = sadd.s32 1, %s6525_s29  }
 0x4d6   : >> { %2087 = vrot.lane.b32.xlu0 %v8319_v55, %s9887_s13  ;;  %1981 = vrot.lane.b32.xlu2 %v8235_v34, %s9884_s11  ;;  %p415_p11 = scmp.ge.s32.totalorder %s418_s29, 4  }
 0x4d7   : >> { %v8366_v19 = vpop.permute.xlu1 %1893  ;;  %v1888_v7 = vpop.permute.xlu2 %1887  ;;  %vm3290_vm3 = vcmask (%p415_p11), 1044480   ;;  %vm3265_vm9 = vcmask (%p415_p11), 1041409   ;;  %vm3268_vm12 = vcmask (%p415_p11), 1042434   ;;  %s9938_s17 = sld [smem:[#allocation22_spill]] (%p415_p11)  ;;  %s6075_s21 = sshll.u32 (%p415_p11), %s6636_s25, 2 }
 0x4d8   : >> { %v1873_v0 = vpop.permute.xlu0 %1872  ;;  %v1897_v31 = vsel %vm564_vm7, %v1888_v7, %v1890_v27  ;;  %v8371_v61 = vsel %vm564_vm7, %v1892_v39, %v8366_v19  ;;  %v5463_v27 = vld [vmem:[%s9791_s3 + $0x38] sm:$0xf0]  ;;  %v6099_v7 = vld [vmem:[%s9791_s3 + $0x34] sm:$0xf0]  ;;  %s9939_s0 = sld [smem:[#allocation7_spill]] (%p415_p11)  ;;  %s9943_s12 = scalar_lea.vmem (%p415_p11), [#allocation3], %s6667_s16 }
 0x4d9   : >> { %2209 = vmatpush.bf16.msra.mxu0 %v1897_v31  ;;  %2243 = vmatpush.bf16.msrb.mxu2 %v8371_v61  ;;  %v8430_v18 = vsel %vm508_vm5, %v1871_v26, %v1873_v0  ;;  %s9941_s26 = sld [smem:[#allocation24_spill]] (%p415_p11) }
 0x4da   : > { %s9942_s18 = sld [smem:[#allocation23_spill]] (%p415_p11) }
 0x4dd   : >> { %2091 = vrot.lane.b32.xlu1 %v8319_v55, %s9884_s11  ;;  %s3225_s11 = scalar_lea.vmem [#allocation2], %s5611_s15  ;;  %s9944_s15 = smov (%p415_p11), %s9943_s12 }
 0x4de   : >> { %2095 = vrot.lane.b32.xlu0 %v8319_v55, %s9880_s14  ;;  %2099 = vrot.lane.b32.xlu2 %v8319_v55, %s6546_s28  ;;  %s5300_s28 = sshll.u32 (%p415_p11), %s9943_s12, 4  ;;  %s5301_s28 = int_to_ptr.vmem [resolvable:$true] %s5300_s28 }
 0x4df   : >> { %v8380_v63 = vpop.permute.xlu1 %1874  ;;  %v1869_v42 = vpop.permute.xlu2 %1868  ;;  %s5298_s24 = scalar_lea.hbm (%p415_p11), %s9941_s26, %s6075_s21 }
 0x4e0   : >> { %v1931_v46 = vpop.permute.xlu0 %1930  ;;  %v1878_v43 = vsel %vm508_vm5, %v1869_v42, %v1871_v26  ;;  %v8385_v6 = vsel %vm508_vm5, %v1873_v0, %v8380_v63  ;;  %s5302_s19 = sshll.u32 (%p415_p11), %s5298_s24, 4  ;;  %s5303_s19 = int_to_ptr.hbm [resolvable:$true] %s5302_s19 }
 0x4e1   : >> { %2210 = vmatpush.bf16.msra.mxu0 %v1878_v43  ;;  %v8389_v56 = vsel %vm1936_vm14, %v8303_v16, %v1931_v46  ;;  %2244 = vmatpush.bf16.msrb.mxu2 %v8385_v6  ;;  %v8456_v16 = vor.u32 %v6093_v5, %v5447_v58  ;;  %v6096_v43 = vld [vmem:[%s9791_s3 + $0x24] sm:$0xf]  ;;  %s6469_s25 = sshra.s32 (%p415_p11), %s5303_s19, 4  ;;  %s6470_s25 = int_to_ptr.hbm [resolvable:$true] %s6469_s25 }
 0x4e2   : >> { %2224 = vmatpush.bf16.msrb.mxu1 %v8389_v56  ;;  %s6471_s14 = scalar_lea.hbm (%p415_p11), %s6470_s25, 4  ;;  %p6476_p1 = scmp.lt.s32.totalorder (%p415_p11), %s6470_s25, %s9941_s26 }
 0x4e3   : > { %p6472_p12 = scmp.ne.s32.totalorder (%p415_p11), %s6470_s25, %s6471_s14 }
 0x4e5   : >> { %2152 = vperm.xlu1 %6280, %v2138_v44   ;;  %2211 = vmatpush.bf16.msra.mxu0 %v8181_v62  ;;  %p6473_p13 = pnand (%p415_p11), %p6472_p12, %p6653_p5 }
 0x4e6   : >> { %2147 = vperm.xlu0 %6279, %v2137_v4   ;;  %2225 = vmatpush.bf16.msrb.mxu1 %v8410_v32 }
 0x4e7   : >> { %2245 = vmatpush.bf16.msrb.mxu2 %v8211_v20  ;;  %v8414_v12 = vpop.permute.xlu1 %2019  ;;  %v2016_v13 = vpop.permute.xlu2 %2015  ;;  %p6474_p0 = pneg (%p415_p11), %p6473_p13 }
 0x4e8   : >> { %v8416_v35 = vpop.permute.xlu0 %2042  ;;  %2212 = vmatmul.bf16.vlgmr.msra.gmra.mxu0 %v8405_v54  ;;  %v8436_v51 = vsel %vm2027_vm2, %v8315_v45, %v8414_v12 }
 0x4e9   : >> { %v8425_v62 = vsel %vm2050_vm1, %v8327_v40, %v8416_v35 }
 0x4ea   : >> { %2226 = vmatpush.bf16.msrb.mxu1 %v8420_v60 }
 0x4eb   : >> { %2246 = vmatpush.bf16.msrb.mxu2 %v8425_v62 }
 0x4ee   : >> { %2227 = vmatpush.bf16.msrb.mxu1 %v8430_v18 }
 0x4ef   : >> { %2247 = vmatpush.bf16.msrb.mxu2 %v8436_v51  ;;  %v8445_v23 = vpop.permute.xlu1 %1997  ;;  %v8504_v8 = vpop.permute.xlu2 %1895 }
 0x4f0   : >> { %v8447_v37 = vpop.permute.xlu0 %1932  ;;  %v2006_v48 = vsel %vm876_vm11, %v8279_v33, %v8445_v23  ;;  %v8466_v33 = vor.u32 %v6098_v53, %v5453_v49 }
 0x4f1   : >> { %v8454_v47 = vsel %vm1936_vm14, %v1931_v46, %v8447_v37 }
 0x4f2   : >> { %2228 = vmatpush.bf16.msrb.mxu1 %v8183_v57  ;;  %2268 = vmatpush.bf16.msra.mxu3 %v8454_v47 }
 0x4f3   : >> { %2248 = vmatpush.bf16.msrb.mxu2 %v2006_v48 }
 0x4f5   : >> { %5467 = vmatmul.msk.bf16.vlgmr.msra.gmra.mxu3 %vm1258_vm6, %v8456_v16 }
 0x4f6   : >> { %2280 = vmatpush.bf16.msrb.mxu3 %v2006_v48 }
 0x4f7   : >> { %v2039_v28 = vpop.permute.xlu1 %2038  ;;  %v8543_v31 = vpop.permute.xlu2 %2021 }
 0x4f8   : >> { %v8476_v38 = vpop.permute.xlu0 %1975  ;;  %2217 = vmatmul.bf16.gmra.mxu0 %v8466_v33  ;;  %v2051_v2 = vsel %vm2050_vm1, %v2039_v28, %v8327_v40  ;;  %v2028_v40 = vsel %vm2027_vm2, %v2016_v13, %v8315_v45 }
 0x4f9   : >> { %2229 = vmatpush.bf16.msrb.mxu1 %v2051_v2  ;;  %v1984_v30 = vsel %vm9933_vm4, %v8293_v50, %v8476_v38  ;;  %v6097_v50 = vld [vmem:[%s9791_s3 + $0x2c] sm:$0xf] }
 0x4fa   : >> { %2249 = vmatpush.bf16.msrb.mxu2 %v1984_v30  ;;  %2281 = vmatpush.bf16.msrb.mxu3 %v1984_v30  ;;  %v8517_v11 = vor.u32 %v6097_v50, %v5463_v27 }
 0x4fd   : >> { %2250 = vmatmul.bf16.vlgmr.msrb.gmra.mxu2 %v8484_v3  ;;  %2230 = vmatpush.bf16.msrb.mxu1 %v2028_v40 }
 0x4fe   : >> { %2282 = vmatpush.bf16.msrb.mxu3 %v8357_v17  ;;  %v2136_v17 = vld [vmem:[%s9792_s4] sm:$0xff] }
 0x4ff   : >> { %v8506_v39 = vpop.permute.xlu1 %1914  ;;  %2142 = vperm.xlu2 %6351, %v2136_v17  }
 0x500   : >> { %v1956_v45 = vpop.permute.xlu0 %1955  ;;  %2231 = vmatmul.bf16.vlgmr.msrb.gmra.mxu1 %v8494_v52  ;;  %v8512_v15 = vsel %vm1916_vm0, %v8329_v10, %v8506_v39  ;;  %v8526_v10 = vsel %vm564_vm7, %v8366_v19, %v8504_v8 }
 0x501   : >> { %v1963_v26 = vsel %vm752_vm15, %v8351_v22, %v1956_v45  ;;  %2318 = vmatpush.bf16.msra.mxu1 %v8512_v15  ;;  %v5461_v22 = vld [vmem:[%s9791_s3 + $0x28] sm:$0xf] }
 0x502   : >> { %2283 = vmatpush.bf16.msrb.mxu3 %v8389_v56  ;;  %2299 = vmatpush.bf16.msrb.mxu0 %v1963_v26  ;;  %v8550_v46 = vor.u32 %v6099_v7, %v5461_v22  ;;  %v5455_v56 = vld [vmem:[%s9791_s3 + $0x30] sm:$0xf0] }
 0x503   : >> { %v8561_v1 = vor.u32 %v6096_v43, %v5455_v56 }
 0x505   : >> { %5468 = vmatmul.msk.bf16.gmra.mxu3 %vm1258_vm6, %v8517_v11  ;;  %2319 = vmatpush.bf16.msra.mxu1 %v8526_v10 }
 0x506   : >> { %2284 = vmatpush.bf16.msrb.mxu3 %v8410_v32  ;;  %2300 = vmatpush.bf16.msrb.mxu0 %v8454_v47 }
 0x507   : >> { %v8539_v0 = vpop.permute.xlu1 %2044 }
 0x508   : >> { %v8541_v19 = vpop.permute.xlu0 %1876  ;;  %v8583_v32 = vsel %vm2050_vm1, %v8416_v35, %v8539_v0 }
 0x509   : >> { %v8548_v42 = vsel %vm508_vm5, %v8380_v63, %v8541_v19 }
 0x50a   : >> { %2285 = vmatpush.bf16.msrb.mxu3 %v8420_v60  ;;  %2301 = vmatpush.bf16.msrb.mxu0 %v8342_v24  ;;  %v1978_v60 = vpop.permute.xlu2 %1977 }
 0x50b   : >> { %2320 = vmatpush.bf16.msra.mxu1 %v8548_v42  ;;  %v1985_v35 = vsel %vm9934_vm10, %v8476_v38, %v1978_v60 }
 0x50d   : >> { %2255 = vmatmul.bf16.gmra.mxu2 %v8550_v46 }
 0x50e   : >> { %2286 = vmatpush.bf16.msrb.mxu3 %v8430_v18  ;;  %2302 = vmatpush.bf16.msrb.mxu0 %v8371_v61  ;;  %v2139_v18 = vld [vmem:[%s9792_s4 + $0x18] sm:$0xff] }
 0x50f   : >> { %2321 = vmatpush.bf16.msra.mxu1 %v8203_v59  ;;  %v8567_v63 = vpop.permute.xlu1 %1934  ;;  %2157 = vperm.xlu2 %6351, %v2139_v18  }
 0x510   : >> { %v2000_v29 = vpop.permute.xlu0 %1999  ;;  %2236 = vmatmul.bf16.gmra.mxu1 %v8561_v1  ;;  %v8573_v44 = vsel %vm1936_vm14, %v8447_v37, %v8567_v63 }
 0x511   : >> { %v2007_v4 = vsel %vm876_vm11, %v8445_v23, %v2000_v29  ;;  %2344 = vmatpush.bf16.msra.mxu2 %v8573_v44 }
 0x512   : >> { %2287 = vmatpush.bf16.msrb.mxu3 %v8183_v57  ;;  %2303 = vmatpush.bf16.msrb.mxu0 %v8385_v6  ;;  %v8594_v57 = vsel %vm2027_vm2, %v8414_v12, %v8543_v31  ;;  %v8602_v23 = vpop.permute.xlu2 %2067 }
 0x513   : >> { %2322 = vmatpush.bf16.msra.mxu1 %v8583_v32 }
 0x515   : >> { %2288 = vmatmul.bf16.vlgmr.msrb.gmra.mxu3 %v8405_v54 }
 0x516   : >> { %2356 = vmatpush.bf16.msra.mxu3 %v2007_v4  ;;  %2304 = vmatpush.bf16.msrb.mxu0 %v8211_v20 }
 0x517   : >> { %2323 = vmatpush.bf16.msra.mxu1 %v8594_v57  ;;  %v8599_v5 = vpop.permute.xlu1 %2072 }
 0x518   : >> { %v1958_v58 = vpop.permute.xlu0 %1957  ;;  %v8612_v37 = vsel %vm1916_vm0, %v8506_v39, %v8599_v5 }
 0x519   : >> { %v1964_v12 = vsel %vm752_vm15, %v1956_v45, %v1958_v58 }
 0x51a   : >> { %2357 = vmatpush.bf16.msra.mxu3 %v1985_v35  ;;  %2305 = vmatpush.bf16.msrb.mxu0 %v8425_v62 }
 0x51b   : >> { %2324 = vmatpush.bf16.msra.mxu1 %v2007_v4 }
 0x51d   : >> { %5469 = vmatmul.msk.bf16.vlgmr.msra.gmra.mxu2 %vm1258_vm6, %v8456_v16 }
 0x51e   : >> { %2358 = vmatpush.bf16.msra.mxu3 %v1963_v26  ;;  %2306 = vmatpush.bf16.msrb.mxu0 %v8436_v51  ;;  %v8625_v51 = vsel %vm564_vm7, %v8504_v8, %v8602_v23 }
 0x51f   : >> { %2325 = vmatpush.bf16.msra.mxu1 %v1985_v35  ;;  %v8614_v62 = vpop.permute.xlu1 %2046 }
 0x520   : >> { %v8618_v48 = vpop.permute.xlu0 %2062 }
 0x521   : >> { %2307 = vmatmul.bf16.vlgmr.msrb.gmra.mxu0 %v8494_v52  ;;  %v8636_v49 = vsel %vm508_vm5, %v8541_v19, %v8618_v48 }
 0x522   : >> { %2359 = vmatpush.bf16.msra.mxu3 %v8454_v47  ;;  %2375 = vmatpush.bf16.msra.mxu0 %v1964_v12  ;;  %v8630_v47 = vpop.permute.xlu2 %2023 }
 0x523   : >> { %2394 = vmatpush.bf16.msrb.mxu1 %v8612_v37 }
 0x524   : >> { %2326 = vmatmul.bf16.vlgmr.msra.gmra.mxu1 %v8484_v3 }
 0x525   : >> { %2293 = vmatmul.bf16.gmra.mxu3 %v8466_v33 }
 0x526   : >> { %2360 = vmatpush.bf16.msra.mxu3 %v8342_v24  ;;  %2376 = vmatpush.bf16.msra.mxu0 %v8573_v44 }
 0x527   : >> { %2395 = vmatpush.bf16.msrb.mxu1 %v8625_v51  ;;  %v8638_v24 = vpop.permute.xlu1 %2077 }
 0x528   : >> { %v2079_v53 = vsel %vm1936_vm14, %v8567_v63, %v8638_v24  ;;  %v2002_v13 = vpop.permute.xlu0 %2001 }
 0x529   : >> { %2420 = vmatpush.bf16.msrb.mxu2 %v2079_v53  ;;  %v2008_v36 = vsel %vm876_vm11, %v2000_v29, %v2002_v13 }
 0x52a   : >> { %2361 = vmatpush.bf16.msra.mxu3 %v8371_v61  ;;  %2377 = vmatpush.bf16.msra.mxu0 %v8512_v15  ;;  %v8654_v61 = vsel %vm2050_vm1, %v8539_v0, %v8614_v62 }
 0x52b   : >> { %2396 = vmatpush.bf16.msrb.mxu1 %v8636_v49 }
 0x52d   : >> { %5470 = vmatmul.msk.bf16.gmra.mxu2 %vm1258_vm6, %v8517_v11 }
 0x52e   : >> { %2362 = vmatpush.bf16.msra.mxu3 %v8385_v6  ;;  %2378 = vmatpush.bf16.msra.mxu0 %v8526_v10  ;;  %v1980_v6 = vpop.permute.xlu2 %1979 }
 0x52f   : >> { %2397 = vmatpush.bf16.msrb.mxu1 %v8233_v25  ;;  %v8656_v9 = vpop.permute.xlu1 %2118  ;;  %v1986_v28 = vsel %vm9935_vm13, %v1978_v60, %v1980_v6 }
 0x530   : >> { %v1960_v38 = vpop.permute.xlu0 %1959  ;;  %v2120_v21 = vsel %vm1916_vm0, %v8599_v5, %v8656_v9  ;;  %vm3271_vm0 = vcmask (%p415_p11), 1043459  }
 0x531   : >> { %2312 = vmatmul.bf16.gmra.mxu0 %v8561_v1  ;;  %v1965_v41 = vsel %vm752_vm15, %v1958_v58, %v1960_v38 }
 0x532   : >> { %2363 = vmatpush.bf16.msra.mxu3 %v8211_v20  ;;  %2379 = vmatpush.bf16.msra.mxu0 %v8548_v42  ;;  %v8666_v20 = vsel %vm2027_vm2, %v8543_v31, %v8630_v47 }
 0x533   : >> { %2398 = vmatpush.bf16.msrb.mxu1 %v8654_v61 }
 0x534   : >> { %2331 = vmatmul.bf16.gmra.mxu1 %v8550_v46 }
 0x535   : >> { %2364 = vmatmul.bf16.vlgmr.msra.gmra.mxu3 %v8405_v54 }
 0x536   : >> { %2432 = vmatpush.bf16.msrb.mxu3 %v2008_v36  ;;  %2380 = vmatpush.bf16.msra.mxu0 %v8203_v59  ;;  %v2114_v30 = vpop.permute.xlu2 %2113 }
 0x537   : >> { %2399 = vmatpush.bf16.msrb.mxu1 %v8666_v20  ;;  %v8672_v2 = vpop.permute.xlu1 %2048  ;;  %v2115_v45 = vsel %vm564_vm7, %v8602_v23, %v2114_v30  ;;  %vm9936_vm7 = vmmov %vm9933_vm4 }
 0x538   : >> { %v2109_v50 = vpop.permute.xlu0 %2108 }
 0x539   : >> { %v2110_v17 = vsel %vm508_vm5, %v8618_v48, %v2109_v50 }
 0x53a   : >> { %2433 = vmatpush.bf16.msrb.mxu3 %v1986_v28  ;;  %2381 = vmatpush.bf16.msra.mxu0 %v8583_v32 }
 0x53b   : >> { %2400 = vmatpush.bf16.msrb.mxu1 %v2008_v36 }
 0x53d   : >> { %5471 = vmatmul.msk.bf16.vlgmr.msrb.gmra.mxu2 %vm1258_vm6, %v8456_v16 }
 0x53e   : >> { %2434 = vmatpush.bf16.msrb.mxu3 %v1964_v12  ;;  %2382 = vmatpush.bf16.msra.mxu0 %v8594_v57  ;;  %v2026_v26 = vpop.permute.xlu2 %2025 }
 0x53f   : >> { %2401 = vmatpush.bf16.msrb.mxu1 %v1986_v28  ;;  %v2124_v40 = vpop.permute.xlu1 %2123  ;;  %v2032_v0 = vsel %vm2027_vm2, %v8630_v47, %v2026_v26 }
 0x540   : >> { %v2125_v27 = vsel %vm1936_vm14, %v8638_v24, %v2124_v40 }
 0x541   : >> { %2383 = vmatmul.bf16.vlgmr.msra.gmra.mxu0 %v8494_v52  ;;  %2496 = vmatpush.bf16.msra.mxu2 %v2125_v27 }
 0x542   : >> { %2435 = vmatpush.bf16.msrb.mxu3 %v8573_v44  ;;  %2451 = vmatpush.bf16.msrb.mxu0 %v1965_v41 }
 0x543   : >> { %2470 = vmatpush.bf16.msra.mxu1 %v2120_v21 }
 0x544   : >> { %2402 = vmatmul.bf16.vlgmr.msrb.gmra.mxu1 %v8484_v3 }
 0x545   : >> { %2572 = vmatpush.bf16.msrb.mxu2 %v2124_v40  ;;  %2369 = vmatmul.bf16.gmra.mxu3 %v8466_v33 }
 0x546   : >> { %2436 = vmatpush.bf16.msrb.mxu3 %v8512_v15  ;;  %2452 = vmatpush.bf16.msrb.mxu0 %v2079_v53  ;;  %v2004_v15 = vpop.permute.xlu0 %2003  ;;  %v1982_v7 = vpop.permute.xlu2 %1981 }
 0x547   : >> { %2471 = vmatpush.bf16.msra.mxu1 %v2115_v45  ;;  %v2009_v22 = vsel %vm876_vm11, %v2002_v13, %v2004_v15 }
 0x54a   : >> { %2437 = vmatpush.bf16.msrb.mxu3 %v8526_v10  ;;  %2453 = vmatpush.bf16.msrb.mxu0 %v8612_v37  ;;  %v2055_v10 = vsel %vm2050_vm1, %v8614_v62, %v8672_v2 }
 0x54b   : >> { %2472 = vmatpush.bf16.msra.mxu1 %v2110_v17 }
 0x54d   : >> { %5472 = vmatmul.msk.bf16.gmra.mxu2 %vm1258_vm6, %v8517_v11 }
 0x54e   : >> { %2438 = vmatpush.bf16.msrb.mxu3 %v8548_v42  ;;  %2454 = vmatpush.bf16.msrb.mxu0 %v8625_v51  ;;  %v2088_v31 = vpop.permute.xlu0 %2087  ;;  %v2100_v43 = vpop.permute.xlu2 %2099 }
 0x54f   : >> { %2473 = vmatpush.bf16.msra.mxu1 %v8235_v34  ;;  %v2089_v42 = vsel %vm752_vm15, %v1960_v38, %v2088_v31  ;;  %v2101_v56 = vsel %vm2027_vm2, %v2026_v26, %v2100_v43 }
 0x551   : >> { %2388 = vmatmul.bf16.gmra.mxu0 %v8561_v1 }
 0x552   : >> { %2439 = vmatpush.bf16.msrb.mxu3 %v8203_v59  ;;  %2455 = vmatpush.bf16.msrb.mxu0 %v8636_v49  ;;  %v1987_v59 = vsel %vm9936_vm7, %v1980_v6, %v1982_v7 }
 0x553   : >> { %2474 = vmatpush.bf16.msra.mxu1 %v2055_v10 }
 0x554   : >> { %2407 = vmatmul.bf16.gmra.mxu1 %v8550_v46 }
 0x555   : >> { %2440 = vmatmul.bf16.vlgmr.msrb.gmra.mxu3 %v8405_v54 }
 0x556   : >> { %2508 = vmatpush.bf16.msra.mxu3 %v2009_v22  ;;  %2456 = vmatpush.bf16.msrb.mxu0 %v8233_v25 }
 0x557   : >> { %2475 = vmatpush.bf16.msra.mxu1 %v2032_v0 }
 0x55a   : >> { %2509 = vmatpush.bf16.msra.mxu3 %v1987_v59  ;;  %2457 = vmatpush.bf16.msrb.mxu0 %v8654_v61 }
 0x55b   : >> { %2476 = vmatpush.bf16.msra.mxu1 %v2009_v22 }
 0x55d   : >> { %5473 = vmatmul.msk.bf16.vlgmr.msra.gmra.mxu2 %vm1258_vm6, %v8456_v16 }
 0x55e   : >> { %2510 = vmatpush.bf16.msra.mxu3 %v1965_v41  ;;  %2458 = vmatpush.bf16.msrb.mxu0 %v8666_v20 }
 0x55f   : >> { %2477 = vmatpush.bf16.msra.mxu1 %v1987_v59 }
 0x561   : >> { %2459 = vmatmul.bf16.vlgmr.msrb.gmra.mxu0 %v8494_v52 }
 0x562   : >> { %2527 = vmatpush.bf16.msra.mxu0 %v2089_v42  ;;  %2511 = vmatpush.bf16.msra.mxu3 %v8567_v63  ;;  %v2096_v63 = vpop.permute.xlu0 %2095 }
 0x563   : >> { %2546 = vmatpush.bf16.msrb.mxu1 %v8656_v9 }
 0x564   : >> { %2478 = vmatmul.bf16.vlgmr.msra.gmra.mxu1 %v8484_v3 }
 0x565   : >> { %2445 = vmatmul.bf16.gmra.mxu3 %v8466_v33  ;;  %v2213_v29 = vpop.f32.mrf.mxu0 }
 0x566   : >> { %2528 = vmatpush.bf16.msra.mxu0 %v8638_v24  ;;  %2512 = vmatpush.bf16.msra.mxu3 %v8506_v39  ;;  %v2104_v39 = vpop.permute.xlu1 %2103 }
 0x567   : >> { %2547 = vmatpush.bf16.msrb.mxu1 %v2114_v30 }
 0x56a   : >> { %2513 = vmatpush.bf16.msra.mxu3 %v8504_v8  ;;  %2529 = vmatpush.bf16.msra.mxu0 %v8599_v5  ;;  %v2105_v8 = vsel %vm2050_vm1, %v8672_v2, %v2104_v39  ;;  %v8787_v31 = vpop.permute.xlu0 %2147  ;;  %vm5269_vm1 = vcmask (%p415_p11), 1041408  }
 0x56b   : >> { %2548 = vmatpush.bf16.msrb.mxu1 %v2109_v50 }
 0x56d   : >> { %5474 = vmatmul.msk.bf16.gmra.mxu2 %vm1258_vm6, %v8517_v11  ;;  %v2215_v60 = vpop.f32.mrf.mxu0 }
 0x56e   : >> { %2514 = vmatpush.bf16.msra.mxu3 %v8541_v19  ;;  %2530 = vmatpush.bf16.msra.mxu0 %v8602_v23  ;;  %v8754_v23 = vpop.permute.xlu2 %2142 }
 0x56f   : >> { %2549 = vmatpush.bf16.msrb.mxu1 %v8319_v55  ;;  %v2092_v55 = vpop.permute.xlu1 %2091 }
 0x571   : >> { %2464 = vmatmul.bf16.gmra.mxu0 %v8561_v1 }
 0x572   : >> { %2515 = vmatpush.bf16.msra.mxu3 %v8233_v25  ;;  %2531 = vmatpush.bf16.msra.mxu0 %v8618_v48  ;;  %v2097_v25 = vsel %vm876_vm11, %v2004_v15, %v2096_v63  ;;  %vm3226_vm11 = vcmask 203776  }
 0x573   : >> { %2550 = vmatpush.bf16.msrb.mxu1 %v2105_v8  ;;  %v2216_v8 = vadd.f32 %v2215_v60, %v8787_v31 }
 0x574   : >> { %2483 = vmatmul.bf16.gmra.mxu1 %v8550_v46 }
 0x575   : >> { %2516 = vmatmul.bf16.vlgmr.msra.gmra.mxu3 %v8405_v54  ;;  %v2218_v5 = vpop.f32.mrf.mxu0 }
 0x576   : >> { %2532 = vmatpush.bf16.msra.mxu0 %v8235_v34  ;;  %v2093_v34 = vsel %vm9937_vm8, %v1982_v7, %v2092_v55 }
 0x577   : >> { %2551 = vmatpush.bf16.msrb.mxu1 %v2101_v56  ;;  %v8772_v36 = vpop.permute.xlu1 %2152 }
 0x578   : >> { %v2270_v19 = vpop.f32.mrf.mxu3  ;;  %v2219_v20 = vadd.f32 %v2218_v5, %v8772_v36 }
 0x57a   : >> { %2533 = vmatpush.bf16.msra.mxu0 %v2055_v10 }
 0x57b   : >> { %2552 = vmatpush.bf16.msrb.mxu1 %v2097_v25 }
 0x57d   : >> { %v2232_v44 = vpop.f32.mrf.mxu1  ;;  %5475 = vmatmul.msk.bf16.vlgmr.msrb.gmra.mxu2 %vm1258_vm6, %v8456_v16 }
 0x57e   : >> { %2534 = vmatpush.bf16.msra.mxu0 %v2032_v0 }
 0x57f   : >> { %2553 = vmatpush.bf16.msrb.mxu1 %v2093_v34 }
 0x580   : >> { %v2251_v4 = vpop.f32.mrf.mxu2  ;;  %v8745_v32 = vpop.f32.mrf.mxu3 }
 0x581   : >> { %2535 = vmatmul.bf16.vlgmr.msra.gmra.mxu0 %v8494_v52  ;;  %v2214_v52 = vadd.f32 %v2213_v29, %v8754_v23 }
 0x583   : >> { %v2233_v62 = vadd.f32 %v2232_v44, %v2214_v52  ;;  %v8802_v52 = vpop.permute.xlu2 %2157 }
 0x584   : >> { %2554 = vmatmul.bf16.vlgmr.msrb.gmra.mxu1 %v8484_v3 }
 0x585   : >> { %v2234_v18 = vpop.f32.mrf.mxu1  ;;  %2521 = vmatmul.bf16.gmra.mxu3 %v8466_v33  ;;  %v8761_v33 = vpop.f32.mrf.mxu0  ;;  %v2252_v48 = vadd.f32 %v2251_v4, %v2233_v62 }
 0x586   : >> { %v2235_v63 = vadd.f32 %v2234_v18, %v2216_v8 }
 0x587   : >> { %v8766_v13 = vadd.f32 %v2270_v19, %v2252_v48  ;;  %v2221_v48 = vadd.f32 %v8761_v33, %v8802_v52 }
 0x588   : >> { %v2253_v54 = vpop.f32.mrf.mxu2  ;;  %v2275_v57 = vpop.f32.mrf.mxu3 }
 0x589   : >> { %v2584_v61 = vmax.f32 %v8766_v13, 0.0  ;;  %v2254_v55 = vadd.f32 %v2253_v54, %v2235_v63 }
 0x58d   : >> { %v2237_v35 = vpop.f32.mrf.mxu1  ;;  %5476 = vmatmul.msk.bf16.gmra.mxu2 %vm1258_vm6, %v8517_v11  ;;  %vm3116_vm6 = vcmask 138240  }
 0x58e   : >> { %v2238_v41 = vadd.f32 %v2237_v35, %v2219_v20  ;;  %v8798_v35 = vadd.f32 %v8745_v32, %v2254_v55 }
 0x590   : >> { %v2256_v58 = vpop.f32.mrf.mxu2  ;;  %v8752_v16 = vpop.f32.mrf.mxu3  ;;  %v2589_v18 = vmax.f32 %v8798_v35, 0.0 }
 0x591   : >> { %2540 = vmatmul.bf16.gmra.mxu0 %v8561_v1  ;;  %v2257_v21 = vadd.f32 %v2256_v58, %v2238_v41 }
 0x593   : >> { %v8781_v15 = vadd.f32 %v2275_v57, %v2257_v21 }
 0x594   : >> { %2559 = vmatmul.bf16.gmra.mxu1 %v8550_v46 }
 0x595   : >> { %v8759_v3 = vpop.f32.mrf.mxu1  ;;  %v2594_v7 = vmax.f32 %v8781_v15, 0.0 }
 0x598   : >> { %v2289_v12 = vpop.f32.mrf.mxu3  ;;  %v8763_v37 = vpop.f32.mrf.mxu2 }
 0x599   : >> { %v2290_v11 = vadd.f32 %v2289_v12, %v8754_v23 }
 0x59e   : >> { %v2308_v51 = vpop.f32.mrf.mxu0 }
 0x59f   : >> { %v2309_v47 = vadd.f32 %v2308_v51, %v2290_v11 }
 0x5a0   : >> { %v2291_v24 = vpop.f32.mrf.mxu3  ;;  %v2346_v1 = vpop.f32.mrf.mxu2 }
 0x5a1   : >> { %v2327_v49 = vpop.f32.mrf.mxu1  ;;  %v2292_v19 = vadd.f32 %v2291_v24, %v8787_v31  ;;  %v2240_v24 = vadd.f32 %v8759_v3, %v2221_v48 }
 0x5a2   : >> { %v2328_v53 = vadd.f32 %v2327_v49, %v2309_v47 }
 0x5a3   : >> { %v2259_v33 = vadd.f32 %v8763_v37, %v2240_v24 }
 0x5a4   : >> { %v8768_v46 = vadd.f32 %v2346_v1, %v2328_v53 }
 0x5a6   : >> { %v2585_v9 = vmax.f32 %v8768_v46, 0.0  ;;  %v2310_v6 = vpop.f32.mrf.mxu0 }
 0x5a7   : >> { %v2311_v5 = vadd.f32 %v2310_v6, %v2292_v19 }
 0x5a8   : >> { %v6352_v28 = vpack.i.bf16 %v2585_v9, %v2584_v61  ;;  %v2294_v2 = vpop.f32.mrf.mxu3  ;;  %v2348_v30 = vpop.f32.mrf.mxu2 }
 0x5a9   : >> { %v2329_v38 = vpop.f32.mrf.mxu1  ;;  %v2295_v40 = vadd.f32 %v2294_v2, %v8772_v36 }
 0x5aa   : >> { %6353 = vrot.lane.b32.xlu0 %v6352_v28, %s9876_s23  ;;  %v2330_v12 = vadd.f32 %v2329_v38, %v2311_v5 }
 0x5ac   : >> { %v8814_v1 = vadd.f32 %v2348_v30, %v2330_v12 }
 0x5ae   : >> { %v2313_v50 = vpop.f32.mrf.mxu0  ;;  %v2590_v28 = vmax.f32 %v8814_v1, 0.0 }
 0x5af   : >> { %v2314_v27 = vadd.f32 %v2313_v50, %v2295_v40 }
 0x5b0   : >> { %v2296_v26 = vpop.f32.mrf.mxu3  ;;  %v2351_v17 = vpop.f32.mrf.mxu2 }
 0x5b1   : >> { %v2332_v45 = vpop.f32.mrf.mxu1  ;;  %v2297_v21 = vadd.f32 %v2296_v26, %v8802_v52 }
 0x5b2   : >> { %v2333_v22 = vadd.f32 %v2332_v45, %v2314_v27  ;;  %v8829_v27 = vadd.f32 %v8752_v16, %v2259_v33 }
 0x5b4   : >> { %v8783_v10 = vadd.f32 %v2351_v17, %v2333_v22  ;;  %v2599_v26 = vmax.f32 %v8829_v27, 0.0 }
 0x5b6   : >> { %v2595_v0 = vmax.f32 %v8783_v10, 0.0  ;;  %v2315_v59 = vpop.f32.mrf.mxu0  ;;  %v6107_v10 = vld [vmem:[%s9793_s5 + $0x38] sm:$0xff] }
 0x5b7   : >> { %v2316_v37 = vadd.f32 %v2315_v59, %v2297_v21  ;;  %3129 = vmatpush.bf16.msrb.mxu3 %v6107_v10  ;;  %v6123_v10 = vld [vmem:[%s9793_s5 + $0xb8] sm:$0xff] }
 0x5b8   : >> { %v6367_v42 = vpack.i.bf16 %v2595_v0, %v2594_v7  ;;  %v2353_v43 = vpop.f32.mrf.mxu2  ;;  %v2365_v56 = vpop.f32.mrf.mxu3  ;;  %3167 = vmatpush.bf16.msra.mxu1 %v6123_v10 }
 0x5b9   : >> { %v2334_v39 = vpop.f32.mrf.mxu1  ;;  %v2366_v25 = vadd.f32 %v2365_v56, %v8754_v23 }
 0x5ba   : >> { %6368 = vrot.lane.b32.xlu0 %v6367_v42, %s9876_s23  ;;  %v2335_v42 = vadd.f32 %v2334_v39, %v2316_v37 }
 0x5be   : >> { %v2384_v34 = vpop.f32.mrf.mxu0 }
 0x5bf   : >> { %v2385_v29 = vadd.f32 %v2384_v34, %v2366_v25  ;;  %v8841_v34 = vadd.f32 %v2353_v43, %v2335_v42 }
 0x5c0   : >> { %v2367_v4 = vpop.f32.mrf.mxu3  ;;  %v2422_v57 = vpop.f32.mrf.mxu2 }
 0x5c1   : >> { %v2403_v44 = vpop.f32.mrf.mxu1  ;;  %v2368_v54 = vadd.f32 %v2367_v4, %v8787_v31 }
 0x5c2   : >> { %v2404_v60 = vadd.f32 %v2403_v44, %v2385_v29  ;;  %v2600_v44 = vmax.f32 %v8841_v34, 0.0 }
 0x5c4   : >> { %v8800_v58 = vadd.f32 %v2422_v57, %v2404_v60 }
 0x5c6   : >> { %v2586_v62 = vmax.f32 %v8800_v58, 0.0  ;;  %v2386_v11 = vpop.f32.mrf.mxu0  ;;  %v6104_v58 = vld [vmem:[%s9793_s5 + $0x20] sm:$0xff] }
 0x5c7   : >> { %v2387_v51 = vadd.f32 %v2386_v11, %v2368_v54 }
 0x5c8   : >> { %v6357_v32 = vpack.i.bf16 %v2589_v18, %v2586_v62  ;;  %v2370_v49 = vpop.f32.mrf.mxu3  ;;  %v2424_v6 = vpop.f32.mrf.mxu2 }
 0x5c9   : >> { %v2405_v47 = vpop.f32.mrf.mxu1  ;;  %v2371_v38 = vadd.f32 %v2370_v49, %v8772_v36 }
 0x5ca   : >> { %v2406_v53 = vadd.f32 %v2405_v47, %v2387_v51  ;;  %6358 = vrot.lane.b32.xlu1 %v6357_v32, %s9876_s23 }
 0x5cc   : >> { %v8817_v20 = vadd.f32 %v2424_v6, %v2406_v53 }
 0x5ce   : >> { %v2591_v2 = vmax.f32 %v8817_v20, 0.0  ;;  %v2389_v41 = vpop.f32.mrf.mxu0 }
 0x5cf   : >> { %v2390_v30 = vadd.f32 %v2389_v41, %v2371_v38 }
 0x5d0   : >> { %v6362_v3 = vpack.i.bf16 %v2591_v2, %v2590_v28  ;;  %v2372_v50 = vpop.f32.mrf.mxu3  ;;  %v2427_v17 = vpop.f32.mrf.mxu2 }
 0x5d1   : >> { %v2408_v40 = vpop.f32.mrf.mxu1  ;;  %v2373_v8 = vadd.f32 %v2372_v50, %v8802_v52 }
 0x5d2   : >> { %v2409_v45 = vadd.f32 %v2408_v40, %v2390_v30  ;;  %6363 = vrot.lane.b32.xlu2 %v6362_v3, %s9876_s23 }
 0x5d4   : >> { %v8832_v22 = vadd.f32 %v2427_v17, %v2409_v45 }
 0x5d6   : >> { %v2596_v56 = vmax.f32 %v8832_v22, 0.0  ;;  %v2391_v63 = vpop.f32.mrf.mxu0 }
 0x5d7   : >> { %v2392_v59 = vadd.f32 %v2391_v63, %v2373_v8 }
 0x5d8   : >> { %v6372_v16 = vpack.i.bf16 %v2599_v26, %v2596_v56  ;;  %v2441_v55 = vpop.f32.mrf.mxu3  ;;  %v2429_v29 = vpop.f32.mrf.mxu2 }
 0x5d9   : >> { %v2410_v25 = vpop.f32.mrf.mxu1  ;;  %v2442_v38 = vadd.f32 %v2441_v55, %v8754_v23 }
 0x5da   : >> { %v2411_v19 = vadd.f32 %v2410_v25, %v2392_v59  ;;  %6373 = vrot.lane.b32.xlu1 %v6372_v16, %s9876_s23 }
 0x5dc   : >> { %v8844_v39 = vadd.f32 %v2429_v29, %v2411_v19 }
 0x5de   : >> { %v2601_v4 = vmax.f32 %v8844_v39, 0.0  ;;  %v2460_v57 = vpop.f32.mrf.mxu0 }
 0x5df   : >> { %v2461_v3 = vadd.f32 %v2460_v57, %v2442_v38 }
 0x5e0   : >> { %v6377_v5 = vpack.i.bf16 %v2601_v4, %v2600_v44  ;;  %v2443_v60 = vpop.f32.mrf.mxu3  ;;  %v2498_v43 = vpop.f32.mrf.mxu2 }
 0x5e1   : >> { %v2479_v12 = vpop.f32.mrf.mxu1  ;;  %v2444_v8 = vadd.f32 %v2443_v60, %v8787_v31 }
 0x5e2   : >> { %6378 = vrot.lane.b32.xlu2 %v6377_v5, %s9876_s23  ;;  %v2480_v45 = vadd.f32 %v2479_v12, %v2461_v3 }
 0x5e4   : >> { %v8859_v59 = vadd.f32 %v2498_v43, %v2480_v45 }
 0x5e6   : >> { %v2462_v54 = vpop.f32.mrf.mxu0  ;;  %v2587_v5 = vmax.f32 %v8859_v59, 0.0  ;;  %v6105_v59 = vld [vmem:[%s9793_s5 + $0x28] sm:$0xff] }
 0x5e7   : >> { %v2463_v25 = vadd.f32 %v2462_v54, %v2444_v8 }
 0x5e8   : >> { %v2446_v11 = vpop.f32.mrf.mxu3  ;;  %v2500_v32 = vpop.f32.mrf.mxu2 }
 0x5e9   : >> { %v2481_v48 = vpop.f32.mrf.mxu1  ;;  %v2447_v60 = vadd.f32 %v2446_v11, %v8772_v36 }
 0x5ee   : >> { %v2465_v51 = vpop.f32.mrf.mxu0 }
 0x5f0   : >> { %v2448_v47 = vpop.f32.mrf.mxu3  ;;  %v2503_v24 = vpop.f32.mrf.mxu2 }
 0x5f1   : >> { %v2484_v49 = vpop.f32.mrf.mxu1  ;;  %v2449_v53 = vadd.f32 %v2448_v47, %v8802_v52  ;;  %v2482_v47 = vadd.f32 %v2481_v48, %v2463_v25 }
 0x5f6   : >> { %v2467_v6 = vpop.f32.mrf.mxu0 }
 0x5f7   : >> { %v2468_v33 = vadd.f32 %v2467_v6, %v2449_v53  ;;  %v8871_v6 = vadd.f32 %v2500_v32, %v2482_v47 }
 0x5f8   : >> { %v2517_v41 = vpop.f32.mrf.mxu3  ;;  %v2505_v40 = vpop.f32.mrf.mxu2 }
 0x5f9   : >> { %v2486_v21 = vpop.f32.mrf.mxu1  ;;  %v2518_v37 = vadd.f32 %v2517_v41, %v8754_v23  ;;  %v2592_v11 = vmax.f32 %v8871_v6, 0.0 }
 0x5fa   : >> { %v2487_v30 = vadd.f32 %v2486_v21, %v2468_v33  ;;  %v2466_v33 = vadd.f32 %v2465_v51, %v2447_v60 }
 0x5fc   : >> { %v8855_v50 = vadd.f32 %v2505_v40, %v2487_v30  ;;  %v2485_v3 = vadd.f32 %v2484_v49, %v2466_v33 }
 0x5fe   : >> { %v2536_v17 = vpop.f32.mrf.mxu0  ;;  %v8883_v45 = vadd.f32 %v2503_v24, %v2485_v3  ;;  %v2602_v35 = vmax.f32 %v8855_v50, 0.0 }
 0x5ff   : >> { %v2537_v42 = vadd.f32 %v2536_v17, %v2518_v37 }
 0x600   : >> { %v2519_v63 = vpop.f32.mrf.mxu3  ;;  %v2574_v19 = vpop.f32.mrf.mxu2  ;;  %v2597_v49 = vmax.f32 %v8883_v45, 0.0  ;;  %v6100_v45 = vld [vmem:[%s9793_s5] sm:$0xff] }
 0x601   : >> { %v2555_v16 = vpop.f32.mrf.mxu1  ;;  %v2520_v57 = vadd.f32 %v2519_v63, %v8787_v31 }
 0x602   : >> { %v2556_v55 = vadd.f32 %v2555_v16, %v2537_v42 }
 0x604   : >> { %v8861_v29 = vadd.f32 %v2574_v19, %v2556_v55 }
 0x606   : >> { %v2588_v23 = vmax.f32 %v8861_v29, 0.0  ;;  %v2538_v12 = vpop.f32.mrf.mxu0 }
 0x607   : >> { %v2539_v53 = vadd.f32 %v2538_v12, %v2520_v57 }
 0x608   : >> { %v6382_v43 = vpack.i.bf16 %v2588_v23, %v2587_v5  ;;  %v2522_v38 = vpop.f32.mrf.mxu3  ;;  %v2576_v48 = vpop.f32.mrf.mxu2 }
 0x609   : >> { %v2557_v54 = vpop.f32.mrf.mxu1  ;;  %v2523_v21 = vadd.f32 %v2522_v38, %v8772_v36 }
 0x60a   : >> { %v2558_v31 = vadd.f32 %v2557_v54, %v2539_v53  ;;  %6383 = vrot.lane.b32.xlu0 %v6382_v43, %s9876_s23 }
 0x60c   : >> { %v8874_v41 = vadd.f32 %v2576_v48, %v2558_v31 }
 0x60e   : >> { %v2593_v30 = vmax.f32 %v8874_v41, 0.0  ;;  %v2541_v40 = vpop.f32.mrf.mxu0 }
 0x60f   : >> { %v2542_v37 = vadd.f32 %v2541_v40, %v2523_v21 }
 0x610   : >> { %v6387_v32 = vpack.i.bf16 %v2593_v30, %v2592_v11  ;;  %v2579_v42 = vpop.f32.mrf.mxu2  ;;  %v2524_v16 = vpop.f32.mrf.mxu3 }
 0x611   : >> { %v2560_v51 = vpop.f32.mrf.mxu1  ;;  %v2525_v19 = vadd.f32 %v2524_v16, %v8802_v52 }
 0x612   : >> { %v2561_v17 = vadd.f32 %v2560_v51, %v2542_v37  ;;  %6388 = vrot.lane.b32.xlu1 %v6387_v32, %s9876_s23 }
 0x614   : >> { %v8886_v36 = vadd.f32 %v2579_v42, %v2561_v17 }
 0x616   : >> { %v2598_v8 = vmax.f32 %v8886_v36, 0.0  ;;  %v2543_v55 = vpop.f32.mrf.mxu0  ;;  %v6101_v36 = vld [vmem:[%s9793_s5 + $0x8] sm:$0xff] }
 0x617   : >> { %v2544_v60 = vadd.f32 %v2543_v55, %v2525_v19 }
 0x618   : >> { %v6402_v63 = vpack.i.bf16 %v2598_v8, %v2597_v49  ;;  %v2581_v3 = vpop.f32.mrf.mxu2 }
 0x619   : >> { %v2562_v43 = vpop.f32.mrf.mxu1 }
 0x61a   : >> { %6403 = vrot.lane.b32.xlu1 %v6402_v63, %s9876_s23  ;;  %v2563_v21 = vadd.f32 %v2562_v43, %v2544_v60 }
 0x61c   : >> { %v6354_v24 = vpop.permute.xlu0 %6353  ;;  %v8922_v42 = vadd.f32 %v2581_v3, %v2563_v21  ;;  %v6106_v3 = vld [vmem:[%s9793_s5 + $0x30] sm:$0xff] }
 0x61d   : >> { %v6356_v57 = vunpack.i.h.bf16 %v6354_v24  ;;  %v6355_v47 = vunpack.i.l.bf16 %v6354_v24  ;;  %3130 = vmatpush.bf16.msrb.mxu3 %v6106_v3 }
 0x61e   : >> { %v2603_v46 = vmax.f32 %v8922_v42, 0.0 }
 0x61f   : >> { %v2665_v33 = vsel %vm508_vm5, %v6355_v47, %v6356_v57 }
 0x620   : >> { %v8908_v37 = vmax.f32 %v2584_v61, %v2665_v33  ;;  %v6407_v24 = vpack.i.bf16 %v2603_v46, %v2602_v35 }
 0x621   : >> { %3131 = vmatpush.bf16.msrb.mxu3 %v6105_v59 }
 0x625   : >> { %3132 = vmatpush.bf16.msrb.mxu3 %v6104_v58 }
 0x62c   : >> { %v8895_v25 = vpop.permute.xlu2 %6363  ;;  %v6369_v61 = vpop.permute.xlu0 %6368 }
 0x62d   : >> { %v6366_v12 = vunpack.i.h.bf16 %v8895_v25  ;;  %v6365_v53 = vunpack.i.l.bf16 %v8895_v25  ;;  %v6370_v1 = vunpack.i.l.bf16 %v6369_v61 }
 0x62f   : >> { %v2670_v38 = vsel %vm508_vm5, %v6365_v53, %v6366_v12 }
 0x630   : >> { %v8912_v32 = vmax.f32 %v2590_v28, %v2670_v38 }
 0x63c   : >> { %v6359_v54 = vpop.permute.xlu1 %6358 }
 0x63d   : >> { %v6361_v31 = vunpack.i.h.bf16 %v6359_v54  ;;  %v6360_v48 = vunpack.i.l.bf16 %v6359_v54 }
 0x63f   : >> { %v2666_v52 = vsel %vm508_vm5, %v6356_v57, %v6360_v48  ;;  %v2669_v40 = vsel %vm508_vm5, %v6361_v31, %v6365_v53 }
 0x640   : >> { %v8916_v51 = vmax.f32 %v2585_v9, %v2666_v52  ;;  %v8920_v17 = vmax.f32 %v2589_v18, %v2669_v40  ;;  %v8931_v9 = vpop.permute.xlu2 %6378  ;;  %v6371_v18 = vunpack.i.h.bf16 %v6369_v61 }
 0x641   : >> { %v6381_v28 = vunpack.i.h.bf16 %v8931_v9  ;;  %v6380_v16 = vunpack.i.l.bf16 %v8931_v9 }
 0x642   : >> { %v6392_v63 = vpack.i.bf16 %v8916_v51, %v8908_v37  ;;  %v6397_v13 = vpack.i.bf16 %v8912_v32, %v8920_v17  ;;  %v2673_v19 = vsel %vm508_vm5, %v6370_v1, %v6371_v18 }
 0x643   : >> { %v2678_v57 = vsel %vm508_vm5, %v6380_v16, %v6381_v28  ;;  %v8953_v54 = vmax.f32 %v2594_v7, %v2673_v19 }
 0x644   : >> { %6393 = vrot.lane.b32.xlu2 %v6392_v63, %s9887_s13  ;;  %6398 = vrot.lane.b32.xlu0 %v6397_v13, %s9887_s13  ;;  %v8957_v33 = vmax.f32 %v2600_v44, %v2678_v57 }
 0x64c   : >> { %6408 = vrot.lane.b32.xlu2 %v6407_v24, %s9876_s23  ;;  %v8941_v55 = vpop.permute.xlu1 %6373 }
 0x64d   : >> { %v6376_v47 = vunpack.i.h.bf16 %v8941_v55  ;;  %v6375_v53 = vunpack.i.l.bf16 %v8941_v55 }
 0x64f   : >> { %v2674_v60 = vsel %vm508_vm5, %v6371_v18, %v6375_v53  ;;  %v2677_v43 = vsel %vm508_vm5, %v6376_v47, %v6380_v16  ;;  %v6102_v16 = vld [vmem:[%s9793_s5 + $0x10] sm:$0xff] }
 0x650   : >> { %v8961_v38 = vmax.f32 %v2595_v0, %v2674_v60  ;;  %v8965_v31 = vmax.f32 %v2599_v26, %v2677_v43 }
 0x652   : >> { %v6417_v21 = vpack.i.bf16 %v8957_v33, %v8965_v31  ;;  %v6412_v15 = vpack.i.bf16 %v8961_v38, %v8953_v54 }
 0x654   : >> { %6418 = vrot.lane.b32.xlu1 %v6417_v21, %s9887_s13  ;;  %6413 = vrot.lane.b32.xlu0 %v6412_v15, %s9887_s13 }
 0x67c   : >> { %v6384_v7 = vpop.permute.xlu0 %6383 }
 0x67d   : >> { %v6386_v34 = vunpack.i.h.bf16 %v6384_v7  ;;  %v6385_v44 = vunpack.i.l.bf16 %v6384_v7 }
 0x67f   : >> { %v8978_v0 = vmax.f32 %v2588_v23, %v6386_v34  ;;  %v2668_v27 = vsel %vm508_vm5, %v6385_v44, %v6386_v34  ;;  %v2667_v29 = vsel %vm508_vm5, %v6360_v48, %v6385_v44  ;;  %v6115_v44 = vld [vmem:[%s9793_s5 + $0x78] sm:$0xff] }
 0x680   : >> { %v8983_v26 = vmax.f32 %v2587_v5, %v2668_v27  ;;  %v9005_v18 = vmax.f32 %v2586_v62, %v2667_v29  ;;  %v6131_v27 = vld [vmem:[%s9793_s5 + $0xf8] sm:$0xff]  ;;  %3148 = vmatpush.bf16.msrb.mxu0 %v6115_v44 }
 0x681   : >> { %3186 = vmatpush.bf16.msra.mxu2 %v6131_v27 }
 0x682   : >> { %v6422_v52 = vpack.i.bf16 %v8978_v0, %v8983_v26 }
 0x684   : >> { %6423 = vrot.lane.b32.xlu2 %v6422_v52, %s9887_s13  ;;  %v6389_v40 = vpop.permute.xlu1 %6388 }
 0x685   : >> { %v6391_v23 = vunpack.i.h.bf16 %v6389_v40  ;;  %v6390_v63 = vunpack.i.l.bf16 %v6389_v40  ;;  %v6130_v40 = vld [vmem:[%s9793_s5 + $0xf0] sm:$0xff] }
 0x686   : >> { %3187 = vmatpush.bf16.msra.mxu2 %v6130_v40 }
 0x687   : >> { %v8997_v5 = vmax.f32 %v2593_v30, %v6391_v23  ;;  %v2672_v13 = vsel %vm508_vm5, %v6390_v63, %v6391_v23  ;;  %v2671_v61 = vsel %vm508_vm5, %v6366_v12, %v6390_v63 }
 0x688   : >> { %v9009_v48 = vmax.f32 %v2592_v11, %v2672_v13  ;;  %v9013_v1 = vmax.f32 %v2591_v2, %v2671_v61  ;;  %v6103_v2 = vld [vmem:[%s9793_s5 + $0x18] sm:$0xff] }
 0x689   : >> { %3133 = vmatpush.bf16.msrb.mxu3 %v6103_v2  ;;  %v6128_v2 = vld [vmem:[%s9793_s5 + $0xe0] sm:$0xff] }
 0x68a   : >> { %v6427_v41 = vpack.i.bf16 %v8997_v5, %v9009_v48  ;;  %v6432_v30 = vpack.i.bf16 %v9013_v1, %v9005_v18 }
 0x68c   : >> { %v6404_v62 = vpop.permute.xlu1 %6403  ;;  %6433 = vrot.lane.b32.xlu1 %v6432_v30, %s9887_s13  ;;  %6428 = vrot.lane.b32.xlu0 %v6427_v41, %s9887_s13 }
 0x68d   : >> { %v6406_v6 = vunpack.i.h.bf16 %v6404_v62  ;;  %v6405_v20 = vunpack.i.l.bf16 %v6404_v62  ;;  %3134 = vmatpush.bf16.msrb.mxu3 %v6102_v16  ;;  %v6113_v62 = vld [vmem:[%s9793_s5 + $0x68] sm:$0xff]  ;;  %v6119_v16 = vld [vmem:[%s9793_s5 + $0x98] sm:$0xff] }
 0x68f   : >> { %v9029_v11 = vmax.f32 %v2598_v8, %v6406_v6  ;;  %v2676_v25 = vsel %vm508_vm5, %v6405_v20, %v6406_v6  ;;  %v2675_v55 = vsel %vm508_vm5, %v6375_v53, %v6405_v20  ;;  %v6121_v6 = vld [vmem:[%s9793_s5 + $0xa8] sm:$0xff] }
 0x690   : >> { %v9034_v12 = vmax.f32 %v2597_v49, %v2676_v25  ;;  %v9061_v21 = vmax.f32 %v2596_v56, %v2675_v55  ;;  %v6129_v20 = vld [vmem:[%s9793_s5 + $0xe8] sm:$0xff]  ;;  %v6111_v25 = vld [vmem:[%s9793_s5 + $0x58] sm:$0xff] }
 0x691   : >> { %3135 = vmatpush.bf16.msrb.mxu3 %v6101_v36  ;;  %3188 = vmatpush.bf16.msra.mxu2 %v6129_v20  ;;  %v6127_v36 = vld [vmem:[%s9793_s5 + $0xd8] sm:$0xff] }
 0x692   : >> { %v6437_v24 = vpack.i.bf16 %v9029_v11, %v9034_v12 }
 0x694   : >> { %6438 = vrot.lane.b32.xlu2 %v6437_v24, %s9887_s13  ;;  %v2914_v24 = vld [vmem:[%s9793_s5 + $0x108] sm:$0x1] }
 0x695   : >> { %3136 = vmatpush.bf16.msrb.mxu3 %v6100_v45  ;;  %3189 = vmatpush.bf16.msra.mxu2 %v6128_v2  ;;  %v3048_v45 = vunpack.c.l.b16 %v2914_v24 }
 0x697   : >> { %v3082_v55 = vpack.c.b16 %v3048_v45, %v3048_v45 }
 0x699   : >> { %3190 = vmatpush.bf16.msra.mxu2 %v6127_v36 }
 0x69e   : >> { %v9048_v49 = vpop.permute.xlu2 %6393 }
 0x69f   : >> { %v6396_v22 = vunpack.i.h.bf16 %v9048_v49  ;;  %v6395_v56 = vunpack.i.l.bf16 %v9048_v49 }
 0x6a1   : >> { %v2782_v39 = vsel %vm752_vm15, %v6395_v56, %v6396_v22  ;;  %v6132_v56 = vld [vmem:[%s9793_s5 + $0x100] sm:$0xff] }
 0x6a6   : >> { %v6409_v8 = vpop.permute.xlu2 %6408 }
 0x6a7   : >> { %v6411_v19 = vunpack.i.h.bf16 %v6409_v8  ;;  %v6410_v57 = vunpack.i.l.bf16 %v6409_v8 }
 0x6a9   : >> { %v9053_v47 = vmax.f32 %v2603_v46, %v6411_v19  ;;  %v2680_v60 = vsel %vm508_vm5, %v6410_v57, %v6411_v19  ;;  %v2679_v43 = vsel %vm508_vm5, %v6381_v28, %v6410_v57  ;;  %v2818_v28 = vmax.f32 %v8908_v37, %v2782_v39  ;;  %v6114_v37 = vld [vmem:[%s9793_s5 + $0x70] sm:$0xff]  ;;  %v6108_v39 = vld [vmem:[%s9793_s5 + $0x40] sm:$0xff] }
 0x6aa   : >> { %v9065_v15 = vmax.f32 %v2602_v35, %v2680_v60  ;;  %v9069_v53 = vmax.f32 %v2601_v4, %v2679_v43  ;;  %3149 = vmatpush.bf16.msrb.mxu0 %v6114_v37  ;;  %vm3123_vm5 = vcmask 1040384   ;;  %v6110_v19 = vld [vmem:[%s9793_s5 + $0x50] sm:$0xff] }
 0x6ab   : >> { %v3125_v8 = vsel %vm3123_vm5, 65535, %v6544_v14  ;;  %v6118_v57 = vld [vmem:[%s9793_s5 + $0x90] sm:$0xff]  ;;  %v6109_v14 = vld [vmem:[%s9793_s5 + $0x48] sm:$0xff] }
 0x6ac   : >> { %v6442_v42 = vpack.i.bf16 %v9053_v47, %v9065_v15  ;;  %v6447_v46 = vpack.i.bf16 %v9069_v53, %v9061_v21  ;;  %v6126_v60 = vld [vmem:[%s9793_s5 + $0xd0] sm:$0xff]  ;;  %v3127_v43 = vand.u32 %v3125_v8, %v3082_v55 }
 0x6ad   : >> { %3191 = vmatpush.bf16.msra.mxu2 %v6126_v60 }
 0x6ae   : >> { %6448 = vrot.lane.b32.xlu1 %v6447_v46, %s9887_s13  ;;  %6443 = vrot.lane.b32.xlu0 %v6442_v42, %s9887_s13  ;;  %v6117_v42 = vld [vmem:[%s9793_s5 + $0x88] sm:$0xff] }
 0x6af   : >> { %3150 = vmatpush.bf16.msrb.mxu0 %v6113_v62  ;;  %3211 = vmatpush.bf16.msra.mxu3 %v3127_v43  ;;  %v6125_v46 = vld [vmem:[%s9793_s5 + $0xc8] sm:$0xff] }
 0x6b1   : >> { %3192 = vmatpush.bf16.msra.mxu2 %v6125_v46 }
 0x6b3   : >> { %3212 = vmatpush.bf16.msra.mxu3 %v6132_v56 }
 0x6b6   : >> { %v9079_v50 = vpop.permute.xlu0 %6398 }
 0x6b7   : >> { %v6401_v4 = vunpack.i.h.bf16 %v9079_v50  ;;  %v6400_v9 = vunpack.i.l.bf16 %v9079_v50 }
 0x6b9   : >> { %v2786_v35 = vsel %vm752_vm15, %v6400_v9, %v6401_v4  ;;  %v6116_v9 = vld [vmem:[%s9793_s5 + $0x80] sm:$0xff] }
 0x6ba   : >> { %v2823_v7 = vmax.f32 %v8920_v17, %v2786_v35  ;;  %v6122_v17 = vld [vmem:[%s9793_s5 + $0xb0] sm:$0xff]  ;;  %v6124_v35 = vld [vmem:[%s9793_s5 + $0xc0] sm:$0xff] }
 0x6bb   : >> { %3168 = vmatpush.bf16.msra.mxu1 %v6122_v17  ;;  %3193 = vmatpush.bf16.msra.mxu2 %v6124_v35 }
 0x6bc   : >> { %v2838_v34 = vpack.c.bf16 %v2823_v7, %v2818_v28 }
 0x6be   : >> { %3137 = vmatmul.bf16.vlgmr.msrb.gmra.mxu3 %v2838_v34 }
 0x6bf   : >> { %3169 = vmatpush.bf16.msra.mxu1 %v6121_v6 }
 0x6c6   : >> { %v9106_v3 = vpop.permute.xlu1 %6418  ;;  %v9108_v52 = vpop.permute.xlu0 %6413 }
 0x6c7   : >> { %v6421_v29 = vunpack.i.h.bf16 %v9106_v3  ;;  %v6420_v23 = vunpack.i.l.bf16 %v9106_v3  ;;  %v6416_v63 = vunpack.i.h.bf16 %v9108_v52  ;;  %v6415_v59 = vunpack.i.l.bf16 %v9108_v52 }
 0x6c9   : >> { %v2794_v13 = vsel %vm752_vm15, %v6420_v23, %v6421_v29  ;;  %v2790_v61 = vsel %vm752_vm15, %v6415_v59, %v6416_v63 }
 0x6ca   : >> { %v2828_v41 = vmax.f32 %v8953_v54, %v2790_v61  ;;  %v2833_v30 = vmax.f32 %v8965_v31, %v2794_v13  ;;  %v6112_v54 = vld [vmem:[%s9793_s5 + $0x60] sm:$0xff] }
 0x6cb   : >> { %v6120_v31 = vld [vmem:[%s9793_s5 + $0xa0] sm:$0xff]  ;;  %3151 = vmatpush.bf16.msrb.mxu0 %v6112_v54 }
 0x6cc   : >> { %v2843_v58 = vpack.c.bf16 %v2833_v30, %v2828_v41  ;;  %3170 = vmatpush.bf16.msra.mxu1 %v6120_v31 }
 0x6ce   : >> { %3142 = vmatmul.bf16.gmra.mxu3 %v2843_v58 }
 0x6cf   : >> { %3152 = vmatpush.bf16.msrb.mxu0 %v6111_v25 }
 0x6d0   : >> { %3171 = vmatpush.bf16.msra.mxu1 %v6119_v16 }
 0x6d3   : >> { %3153 = vmatpush.bf16.msrb.mxu0 %v6110_v19 }
 0x6d4   : >> { %3172 = vmatpush.bf16.msra.mxu1 %v6118_v57 }
 0x6d7   : >> { %3154 = vmatpush.bf16.msrb.mxu0 %v6109_v14 }
 0x6d8   : >> { %3173 = vmatpush.bf16.msra.mxu1 %v6117_v42 }
 0x6db   : >> { %3155 = vmatpush.bf16.msrb.mxu0 %v6108_v39 }
 0x6dc   : >> { %3174 = vmatpush.bf16.msra.mxu1 %v6116_v9 }
 0x6de   : >> { %v6424_v28 = vpop.permute.xlu2 %6423 }
 0x6df   : >> { %v6426_v7 = vunpack.i.h.bf16 %v6424_v28  ;;  %v6425_v34 = vunpack.i.l.bf16 %v6424_v28 }
 0x6e1   : >> { %v2822_v23 = vmax.f32 %v8978_v0, %v6426_v7  ;;  %v2785_v59 = vsel %vm752_vm15, %v6425_v34, %v6426_v7 }
 0x6e2   : >> { %v2821_v54 = vmax.f32 %v8983_v26, %v2785_v59 }
 0x6fe   : >> { %v6434_v44 = vpop.permute.xlu1 %6433  ;;  %v6429_v10 = vpop.permute.xlu0 %6428 }
 0x6ff   : >> { %v6436_v27 = vunpack.i.h.bf16 %v6434_v44  ;;  %v6435_v37 = vunpack.i.l.bf16 %v6434_v44  ;;  %v6431_v17 = vunpack.i.h.bf16 %v6429_v10  ;;  %v6430_v40 = vunpack.i.l.bf16 %v6429_v10 }
 0x701   : >> { %v2783_v13 = vsel %vm752_vm15, %v6396_v22, %v6435_v37  ;;  %v2784_v61 = vsel %vm752_vm15, %v6435_v37, %v6425_v34  ;;  %v2787_v41 = vsel %vm752_vm15, %v6401_v4, %v6436_v27  ;;  %v2827_v30 = vmax.f32 %v8997_v5, %v6431_v17 }
 0x702   : >> { %v2819_v58 = vmax.f32 %v8916_v51, %v2783_v13  ;;  %v2820_v62 = vmax.f32 %v9005_v18, %v2784_v61  ;;  %v2824_v0 = vmax.f32 %v8912_v32, %v2787_v41  ;;  %v2788_v6 = vsel %vm752_vm15, %v6436_v27, %v6430_v40  ;;  %v6439_v32 = vpop.permute.xlu2 %6438 }
 0x703   : >> { %v2842_v20 = vpack.c.bf16 %v2827_v30, %v2822_v23  ;;  %v2789_v49 = vsel %vm752_vm15, %v6430_v40, %v6431_v17  ;;  %v2825_v22 = vmax.f32 %v9013_v1, %v2788_v6  ;;  %v6441_v5 = vunpack.i.h.bf16 %v6439_v32 }
 0x704   : >> { %v2839_v50 = vpack.c.bf16 %v2824_v0, %v2819_v58  ;;  %v2826_v4 = vmax.f32 %v9009_v48, %v2789_v49  ;;  %v6440_v18 = vunpack.i.l.bf16 %v6439_v32  ;;  %v6136_v32 = vld [vmem:[%s9794_s6 + $0x18] sm:$0x10] (%p415_p11) }
 0x705   : >> { %v2840_v31 = vpack.c.bf16 %v2825_v22, %v2820_v62  ;;  %5609 = vmatmul.msk.bf16.vlgmr.msra.gmra.mxu3 %vm3116_vm6, %v2842_v20  ;;  %v2832_v48 = vmax.f32 %v9029_v11, %v6441_v5 }
 0x706   : >> { %v2841_v51 = vpack.c.bf16 %v2826_v4, %v2821_v54  ;;  %3156 = vmatmul.bf16.vlgmr.msrb.gmra.mxu0 %v2839_v50  ;;  %v2793_v2 = vsel %vm752_vm15, %v6440_v18, %v6441_v5 }
 0x707   : >> { %3175 = vmatmul.bf16.vlgmr.msra.gmra.mxu1 %v2840_v31  ;;  %v2831_v45 = vmax.f32 %v9034_v12, %v2793_v2  ;;  %v6134_v2 = vld [vmem:[%s9794_s6 + $0x8] sm:$0x10] (%p415_p11) }
 0x708   : >> { %3194 = vmatmul.bf16.vlgmr.msra.gmra.mxu2 %v2841_v51  ;;  %v5622_v51 = vld [vmem:[%s9794_s6 + $0x18] sm:$0xf] (%p415_p11) }
 0x709   : > { %v5623_v5 = vor.u32 (%p415_p11), %v6136_v32, %v5622_v51 }
 0x720   : >> { %v6449_v25 = vpop.permute.xlu1 %6448  ;;  %v6444_v16 = vpop.permute.xlu0 %6443 }
 0x721   : >> { %v6451_v1 = vunpack.i.h.bf16 %v6449_v25  ;;  %v6450_v24 = vunpack.i.l.bf16 %v6449_v25  ;;  %v6446_v26 = vunpack.i.h.bf16 %v6444_v16  ;;  %v6445_v36 = vunpack.i.l.bf16 %v6444_v16 }
 0x722   : > { %v6549_v25 = vmov (%p415_p11), 65535  }
 0x723   : >> { %v2795_v8 = vsel %vm752_vm15, %v6421_v29, %v6451_v1  ;;  %v2791_v55 = vsel %vm752_vm15, %v6416_v63, %v6450_v24  ;;  %v2792_v19 = vsel %vm752_vm15, %v6450_v24, %v6440_v18  ;;  %v2837_v57 = vmax.f32 %v9053_v47, %v6446_v26  ;;  %v5631_v18 = vld [vmem:[%s9794_s6 + $0x8] sm:$0xf] (%p415_p11) }
 0x724   : >> { %v2796_v60 = vsel %vm752_vm15, %v6451_v1, %v6445_v36  ;;  %v2797_v43 = vsel %vm752_vm15, %v6445_v36, %v6446_v26  ;;  %v2829_v11 = vmax.f32 %v8961_v38, %v2791_v55  ;;  %v2834_v12 = vmax.f32 %v8957_v33, %v2795_v8 }
 0x725   : >> { %v2847_v14 = vpack.c.bf16 %v2837_v57, %v2832_v48  ;;  %v2830_v3 = vmax.f32 %v9061_v21, %v2792_v19  ;;  %v2835_v29 = vmax.f32 %v9069_v53, %v2796_v60  ;;  %v2836_v52 = vmax.f32 %v9065_v15, %v2797_v43  ;;  %v6135_v60 = vld [vmem:[%s9794_s6 + $0x10] sm:$0xff] (%p415_p11) }
 0x726   : >> { %v2844_v63 = vpack.c.bf16 %v2834_v12, %v2829_v11  ;;  %vm3289_vm15 = vcmask (%p415_p11), 1043456   ;;  %v5632_v1 = vor.u32 (%p415_p11), %v6134_v2, %v5631_v18 }
 0x727   : >> { %5610 = vmatmul.msk.bf16.gmra.mxu3 %vm3116_vm6, %v2847_v14  ;;  %v2845_v47 = vpack.c.bf16 %v2835_v29, %v2830_v3  ;;  %v2846_v42 = vpack.c.bf16 %v2836_v52, %v2831_v45  ;;  %v3291_v16 = vsel (%p415_p11), %vm3289_vm15, 4294967295, %v6549_v25 }
 0x728   : >> { %3161 = vmatmul.bf16.gmra.mxu0 %v2844_v63  ;;  %v9245_v36 = vsel (%p415_p11), %vm3290_vm3, %v3291_v16, 0 }
 0x729   : >> { %3180 = vmatmul.bf16.gmra.mxu1 %v2845_v47  ;;  %3199 = vmatmul.bf16.gmra.mxu2 %v2846_v42  ;;  %v3294_v19 = vand.u32 (%p415_p11), %v5623_v5, %v9245_v36  ;;  %v3339_v57 = vand.u32 (%p415_p11), %v5632_v1, %v9245_v36  ;;  %v5644_v47 = vld [vmem:[%s9794_s6 + $0x28] sm:$0xf] (%p415_p11)  ;;  %v6133_v42 = vld [vmem:[%s9794_s6] sm:$0xff] (%p415_p11) }
 0x72b   : > { %3302 = vmatpush.bf16.msra.mxu2 (%p415_p11), %v3294_v19  ;;  %3347 = vmatpush.bf16.msra.mxu3 (%p415_p11), %v3339_v57  ;;  %v6146_v19 = vld [vmem:[%s9794_s6 + $0x68] sm:$0x10] (%p415_p11) }
 0x72f   : > { %3303 = vmatpush.bf16.msra.mxu2 (%p415_p11), %v6135_v60  ;;  %3348 = vmatpush.bf16.msra.mxu3 (%p415_p11), %v6133_v42  ;;  %v6142_v42 = vld [vmem:[%s9794_s6 + $0x48] sm:$0x10] (%p415_p11) }
 0x741   : >> { %v3138_v46 = vpop.f32.mrf.mxu3 }
 0x749   : >> { %v3140_v38 = vpop.f32.mrf.mxu3 }
 0x751   : >> { %v3143_v56 = vpop.f32.mrf.mxu3 }
 0x759   : >> { %v3145_v33 = vpop.f32.mrf.mxu3 }
 0x783   : >> { %v3157_v39 = vpop.f32.mrf.mxu0 }
 0x784   : >> { %v3158_v9 = vadd.f32 %v3157_v39, %v3138_v46  ;;  %v3176_v21 = vpop.f32.mrf.mxu1  ;;  %v6138_v39 = vld [vmem:[%s9794_s6 + $0x28] sm:$0x10] (%p415_p11) }
 0x786   : >> { %v3177_v35 = vadd.f32 %v3176_v21, %v3158_v9  ;;  %v5657_v9 = vld [vmem:[%s9794_s6 + $0x38] sm:$0xf] (%p415_p11) }
 0x788   : >> { %v3214_v53 = vpop.f32.mrf.mxu3 }
 0x78b   : >> { %v3195_v15 = vpop.f32.mrf.mxu2  ;;  %v3159_v28 = vpop.f32.mrf.mxu0 }
 0x78c   : >> { %v3196_v7 = vadd.f32 %v3195_v15, %v3177_v35  ;;  %v3160_v44 = vadd.f32 %v3159_v28, %v3140_v38  ;;  %v3178_v10 = vpop.f32.mrf.mxu1  ;;  %v5645_v15 = vor.u32 (%p415_p11), %v6138_v39, %v5644_v47  ;;  %v6140_v28 = vld [vmem:[%s9794_s6 + $0x38] sm:$0x10] (%p415_p11)  ;;  %v5670_v47 = vld [vmem:[%s9794_s6 + $0x48] sm:$0xf] (%p415_p11)  ;;  %v5683_v39 = vld [vmem:[%s9794_s6 + $0x58] sm:$0xf] (%p415_p11) }
 0x78e   : >> { %v3215_v34 = vadd.f32 %v3214_v53, %v3196_v7  ;;  %v3179_v27 = vadd.f32 %v3178_v10, %v3160_v44 }
 0x790   : >> { %3227 = vst.msk [vmem:[%s3225_s11] sm:$0xff] %vm3226_vm11, %v3215_v34  ;;  %v3216_v40 = vpop.f32.mrf.mxu3 }
 0x793   : >> { %v3197_v37 = vpop.f32.mrf.mxu2 }
 0x794   : >> { %v3198_v17 = vadd.f32 %v3197_v37, %v3179_v27 }
 0x796   : >> { %v3217_v23 = vadd.f32 %v3216_v40, %v3198_v17 }
 0x798   : >> { %3228 = vst.msk [vmem:[%s3225_s11 + $0x8] sm:$0xff] %vm3226_vm11, %v3217_v23 }
 0x7a5   : >> { %v3162_v59 = vpop.f32.mrf.mxu0 }
 0x7a6   : >> { %v3163_v13 = vadd.f32 %v3162_v59, %v3143_v56  ;;  %v3181_v61 = vpop.f32.mrf.mxu1  ;;  %v3397_v59 = vand.u32 (%p415_p11), %v5645_v15, %v9245_v36 }
 0x7a8   : >> { %v3182_v41 = vadd.f32 %v3181_v61, %v3163_v13  ;;  %3405 = vmatpush.bf16.msrb.mxu2 (%p415_p11), %v3397_v59 }
 0x7aa   : >> { %v3219_v30 = vpop.f32.mrf.mxu3 }
 0x7ac   : >> { %v3200_v58 = vpop.f32.mrf.mxu2 }
 0x7ad   : >> { %v3201_v62 = vadd.f32 %v3200_v58, %v3182_v41  ;;  %v3164_v0 = vpop.f32.mrf.mxu0  ;;  %v6137_v58 = vld [vmem:[%s9794_s6 + $0x20] sm:$0xff] (%p415_p11) }
 0x7ae   : >> { %v3165_v20 = vadd.f32 %v3164_v0, %v3145_v33  ;;  %v3183_v49 = vpop.f32.mrf.mxu1  ;;  %3406 = vmatpush.bf16.msrb.mxu2 (%p415_p11), %v6137_v58 }
 0x7af   : >> { %v3220_v6 = vadd.f32 %v3219_v30, %v3201_v62  ;;  %v5658_v30 = vor.u32 (%p415_p11), %v6140_v28, %v5657_v9  ;;  %v6144_v9 = vld [vmem:[%s9794_s6 + $0x58] sm:$0x10] (%p415_p11) }
 0x7b0   : >> { %v3184_v22 = vadd.f32 %v3183_v49, %v3165_v20  ;;  %v5684_v58 = vor.u32 (%p415_p11), %v6144_v9, %v5683_v39 }
 0x7b1   : >> { %3229 = vst.msk [vmem:[%s3225_s11 + $0x10] sm:$0xff] %vm3226_vm11, %v3220_v6  ;;  %v3456_v51 = vand.u32 (%p415_p11), %v5658_v30, %v9245_v36 }
 0x7b2   : >> { %v3221_v4 = vpop.f32.mrf.mxu3 }
 0x7b3   : > { %3464 = vmatpush.bf16.msrb.mxu3 (%p415_p11), %v3456_v51 }
 0x7b4   : >> { %v3202_v54 = vpop.f32.mrf.mxu2 }
 0x7b5   : >> { %v3203_v50 = vadd.f32 %v3202_v54, %v3184_v22  ;;  %417 = sbr.rel (!%p415_p11) target bundleno = 37 (0x25), region = 143 }
 0x7b7   : >> { %v3222_v31 = vadd.f32 %v3221_v4, %v3203_v50 }
 0x7b9   : >> { %3230 = vst.msk [vmem:[%s3225_s11 + $0x18] sm:$0xff] %vm3226_vm11, %v3222_v31  ;;  %s9945_s11 = sand.u32 (%p415_p11), 1, %s9939_s0  }
 0x7ba   : > { %s5288_s27 = scalar_lea.sflag [#allocation4], %s9945_s11 }
 0x7c0   : > { %v3243_v24 = vld [vmem:[#allocation2 + $0x1] sm:$0x1]  ;;  %v3231_v12 = vld [vmem:[#allocation2] sm:$0x1]  ;;  %v3354_v7 = vld [vmem:[#allocation2 + $0x2] sm:$0x1] }
 0x7c1   : > { %v3244_v26 = vld [vmem:[#allocation2 + $0x21] sm:$0x1]  ;;  %v3247_v8 = vpack.c.bf16 %v3243_v24, %v3243_v24  ;;  %v3232_v14 = vld [vmem:[#allocation2 + $0x20] sm:$0x1]  ;;  %v3235_v56 = vpack.c.bf16 %v3231_v12, %v3231_v12  ;;  %v3355_v37 = vld [vmem:[#allocation2 + $0x22] sm:$0x1]  ;;  %v3358_v0 = vpack.c.bf16 %v3354_v7, %v3354_v7 }
 0x7c2   : > { %v3245_v48 = vld [vmem:[#allocation2 + $0x41] sm:$0x1]  ;;  %v3248_v55 = vpack.c.bf16 %v3244_v26, %v3244_v26  ;;  %v3233_v3 = vld [vmem:[#allocation2 + $0x40] sm:$0x1]  ;;  %v3236_v33 = vpack.c.bf16 %v3232_v14, %v3232_v14  ;;  %v3356_v13 = vld [vmem:[#allocation2 + $0x42] sm:$0x1]  ;;  %v3359_v22 = vpack.c.bf16 %v3355_v37, %v3355_v37 }
 0x7c3   : > { %v3246_v45 = vld [vmem:[#allocation2 + $0x61] sm:$0x1]  ;;  %v3249_v43 = vpack.c.bf16 %v3245_v48, %v3245_v48  ;;  %v3260_v29 = vunpack.c.l.b16 %v3247_v8  ;;  %v3234_v63 = vld [vmem:[#allocation2 + $0x60] sm:$0x1]  ;;  %v3237_v35 = vpack.c.bf16 %v3233_v3, %v3233_v3  ;;  %v3313_v10 = vunpack.c.l.b16 %v3235_v56  ;;  %v3357_v62 = vld [vmem:[#allocation2 + $0x62] sm:$0x1] }
 0x7c4   : > { %v3250_v11 = vpack.c.bf16 %v3246_v45, %v3246_v45  ;;  %v3261_v52 = vunpack.c.l.b16 %v3248_v55  ;;  %v3238_v53 = vpack.c.bf16 %v3234_v63, %v3234_v63  ;;  %v3314_v27 = vunpack.c.l.b16 %v3236_v33  ;;  %v3413_v54 = vld [vmem:[#allocation2 + $0x3] sm:$0x1]  ;;  %v6139_v26 = vld [vmem:[%s9794_s6 + $0x30] sm:$0xff]  ;;  %v5696_v55 = vld [vmem:[%s9794_s6 + $0x68] sm:$0xf] }
 0x7c5   : > { %v3262_v46 = vunpack.c.l.b16 %v3249_v43  ;;  %v3315_v40 = vunpack.c.l.b16 %v3237_v35  ;;  %v3414_v50 = vld [vmem:[#allocation2 + $0x23] sm:$0x1]  ;;  %v3360_v32 = vpack.c.bf16 %v3356_v13, %v3356_v13  ;;  %v3361_v2 = vpack.c.bf16 %v3357_v62, %v3357_v62  ;;  %v5709_v12 = vld [vmem:[%s9794_s6 + $0x78] sm:$0xf]  ;;  %v6148_v14 = vld [vmem:[%s9794_s6 + $0x78] sm:$0x10]  ;;  %3465 = vmatpush.bf16.msrb.mxu3 %v6139_v26 }
 0x7c6   : > { %v3263_v38 = vunpack.c.l.b16 %v3250_v11  ;;  %v3264_v21 = vrot.slane %v3261_v52, 7  ;;  %v3316_v23 = vunpack.c.l.b16 %v3238_v53  ;;  %v3317_v41 = vrot.slane %v3314_v27, 7  ;;  %v3415_v5 = vld [vmem:[#allocation2 + $0x43] sm:$0x1]  ;;  %v3472_v28 = vld [vmem:[#allocation2 + $0x4] sm:$0x1] }
 0x7c7   : > { %v3267_v34 = vrot.slane %v3262_v46, 6  ;;  %v3319_v20 = vrot.slane %v3315_v40, 6  ;;  %v3371_v25 = vunpack.c.l.b16 %v3358_v0  ;;  %v3372_v16 = vunpack.c.l.b16 %v3359_v22  ;;  %v3416_v1 = vld [vmem:[#allocation2 + $0x63] sm:$0x1]  ;;  %v3473_v7 = vld [vmem:[#allocation2 + $0x24] sm:$0x1] }
 0x7c8   : > { %v3270_v44 = vrot.slane %v3263_v38, 5  ;;  %v3266_v17 = vsel %vm3265_vm9, %v3264_v21, %v3260_v29  ;;  %v3321_v49 = vrot.slane %v3316_v23, 5  ;;  %v3318_v31 = vsel %vm3265_vm9, %v3317_v41, %v3313_v10  ;;  %v3474_v37 = vld [vmem:[#allocation2 + $0x44] sm:$0x1]  ;;  %v3590_v51 = vld [vmem:[#allocation2 + $0x6] sm:$0x1] }
 0x7c9   : > { %v3269_v61 = vsel %vm3268_vm12, %v3267_v34, %v3266_v17  ;;  %v3320_v18 = vsel %vm3268_vm12, %v3319_v20, %v3318_v31  ;;  %v3373_v48 = vunpack.c.l.b16 %v3360_v32  ;;  %v3417_v45 = vpack.c.bf16 %v3413_v54, %v3413_v54  ;;  %v3475_v17 = vld [vmem:[#allocation2 + $0x64] sm:$0x1]  ;;  %v3532_v20 = vld [vmem:[#allocation2 + $0x25] sm:$0x1] }
 0x7ca   : > { %v3272_v6 = vsel %vm3271_vm0, %v3270_v44, %v3269_v61  ;;  %v3322_v24 = vsel %vm3271_vm0, %v3321_v49, %v3320_v18  ;;  %v3418_v8 = vpack.c.bf16 %v3414_v50, %v3414_v50  ;;  %v3374_v60 = vunpack.c.l.b16 %v3361_v2  ;;  %v3531_v61 = vld [vmem:[#allocation2 + $0x5] sm:$0x1] }
 0x7cb   : > { %v3273_v4 = vpack.c.b16 %v3272_v6, %v3272_v6  ;;  %v3323_v57 = vpack.c.b16 %v3322_v24, %v3322_v24  ;;  %v3375_v43 = vrot.slane %v3372_v16, 7  ;;  %v3419_v11 = vpack.c.bf16 %v3415_v5, %v3415_v5  ;;  %v6145_v62 = vld [vmem:[%s9794_s6 + $0x60] sm:$0xff]  ;;  %v6147_v6 = vld [vmem:[%s9794_s6 + $0x70] sm:$0xff] }
 0x7cc   : > { %v3377_v3 = vrot.slane %v3373_v48, 6  ;;  %v3420_v29 = vpack.c.bf16 %v3416_v1, %v3416_v1  ;;  %v3430_v52 = vunpack.c.l.b16 %v3417_v45  ;;  %v3431_v63 = vunpack.c.l.b16 %v3418_v8  ;;  %v3534_v31 = vld [vmem:[#allocation2 + $0x65] sm:$0x1]  ;;  %v3591_v48 = vld [vmem:[#allocation2 + $0x26] sm:$0x1]  ;;  %v6143_v8 = vld [vmem:[%s9794_s6 + $0x50] sm:$0xff] }
 0x7cd   : > { %5624 = vmatmul.msk.bf16.vlgmr.msra.gmra.mxu2 %vm3226_vm11, %v3273_v4  ;;  %5633 = vmatmul.msk.bf16.vlgmr.msra.gmra.mxu3 %vm3226_vm11, %v3323_v57  ;;  %v3376_v46 = vsel %vm3265_vm9, %v3375_v43, %v3371_v25  ;;  %v3379_v38 = vrot.slane %v3374_v60, 5  ;;  %v3432_v56 = vunpack.c.l.b16 %v3419_v11  ;;  %v5697_v33 = vor.u32 %v6146_v19, %v5696_v55  ;;  %v3533_v4 = vld [vmem:[#allocation2 + $0x45] sm:$0x1]  ;;  %v3592_v45 = vld [vmem:[#allocation2 + $0x46] sm:$0x1] }
 0x7ce   : > { %v3378_v21 = vsel %vm3268_vm12, %v3377_v3, %v3376_v46  ;;  %v3433_v35 = vunpack.c.l.b16 %v3420_v29  ;;  %v3434_v53 = vrot.slane %v3431_v63, 7  ;;  %v5710_v15 = vor.u32 %v6148_v14, %v5709_v12  ;;  %v6141_v18 = vld [vmem:[%s9794_s6 + $0x40] sm:$0xff] }
 0x7cf   : > { %v9310_v34 = vsel %vm3271_vm0, %v3379_v38, %v3378_v21  ;;  %v3436_v44 = vrot.slane %v3432_v56, 6  ;;  %v3633_v10 = vand.u32 %v5697_v33, %v9245_v36  ;;  %v5671_v27 = vor.u32 %v6142_v42, %v5670_v47  ;;  %v3593_v60 = vld [vmem:[#allocation2 + $0x66] sm:$0x1]  ;;  %v3649_v33 = vld [vmem:[#allocation2 + $0x7] sm:$0x1] }
 0x7d0   : > { %v3381_v40 = vpack.c.b16 %v9310_v34, %v9310_v34  ;;  %v3435_v23 = vsel %vm3265_vm9, %v3434_v53, %v3430_v52  ;;  %v3438_v59 = vrot.slane %v3433_v35, 5  ;;  %v3692_v13 = vand.u32 %v5710_v15, %v9245_v36  ;;  %v3650_v53 = vld [vmem:[#allocation2 + $0x27] sm:$0x1] }
 0x7d1   : > { %v3437_v41 = vsel %vm3268_vm12, %v3436_v44, %v3435_v23  ;;  %3641 = vmatpush.bf16.msra.mxu2 %v3633_v10  ;;  %v3515_v30 = vand.u32 %v5671_v27, %v9245_v36  ;;  %v3476_v0 = vpack.c.bf16 %v3472_v28, %v3472_v28  ;;  %v3477_v22 = vpack.c.bf16 %v3473_v7, %v3473_v7  ;;  %v3651_v15 = vld [vmem:[#allocation2 + $0x47] sm:$0x1] }
 0x7d2   : > { %v9326_v49 = vsel %vm3271_vm0, %v3438_v59, %v3437_v41  ;;  %3700 = vmatpush.bf16.msra.mxu3 %v3692_v13  ;;  %v3478_v54 = vpack.c.bf16 %v3474_v37, %v3474_v37  ;;  %v3479_v50 = vpack.c.bf16 %v3475_v17, %v3475_v17  ;;  %v3574_v5 = vand.u32 %v5684_v58, %v9245_v36  ;;  %v3652_v27 = vld [vmem:[#allocation2 + $0x67] sm:$0x1]  ;;  %v5748_v37 = vld [vmem:[%s9794_s6 + $0xa8] sm:$0xf]  ;;  %v6154_v17 = vld [vmem:[%s9794_s6 + $0xa8] sm:$0x10] }
 0x7d3   : > { %v3440_v32 = vpack.c.b16 %v9326_v49, %v9326_v49  ;;  %3523 = vmatpush.bf16.msra.mxu0 %v3515_v30  ;;  %v3489_v2 = vunpack.c.l.b16 %v3476_v0  ;;  %v3535_v25 = vpack.c.bf16 %v3531_v61, %v3531_v61  ;;  %v3490_v16 = vunpack.c.l.b16 %v3477_v22  ;;  %v5722_v13 = vld [vmem:[%s9794_s6 + $0x88] sm:$0xf]  ;;  %v6150_v61 = vld [vmem:[%s9794_s6 + $0x88] sm:$0x10]  ;;  %v5761_v0 = vld [vmem:[%s9794_s6 + $0xb8] sm:$0xf] }
 0x7d4   : > { %v3491_v1 = vunpack.c.l.b16 %v3478_v54  ;;  %v3492_v24 = vunpack.c.l.b16 %v3479_v50  ;;  %v3536_v26 = vpack.c.bf16 %v3532_v20, %v3532_v20  ;;  %3582 = vmatpush.bf16.msra.mxu1 %v3574_v5  ;;  %v3537_v55 = vpack.c.bf16 %v3533_v4, %v3533_v4  ;;  %v5735_v5 = vld [vmem:[%s9794_s6 + $0x98] sm:$0xf] }
 0x7d5   : > { %3642 = vmatpush.bf16.msra.mxu2 %v6145_v62  ;;  %v3538_v19 = vpack.c.bf16 %v3534_v31, %v3534_v31  ;;  %v3548_v57 = vunpack.c.l.b16 %v3535_v25  ;;  %v3594_v43 = vpack.c.bf16 %v3590_v51, %v3590_v51  ;;  %v3493_v11 = vrot.slane %v3490_v16, 7 }
 0x7d6   : > { %v3495_v12 = vrot.slane %v3491_v1, 6  ;;  %v3497_v14 = vrot.slane %v3492_v24, 5  ;;  %3701 = vmatpush.bf16.msra.mxu3 %v6147_v6  ;;  %v3549_v3 = vunpack.c.l.b16 %v3536_v26  ;;  %v3550_v29 = vunpack.c.l.b16 %v3537_v55  ;;  %v6156_v6 = vld [vmem:[%s9794_s6 + $0xb8] sm:$0x10]  ;;  %v3708_v1 = vld [vmem:[#allocation2 + $0x8] sm:$0x1] }
 0x7d7   : > { %3524 = vmatpush.bf16.msra.mxu0 %v6141_v18  ;;  %v3551_v52 = vunpack.c.l.b16 %v3538_v19  ;;  %v3595_v63 = vpack.c.bf16 %v3591_v48, %v3591_v48  ;;  %v3596_v47 = vpack.c.bf16 %v3592_v45, %v3592_v45  ;;  %v3494_v42 = vsel %vm3265_vm9, %v3493_v11, %v3489_v2  ;;  %v3709_v24 = vld [vmem:[#allocation2 + $0x28] sm:$0x1]  ;;  %v6149_v11 = vld [vmem:[%s9794_s6 + $0x80] sm:$0xff] }
 0x7d8   : > { %v3552_v46 = vrot.slane %v3549_v3, 7  ;;  %v3597_v38 = vpack.c.bf16 %v3593_v60, %v3593_v60  ;;  %v3607_v56 = vunpack.c.l.b16 %v3594_v43  ;;  %3583 = vmatpush.bf16.msra.mxu1 %v6143_v8  ;;  %v3496_v39 = vsel %vm3268_vm12, %v3495_v12, %v3494_v42  ;;  %v3710_v55 = vld [vmem:[#allocation2 + $0x48] sm:$0x1]  ;;  %v3768_v42 = vld [vmem:[#allocation2 + $0x29] sm:$0x1] }
 0x7d9   : > { %v3554_v9 = vrot.slane %v3550_v29, 6  ;;  %v3556_v21 = vrot.slane %v3551_v52, 5  ;;  %v3608_v35 = vunpack.c.l.b16 %v3595_v63  ;;  %v3498_v28 = vsel %vm3271_vm0, %v3497_v14, %v3496_v39  ;;  %v3711_v12 = vld [vmem:[#allocation2 + $0x68] sm:$0x1]  ;;  %v6153_v29 = vld [vmem:[%s9794_s6 + $0xa0] sm:$0xff] }
 0x7da   : > { %v3553_v7 = vsel %vm3265_vm9, %v3552_v46, %v3548_v57  ;;  %v3609_v44 = vunpack.c.l.b16 %v3596_v47  ;;  %v3610_v10 = vunpack.c.l.b16 %v3597_v38  ;;  %v3499_v23 = vpack.c.b16 %v3498_v28, %v3498_v28  ;;  %v3767_v47 = vld [vmem:[#allocation2 + $0x9] sm:$0x1]  ;;  %v3826_v28 = vld [vmem:[#allocation2 + $0xa] sm:$0x1] }
 0x7db   : > { %v3555_v34 = vsel %vm3268_vm12, %v3554_v9, %v3553_v7  ;;  %v3611_v59 = vrot.slane %v3608_v35, 7  ;;  %v3654_v62 = vpack.c.bf16 %v3650_v53, %v3650_v53  ;;  %v3655_v22 = vpack.c.bf16 %v3651_v15, %v3651_v15  ;;  %v3769_v39 = vld [vmem:[#allocation2 + $0x49] sm:$0x1] }
 0x7dc   : > { %v3557_v41 = vsel %vm3271_vm0, %v3556_v21, %v3555_v34  ;;  %v3613_v30 = vrot.slane %v3609_v44, 6  ;;  %v3615_v58 = vrot.slane %v3610_v10, 5  ;;  %5672 = vmatmul.msk.bf16.vlgmr.msra.gmra.mxu0 %vm3226_vm11, %v3499_v23  ;;  %v3656_v4 = vpack.c.bf16 %v3652_v27, %v3652_v27  ;;  %v3770_v9 = vld [vmem:[#allocation2 + $0x69] sm:$0x1]  ;;  %v6151_v44 = vld [vmem:[%s9794_s6 + $0x90] sm:$0xff] }
 0x7dd   : > { %5646 = vmatmul.msk.bf16.vlgmr.msrb.gmra.mxu2 %vm3226_vm11, %v3381_v40  ;;  %v3653_v40 = vpack.c.bf16 %v3649_v33, %v3649_v33  ;;  %5659 = vmatmul.msk.bf16.vlgmr.msrb.gmra.mxu3 %vm3226_vm11, %v3440_v32  ;;  %v3558_v20 = vpack.c.b16 %v3557_v41, %v3557_v41  ;;  %v3612_v49 = vsel %vm3265_vm9, %v3611_v59, %v3607_v56  ;;  %v3667_v31 = vunpack.c.l.b16 %v3654_v62  ;;  %v6152_v32 = vld [vmem:[%s9794_s6 + $0x98] sm:$0x10]  ;;  %v6155_v33 = vld [vmem:[%s9794_s6 + $0xb0] sm:$0xff]  ;;  %v3828_v23 = vld [vmem:[#allocation2 + $0x4a] sm:$0x1] }
 0x7de   : > { %v3614_v50 = vsel %vm3268_vm12, %v3613_v30, %v3612_v49  ;;  %v5749_v51 = vor.u32 %v6154_v17, %v5748_v37  ;;  %v3668_v2 = vunpack.c.l.b16 %v3655_v22  ;;  %v5723_v25 = vor.u32 %v6150_v61, %v5722_v13  ;;  %v3827_v17 = vld [vmem:[#allocation2 + $0x2a] sm:$0x1] }
 0x7df   : > { %v3666_v54 = vunpack.c.l.b16 %v3653_v40  ;;  %5685 = vmatmul.msk.bf16.vlgmr.msra.gmra.mxu1 %vm3226_vm11, %v3558_v20  ;;  %v9377_v18 = vsel %vm3271_vm0, %v3615_v58, %v3614_v50  ;;  %v5762_v16 = vor.u32 %v6156_v6, %v5761_v0  ;;  %v3669_v48 = vunpack.c.l.b16 %v3656_v4  ;;  %v3829_v58 = vld [vmem:[#allocation2 + $0x6a] sm:$0x1] }
 0x7e0   : > { %v3617_v26 = vpack.c.b16 %v9377_v18, %v9377_v18  ;;  %v3670_v45 = vrot.slane %v3667_v31, 7  ;;  %v3869_v8 = vand.u32 %v5749_v51, %v9245_v36  ;;  %v3672_v19 = vrot.slane %v3668_v2, 6  ;;  %v3885_v31 = vld [vmem:[#allocation2 + $0xb] sm:$0x1] }
 0x7e1   : > { %v3751_v57 = vand.u32 %v5723_v25, %v9245_v36  ;;  %v3928_v60 = vand.u32 %v5762_v16, %v9245_v36  ;;  %v5736_v43 = vor.u32 %v6152_v32, %v5735_v5  ;;  %v3674_v3 = vrot.slane %v3669_v48, 5  ;;  %v3886_v2 = vld [vmem:[#allocation2 + $0x2b] sm:$0x1] }
 0x7e2   : > { %v3671_v14 = vsel %vm3265_vm9, %v3670_v45, %v3666_v54  ;;  %3877 = vmatpush.bf16.msrb.mxu2 %v3869_v8  ;;  %v3712_v52 = vpack.c.bf16 %v3708_v1, %v3708_v1  ;;  %v3713_v63 = vpack.c.bf16 %v3709_v24, %v3709_v24  ;;  %v3714_v56 = vpack.c.bf16 %v3710_v55, %v3710_v55  ;;  %v3887_v25 = vld [vmem:[#allocation2 + $0x4b] sm:$0x1] }
 0x7e3   : > { %v3673_v46 = vsel %vm3268_vm12, %v3672_v19, %v3671_v14  ;;  %3759 = vmatpush.bf16.msrb.mxu0 %v3751_v57  ;;  %3936 = vmatpush.bf16.msrb.mxu3 %v3928_v60  ;;  %v3810_v38 = vand.u32 %v5736_v43, %v9245_v36  ;;  %v3715_v35 = vpack.c.bf16 %v3711_v12, %v3711_v12  ;;  %v3888_v45 = vld [vmem:[#allocation2 + $0x6b] sm:$0x1]  ;;  %v6158_v60 = vld [vmem:[%s9794_s6 + $0xc8] sm:$0x10] }
 0x7e4   : > { %v3675_v21 = vsel %vm3271_vm0, %v3674_v3, %v3673_v46  ;;  %v3725_v53 = vunpack.c.l.b16 %v3712_v52  ;;  %v3726_v15 = vunpack.c.l.b16 %v3713_v63  ;;  %v3727_v10 = vunpack.c.l.b16 %v3714_v56  ;;  %v5800_v3 = vld [vmem:[%s9794_s6 + $0xe8] sm:$0xf]  ;;  %v5813_v46 = vld [vmem:[%s9794_s6 + $0xf8] sm:$0xf] }
 0x7e5   : > { %v3676_v7 = vpack.c.b16 %v3675_v21, %v3675_v21  ;;  %3818 = vmatpush.bf16.msrb.mxu1 %v3810_v38  ;;  %v3771_v27 = vpack.c.bf16 %v3767_v47, %v3767_v47  ;;  %v3772_v37 = vpack.c.bf16 %v3768_v42, %v3768_v42  ;;  %v3728_v34 = vunpack.c.l.b16 %v3715_v35  ;;  %v6164_v38 = vld [vmem:[%s9794_s6 + $0xf8] sm:$0x10] }
 0x7e6   : > { %3878 = vmatpush.bf16.msrb.mxu2 %v6153_v29  ;;  %v3729_v59 = vrot.slane %v3726_v15, 7  ;;  %v3773_v40 = vpack.c.bf16 %v3769_v39, %v3769_v39  ;;  %v3774_v13 = vpack.c.bf16 %v3770_v9, %v3770_v9  ;;  %v3731_v61 = vrot.slane %v3727_v10, 6  ;;  %v6162_v29 = vld [vmem:[%s9794_s6 + $0xe8] sm:$0x10] }
 0x7e7   : > { %3760 = vmatpush.bf16.msrb.mxu0 %v6149_v11  ;;  %3937 = vmatpush.bf16.msrb.mxu3 %v6155_v33  ;;  %v3784_v41 = vunpack.c.l.b16 %v3771_v27  ;;  %v3785_v30 = vunpack.c.l.b16 %v3772_v37  ;;  %v3830_v62 = vpack.c.bf16 %v3826_v28, %v3826_v28  ;;  %v3733_v6 = vrot.slane %v3728_v34, 5  ;;  %v5787_v28 = vld [vmem:[%s9794_s6 + $0xd8] sm:$0xf]  ;;  %v3946_v34 = vld [vmem:[#allocation2 + $0x4c] sm:$0x1] }
 0x7e8   : > { %v3730_v0 = vsel %vm3265_vm9, %v3729_v59, %v3725_v53  ;;  %v3786_v20 = vunpack.c.l.b16 %v3773_v40  ;;  %v3787_v49 = vunpack.c.l.b16 %v3774_v13  ;;  %v3831_v50 = vpack.c.bf16 %v3827_v17, %v3827_v17 }
 0x7e9   : > { %3819 = vmatpush.bf16.msrb.mxu1 %v6151_v44  ;;  %v3732_v22 = vsel %vm3268_vm12, %v3731_v61, %v3730_v0  ;;  %v3788_v54 = vrot.slane %v3785_v30, 7  ;;  %v3832_v4 = vpack.c.bf16 %v3828_v23, %v3828_v23  ;;  %v3833_v18 = vpack.c.bf16 %v3829_v58, %v3829_v58  ;;  %v3944_v44 = vld [vmem:[#allocation2 + $0xc] sm:$0x1]  ;;  %v6157_v0 = vld [vmem:[%s9794_s6 + $0xc0] sm:$0xff] }
 0x7ea   : > { %v3734_v51 = vsel %vm3271_vm0, %v3733_v6, %v3732_v22  ;;  %v3790_v5 = vrot.slane %v3786_v20, 6  ;;  %v3792_v32 = vrot.slane %v3787_v49, 5  ;;  %v3843_v24 = vunpack.c.l.b16 %v3830_v62  ;;  %v3945_v23 = vld [vmem:[#allocation2 + $0x2c] sm:$0x1]  ;;  %v6161_v6 = vld [vmem:[%s9794_s6 + $0xe0] sm:$0xff] }
 0x7eb   : > { %v3735_v16 = vpack.c.b16 %v3734_v51, %v3734_v51  ;;  %v3789_v1 = vsel %vm3265_vm9, %v3788_v54, %v3784_v41  ;;  %v3844_v48 = vunpack.c.l.b16 %v3831_v50  ;;  %v3845_v55 = vunpack.c.l.b16 %v3832_v4  ;;  %v3947_v41 = vld [vmem:[#allocation2 + $0x6c] sm:$0x1]  ;;  %v4003_v49 = vld [vmem:[#allocation2 + $0xd] sm:$0x1] }
 0x7ec   : > { %v3791_v8 = vsel %vm3268_vm12, %v3790_v5, %v3789_v1  ;;  %v3846_v19 = vunpack.c.l.b16 %v3833_v18  ;;  %v3889_v57 = vpack.c.bf16 %v3885_v31, %v3885_v31  ;;  %v3890_v12 = vpack.c.bf16 %v3886_v2, %v3886_v2  ;;  %v4004_v4 = vld [vmem:[#allocation2 + $0x2d] sm:$0x1] }
 0x7ed   : > { %5698 = vmatmul.msk.bf16.vlgmr.msra.gmra.mxu2 %vm3226_vm11, %v3617_v26  ;;  %v5774_v26 = vld [vmem:[%s9794_s6 + $0xc8] sm:$0xf]  ;;  %5711 = vmatmul.msk.bf16.vlgmr.msra.gmra.mxu3 %vm3226_vm11, %v3676_v7  ;;  %v3793_v43 = vsel %vm3271_vm0, %v3792_v32, %v3791_v8  ;;  %v3847_v11 = vrot.slane %v3844_v48, 7  ;;  %v3891_v14 = vpack.c.bf16 %v3887_v25, %v3887_v25  ;;  %v3849_v63 = vrot.slane %v3845_v55, 6  ;;  %v6160_v7 = vld [vmem:[%s9794_s6 + $0xd8] sm:$0x10] }
 0x7ee   : > { %5724 = vmatmul.msk.bf16.vlgmr.msrb.gmra.mxu0 %vm3226_vm11, %v3735_v16  ;;  %v3794_v52 = vpack.c.b16 %v3793_v43, %v3793_v43  ;;  %v3851_v47 = vrot.slane %v3846_v19, 5  ;;  %v3892_v42 = vpack.c.bf16 %v3888_v45, %v3888_v45  ;;  %v3902_v33 = vunpack.c.l.b16 %v3889_v57  ;;  %v4005_v31 = vld [vmem:[#allocation2 + $0x4d] sm:$0x1]  ;;  %v6163_v25 = vld [vmem:[%s9794_s6 + $0xf0] sm:$0xff]  ;;  %v4062_v16 = vld [vmem:[#allocation2 + $0xe] sm:$0x1] }
 0x7ef   : > { %v3848_v56 = vsel %vm3265_vm9, %v3847_v11, %v3843_v24  ;;  %v3903_v39 = vunpack.c.l.b16 %v3890_v12  ;;  %v3904_v9 = vunpack.c.l.b16 %v3891_v14  ;;  %v5801_v53 = vor.u32 %v6162_v29, %v5800_v3  ;;  %v4006_v51 = vld [vmem:[#allocation2 + $0x6d] sm:$0x1]  ;;  %v6159_v24 = vld [vmem:[%s9794_s6 + $0xd0] sm:$0xff]  ;;  %v4064_v43 = vld [vmem:[#allocation2 + $0x4e] sm:$0x1] }
 0x7f0   : > { %5737 = vmatmul.msk.bf16.vlgmr.msrb.gmra.mxu1 %vm3226_vm11, %v3794_v52  ;;  %v3850_v21 = vsel %vm3268_vm12, %v3849_v63, %v3848_v56  ;;  %v3905_v35 = vunpack.c.l.b16 %v3892_v42  ;;  %v5775_v15 = vor.u32 %v6158_v60, %v5774_v26  ;;  %v5814_v17 = vor.u32 %v6164_v38, %v5813_v46  ;;  %v4063_v60 = vld [vmem:[#allocation2 + $0x2e] sm:$0x1] }
 0x7f1   : > { %v3852_v10 = vsel %vm3271_vm0, %v3851_v47, %v3850_v21  ;;  %v3906_v27 = vrot.slane %v3903_v39, 7  ;;  %v3908_v37 = vrot.slane %v3904_v9, 6  ;;  %v4105_v13 = vand.u32 %v5801_v53, %v9245_v36  ;;  %v4065_v11 = vld [vmem:[#allocation2 + $0x6e] sm:$0x1]  ;;  %v4121_v39 = vld [vmem:[#allocation2 + $0xf] sm:$0x1] }
 0x7f2   : > { %v3853_v59 = vpack.c.b16 %v3852_v10, %v3852_v10  ;;  %v3910_v40 = vrot.slane %v3905_v35, 5  ;;  %v3987_v61 = vand.u32 %v5775_v15, %v9245_v36  ;;  %v4164_v58 = vand.u32 %v5814_v17, %v9245_v36  ;;  %v4122_v15 = vld [vmem:[#allocation2 + $0x2f] sm:$0x1] }
 0x7f3   : > { %v3907_v30 = vsel %vm3265_vm9, %v3906_v27, %v3902_v33  ;;  %v5788_v62 = vor.u32 %v6160_v7, %v5787_v28  ;;  %v3948_v20 = vpack.c.bf16 %v3944_v44, %v3944_v44  ;;  %4113 = vmatpush.bf16.msra.mxu2 %v4105_v13  ;;  %v3949_v54 = vpack.c.bf16 %v3945_v23, %v3945_v23  ;;  %v4123_v27 = vld [vmem:[#allocation2 + $0x4f] sm:$0x1]  ;;  %v6166_v13 = vld [vmem:[%s9794_s6 + $0x108] sm:$0x10] }
 0x7f4   : > { %v3909_v22 = vsel %vm3268_vm12, %v3908_v37, %v3907_v30  ;;  %3995 = vmatpush.bf16.msra.mxu0 %v3987_v61  ;;  %v3950_v50 = vpack.c.bf16 %v3946_v34, %v3946_v34  ;;  %4172 = vmatpush.bf16.msra.mxu3 %v4164_v58  ;;  %v3951_v18 = vpack.c.bf16 %v3947_v41, %v3947_v41  ;;  %v4124_v37 = vld [vmem:[#allocation2 + $0x6f] sm:$0x1] }
 0x7f5   : > { %v3911_v5 = vsel %vm3271_vm0, %v3910_v40, %v3909_v22  ;;  %v4046_v32 = vand.u32 %v5788_v62, %v9245_v36  ;;  %v3961_v2 = vunpack.c.l.b16 %v3948_v20  ;;  %v3962_v48 = vunpack.c.l.b16 %v3949_v54  ;;  %v5826_v40 = vld [vmem:[%s9794_s6 + $0x108] sm:$0xf]  ;;  %v5865_v54 = vld [vmem:[%s9794_s6 + $0x138] sm:$0xf] }
 0x7f6   : > { %v3912_v1 = vpack.c.b16 %v3911_v5, %v3911_v5  ;;  %v3963_v45 = vunpack.c.l.b16 %v3950_v50  ;;  %v4007_v8 = vpack.c.bf16 %v4003_v49, %v4003_v49  ;;  %v3964_v55 = vunpack.c.l.b16 %v3951_v18  ;;  %v5852_v62 = vld [vmem:[%s9794_s6 + $0x128] sm:$0xf]  ;;  %v6172_v50 = vld [vmem:[%s9794_s6 + $0x138] sm:$0x10] }
 0x7f7   : > { %4054 = vmatpush.bf16.msra.mxu1 %v4046_v32  ;;  %v4008_v19 = vpack.c.bf16 %v4004_v4, %v4004_v4  ;;  %v4009_v57 = vpack.c.bf16 %v4005_v31, %v4005_v31  ;;  %v4010_v26 = vpack.c.bf16 %v4006_v51, %v4006_v51  ;;  %4114 = vmatpush.bf16.msra.mxu2 %v6161_v6  ;;  %v3965_v12 = vrot.slane %v3962_v48, 7 }
 0x7f8   : > { %3996 = vmatpush.bf16.msra.mxu0 %v6157_v0  ;;  %v3967_v14 = vrot.slane %v3963_v45, 6  ;;  %v4020_v3 = vunpack.c.l.b16 %v4007_v8  ;;  %v4066_v29 = vpack.c.bf16 %v4062_v16, %v4062_v16  ;;  %v3969_v52 = vrot.slane %v3964_v55, 5  ;;  %4173 = vmatpush.bf16.msra.mxu3 %v6163_v25  ;;  %v6170_v0 = vld [vmem:[%s9794_s6 + $0x128] sm:$0x10]  ;;  %v5839_v16 = vld [vmem:[%s9794_s6 + $0x118] sm:$0xf] }
 0x7f9   : > { %v4021_v63 = vunpack.c.l.b16 %v4008_v19  ;;  %v4022_v47 = vunpack.c.l.b16 %v4009_v57  ;;  %v4023_v42 = vunpack.c.l.b16 %v4010_v26  ;;  %v3966_v46 = vsel %vm3265_vm9, %v3965_v12, %v3961_v2  ;;  %v4180_v19 = vld [vmem:[#allocation2 + $0x10] sm:$0x1] }
 0x7fa   : > { %v4067_v38 = vpack.c.bf16 %v4063_v60, %v4063_v60  ;;  %v4068_v56 = vpack.c.bf16 %v4064_v43, %v4064_v43  ;;  %v4069_v33 = vpack.c.bf16 %v4065_v11, %v4065_v11  ;;  %v3968_v9 = vsel %vm3268_vm12, %v3967_v14, %v3966_v46  ;;  %v4182_v57 = vld [vmem:[#allocation2 + $0x50] sm:$0x1] }
 0x7fb   : > { %4055 = vmatpush.bf16.msra.mxu1 %v6159_v24  ;;  %v4024_v21 = vrot.slane %v4021_v63, 7  ;;  %v4026_v35 = vrot.slane %v4022_v47, 6  ;;  %v4028_v53 = vrot.slane %v4023_v42, 5  ;;  %v3970_v28 = vsel %vm3271_vm0, %v3969_v52, %v3968_v9  ;;  %v4181_v24 = vld [vmem:[#allocation2 + $0x30] sm:$0x1]  ;;  %v6169_v63 = vld [vmem:[%s9794_s6 + $0x120] sm:$0xff] }
 0x7fc   : > { %v4079_v7 = vunpack.c.l.b16 %v4066_v29  ;;  %v4080_v44 = vunpack.c.l.b16 %v4067_v38  ;;  %v4081_v10 = vunpack.c.l.b16 %v4068_v56  ;;  %v3971_v17 = vpack.c.b16 %v3970_v28, %v3970_v28  ;;  %v4183_v12 = vld [vmem:[#allocation2 + $0x70] sm:$0x1]  ;;  %v4239_v56 = vld [vmem:[#allocation2 + $0x11] sm:$0x1]  ;;  %v4298_v28 = vld [vmem:[#allocation2 + $0x12] sm:$0x1] }
 0x7fd   : > { %5750 = vmatmul.msk.bf16.vlgmr.msrb.gmra.mxu2 %vm3226_vm11, %v3853_v59  ;;  %5763 = vmatmul.msk.bf16.vlgmr.msrb.gmra.mxu3 %vm3226_vm11, %v3912_v1  ;;  %v4025_v23 = vsel %vm3265_vm9, %v4024_v21, %v4020_v3  ;;  %v4082_v34 = vunpack.c.l.b16 %v4069_v33  ;;  %v4125_v59 = vpack.c.bf16 %v4121_v39, %v4121_v39  ;;  %v4126_v58 = vpack.c.bf16 %v4122_v15, %v4122_v15  ;;  %v6168_v1 = vld [vmem:[%s9794_s6 + $0x118] sm:$0x10]  ;;  %v4240_v33 = vld [vmem:[#allocation2 + $0x31] sm:$0x1] }
 0x7fe   : > { %v4027_v61 = vsel %vm3268_vm12, %v4026_v35, %v4025_v23  ;;  %v4083_v41 = vrot.slane %v4080_v44, 7  ;;  %v4085_v30 = vrot.slane %v4081_v10, 6  ;;  %5776 = vmatmul.msk.bf16.vlgmr.msra.gmra.mxu0 %vm3226_vm11, %v3971_v17  ;;  %v4127_v49 = vpack.c.bf16 %v4123_v27, %v4123_v27  ;;  %v4241_v39 = vld [vmem:[#allocation2 + $0x51] sm:$0x1]  ;;  %v6165_v35 = vld [vmem:[%s9794_s6 + $0x100] sm:$0xff] }
 0x7ff   : > { %v4029_v6 = vsel %vm3271_vm0, %v4028_v53, %v4027_v61  ;;  %v4087_v20 = vrot.slane %v4082_v34, 5  ;;  %v4128_v22 = vpack.c.bf16 %v4124_v37, %v4124_v37  ;;  %v4138_v51 = vunpack.c.l.b16 %v4125_v59  ;;  %v4242_v15 = vld [vmem:[#allocation2 + $0x71] sm:$0x1]  ;;  %v4300_v61 = vld [vmem:[#allocation2 + $0x52] sm:$0x1] }
 0x800   : > { %v4030_v4 = vpack.c.b16 %v4029_v6, %v4029_v6  ;;  %v4084_v31 = vsel %vm3265_vm9, %v4083_v41, %v4079_v7  ;;  %v4139_v5 = vunpack.c.l.b16 %v4126_v58  ;;  %v4140_v18 = vunpack.c.l.b16 %v4127_v49  ;;  %v6171_v37 = vld [vmem:[%s9794_s6 + $0x130] sm:$0xff] }
 0x801   : > { %v4086_v32 = vsel %vm3268_vm12, %v4085_v30, %v4084_v31  ;;  %v4141_v2 = vunpack.c.l.b16 %v4128_v22  ;;  %v5853_v25 = vor.u32 %v6170_v0, %v5852_v62  ;;  %v5827_v8 = vor.u32 %v6166_v13, %v5826_v40  ;;  %v6167_v17 = vld [vmem:[%s9794_s6 + $0x110] sm:$0xff] }
 0x802   : > { %5789 = vmatmul.msk.bf16.vlgmr.msra.gmra.mxu1 %vm3226_vm11, %v4030_v4  ;;  %v4088_v48 = vsel %vm3271_vm0, %v4087_v20, %v4086_v32  ;;  %v4142_v45 = vrot.slane %v4139_v5, 7  ;;  %v5866_v55 = vor.u32 %v6172_v50, %v5865_v54  ;;  %v4144_v60 = vrot.slane %v4140_v18, 6  ;;  %v4299_v13 = vld [vmem:[#allocation2 + $0x32] sm:$0x1] }
 0x803   : > { %v4089_v26 = vpack.c.b16 %v4088_v48, %v4088_v48  ;;  %v4146_v43 = vrot.slane %v4141_v2, 5  ;;  %v4341_v11 = vand.u32 %v5853_v25, %v9245_v36  ;;  %v4223_v3 = vand.u32 %v5827_v8, %v9245_v36  ;;  %v4301_v62 = vld [vmem:[#allocation2 + $0x72] sm:$0x1]  ;;  %v4357_v2 = vld [vmem:[#allocation2 + $0x13] sm:$0x1] }
 0x804   : > { %v4143_v14 = vsel %vm3265_vm9, %v4142_v45, %v4138_v51  ;;  %v4400_v29 = vand.u32 %v5866_v55, %v9245_v36  ;;  %v5840_v52 = vor.u32 %v6168_v1, %v5839_v16  ;;  %v4184_v42 = vpack.c.bf16 %v4180_v19, %v4180_v19  ;;  %v4358_v25 = vld [vmem:[#allocation2 + $0x33] sm:$0x1] }
 0x805   : > { %v4145_v47 = vsel %vm3268_vm12, %v4144_v60, %v4143_v14  ;;  %4349 = vmatpush.bf16.msrb.mxu2 %v4341_v11  ;;  %v4185_v46 = vpack.c.bf16 %v4181_v24, %v4181_v24  ;;  %v4186_v38 = vpack.c.bf16 %v4182_v57, %v4182_v57  ;;  %4231 = vmatpush.bf16.msrb.mxu0 %v4223_v3  ;;  %v4359_v45 = vld [vmem:[#allocation2 + $0x53] sm:$0x1]  ;;  %v5878_v60 = vld [vmem:[%s9794_s6 + $0x148] sm:$0xf] }
 0x806   : > { %v4147_v9 = vsel %vm3271_vm0, %v4146_v43, %v4145_v47  ;;  %4408 = vmatpush.bf16.msrb.mxu3 %v4400_v29  ;;  %v4282_v21 = vand.u32 %v5840_v52, %v9245_v36  ;;  %v4187_v53 = vpack.c.bf16 %v4183_v12, %v4183_v12  ;;  %v4197_v44 = vunpack.c.l.b16 %v4184_v42  ;;  %v6174_v43 = vld [vmem:[%s9794_s6 + $0x148] sm:$0x10]  ;;  %v5904_v29 = vld [vmem:[%s9794_s6 + $0x168] sm:$0xf] }
 0x807   : > { %v4148_v7 = vpack.c.b16 %v4147_v9, %v4147_v9  ;;  %v4198_v10 = vunpack.c.l.b16 %v4185_v46  ;;  %v4199_v27 = vunpack.c.l.b16 %v4186_v38  ;;  %v4243_v34 = vpack.c.bf16 %v4239_v56, %v4239_v56  ;;  %v6178_v52 = vld [vmem:[%s9794_s6 + $0x168] sm:$0x10]  ;;  %v5917_v38 = vld [vmem:[%s9794_s6 + $0x178] sm:$0xf]  ;;  %v6180_v56 = vld [vmem:[%s9794_s6 + $0x178] sm:$0x10] }
 0x808   : > { %4290 = vmatpush.bf16.msrb.mxu1 %v4282_v21  ;;  %v4200_v23 = vunpack.c.l.b16 %v4187_v53  ;;  %v4244_v59 = vpack.c.bf16 %v4240_v33, %v4240_v33  ;;  %v4245_v40 = vpack.c.bf16 %v4241_v39, %v4241_v39  ;;  %v4246_v58 = vpack.c.bf16 %v4242_v15, %v4242_v15 }
 0x809   : > { %4350 = vmatpush.bf16.msrb.mxu2 %v6169_v63  ;;  %v4201_v41 = vrot.slane %v4198_v10, 7  ;;  %v4203_v30 = vrot.slane %v4199_v27, 6  ;;  %v4302_v0 = vpack.c.bf16 %v4298_v28, %v4298_v28  ;;  %4232 = vmatpush.bf16.msrb.mxu0 %v6165_v35  ;;  %v4256_v20 = vunpack.c.l.b16 %v4243_v34  ;;  %v4417_v34 = vld [vmem:[#allocation2 + $0x34] sm:$0x1] }
 0x80a   : > { %v4205_v6 = vrot.slane %v4200_v23, 5  ;;  %v4257_v49 = vunpack.c.l.b16 %v4244_v59  ;;  %v4258_v22 = vunpack.c.l.b16 %v4245_v40  ;;  %4409 = vmatpush.bf16.msrb.mxu3 %v6171_v37  ;;  %v4259_v50 = vunpack.c.l.b16 %v4246_v58  ;;  %v4416_v23 = vld [vmem:[#allocation2 + $0x14] sm:$0x1] }
 0x80b   : > { %v4202_v54 = vsel %vm3265_vm9, %v4201_v41, %v4197_v44  ;;  %v4303_v4 = vpack.c.bf16 %v4299_v13, %v4299_v13  ;;  %v4304_v31 = vpack.c.bf16 %v4300_v61, %v4300_v61  ;;  %v4305_v18 = vpack.c.bf16 %v4301_v62, %v4301_v62  ;;  %v6176_v44 = vld [vmem:[%s9794_s6 + $0x158] sm:$0x10]  ;;  %v4418_v59 = vld [vmem:[#allocation2 + $0x54] sm:$0x1] }
 0x80c   : > { %4291 = vmatpush.bf16.msrb.mxu1 %v6167_v17  ;;  %v4204_v51 = vsel %vm3268_vm12, %v4203_v30, %v4202_v54  ;;  %v4260_v5 = vrot.slane %v4257_v49, 7  ;;  %v4262_v32 = vrot.slane %v4258_v22, 6  ;;  %v4264_v1 = vrot.slane %v4259_v50, 5  ;;  %v4419_v30 = vld [vmem:[#allocation2 + $0x74] sm:$0x1]  ;;  %v6173_v49 = vld [vmem:[%s9794_s6 + $0x140] sm:$0xff] }
 0x80d   : > { %5802 = vmatmul.msk.bf16.vlgmr.msra.gmra.mxu2 %vm3226_vm11, %v4089_v26  ;;  %5815 = vmatmul.msk.bf16.vlgmr.msra.gmra.mxu3 %vm3226_vm11, %v4148_v7  ;;  %v4206_v16 = vsel %vm3271_vm0, %v4205_v6, %v4204_v51  ;;  %v4315_v24 = vunpack.c.l.b16 %v4302_v0  ;;  %v4316_v48 = vunpack.c.l.b16 %v4303_v4  ;;  %v4317_v19 = vunpack.c.l.b16 %v4304_v31  ;;  %v4360_v26 = vld [vmem:[#allocation2 + $0x73] sm:$0x1]  ;;  %v5891_v7 = vld [vmem:[%s9794_s6 + $0x158] sm:$0xf]  ;;  %v4475_v4 = vld [vmem:[#allocation2 + $0x15] sm:$0x1] }
 0x80e   : > { %v4207_v8 = vpack.c.b16 %v4206_v16, %v4206_v16  ;;  %v4261_v55 = vsel %vm3265_vm9, %v4260_v5, %v4256_v20  ;;  %v4318_v57 = vunpack.c.l.b16 %v4305_v18  ;;  %v4361_v14 = vpack.c.bf16 %v4357_v2, %v4357_v2  ;;  %v4476_v31 = vld [vmem:[#allocation2 + $0x35] sm:$0x1] }
 0x80f   : > { %v4263_v11 = vsel %vm3268_vm12, %v4262_v32, %v4261_v55  ;;  %v4319_v12 = vrot.slane %v4316_v48, 7  ;;  %v4362_v3 = vpack.c.bf16 %v4358_v25, %v4358_v25  ;;  %v4321_v47 = vrot.slane %v4317_v19, 6  ;;  %v6177_v32 = vld [vmem:[%s9794_s6 + $0x160] sm:$0xff]  ;;  %v4477_v2 = vld [vmem:[#allocation2 + $0x55] sm:$0x1] }
 0x810   : > { %5828 = vmatmul.msk.bf16.vlgmr.msrb.gmra.mxu0 %vm3226_vm11, %v4207_v8  ;;  %v4265_v63 = vsel %vm3271_vm0, %v4264_v1, %v4263_v11  ;;  %v4323_v42 = vrot.slane %v4318_v57, 5  ;;  %v4363_v46 = vpack.c.bf16 %v4359_v45, %v4359_v45  ;;  %v4364_v9 = vpack.c.bf16 %v4360_v26, %v4360_v26  ;;  %v4478_v25 = vld [vmem:[#allocation2 + $0x75] sm:$0x1]  ;;  %v4534_v8 = vld [vmem:[#allocation2 + $0x16] sm:$0x1] }
 0x811   : > { %v4266_v33 = vpack.c.b16 %v4265_v63, %v4265_v63  ;;  %v4320_v39 = vsel %vm3265_vm9, %v4319_v12, %v4315_v24  ;;  %v4374_v21 = vunpack.c.l.b16 %v4361_v14  ;;  %v4375_v53 = vunpack.c.l.b16 %v4362_v3  ;;  %v6179_v45 = vld [vmem:[%s9794_s6 + $0x170] sm:$0xff] }
 0x812   : > { %v4322_v35 = vsel %vm3268_vm12, %v4321_v47, %v4320_v39  ;;  %v4376_v15 = vunpack.c.l.b16 %v4363_v46  ;;  %v5905_v28 = vor.u32 %v6178_v52, %v5904_v29  ;;  %v4377_v27 = vunpack.c.l.b16 %v4364_v9  ;;  %v6175_v19 = vld [vmem:[%s9794_s6 + $0x150] sm:$0xff] }
 0x813   : > { %5841 = vmatmul.msk.bf16.vlgmr.msrb.gmra.mxu1 %vm3226_vm11, %v4266_v33  ;;  %v4324_v10 = vsel %vm3271_vm0, %v4323_v42, %v4322_v35  ;;  %v5879_v37 = vor.u32 %v6174_v43, %v5878_v60  ;;  %v5918_v17 = vor.u32 %v6180_v56, %v5917_v38  ;;  %v4378_v13 = vrot.slane %v4375_v53, 7  ;;  %v4535_v43 = vld [vmem:[#allocation2 + $0x36] sm:$0x1] }
 0x814   : > { %v4325_v40 = vpack.c.b16 %v4324_v10, %v4324_v10  ;;  %v4380_v61 = vrot.slane %v4376_v15, 6  ;;  %v4577_v41 = vand.u32 %v5905_v28, %v9245_v36  ;;  %v4382_v58 = vrot.slane %v4377_v27, 5  ;;  %v4536_v29 = vld [vmem:[#allocation2 + $0x56] sm:$0x1]  ;;  %v4593_v15 = vld [vmem:[#allocation2 + $0x17] sm:$0x1] }
 0x815   : > { %v4459_v62 = vand.u32 %v5879_v37, %v9245_v36  ;;  %v4636_v0 = vand.u32 %v5918_v17, %v9245_v36  ;;  %v5892_v6 = vor.u32 %v6176_v44, %v5891_v7  ;;  %v4379_v20 = vsel %vm3265_vm9, %v4378_v13, %v4374_v21  ;;  %v4537_v52 = vld [vmem:[#allocation2 + $0x76] sm:$0x1]  ;;  %v4594_v28 = vld [vmem:[#allocation2 + $0x37] sm:$0x1]  ;;  %v5930_v13 = vld [vmem:[%s9794_s6 + $0x188] sm:$0xf] }
 0x816   : > { %4585 = vmatpush.bf16.msra.mxu2 %v4577_v41  ;;  %v4420_v22 = vpack.c.bf16 %v4416_v23, %v4416_v23  ;;  %v4421_v54 = vpack.c.bf16 %v4417_v34, %v4417_v34  ;;  %v4422_v50 = vpack.c.bf16 %v4418_v59, %v4418_v59  ;;  %v4381_v51 = vsel %vm3268_vm12, %v4380_v61, %v4379_v20  ;;  %v4595_v37 = vld [vmem:[#allocation2 + $0x57] sm:$0x1] }
 0x817   : > { %4467 = vmatpush.bf16.msra.mxu0 %v4459_v62  ;;  %4644 = vmatpush.bf16.msra.mxu3 %v4636_v0  ;;  %v4518_v5 = vand.u32 %v5892_v6, %v9245_v36  ;;  %v4423_v18 = vpack.c.bf16 %v4419_v30, %v4419_v30  ;;  %v4383_v16 = vsel %vm3271_vm0, %v4382_v58, %v4381_v51  ;;  %v5956_v62 = vld [vmem:[%s9794_s6 + $0x1a8] sm:$0xf]  ;;  %v6186_v0 = vld [vmem:[%s9794_s6 + $0x1a8] sm:$0x10] }
 0x818   : > { %v4433_v1 = vunpack.c.l.b16 %v4420_v22  ;;  %v4434_v24 = vunpack.c.l.b16 %v4421_v54  ;;  %v4435_v48 = vunpack.c.l.b16 %v4422_v50  ;;  %v4384_v55 = vpack.c.b16 %v4383_v16, %v4383_v16  ;;  %v6182_v6 = vld [vmem:[%s9794_s6 + $0x188] sm:$0x10]  ;;  %v5969_v50 = vld [vmem:[%s9794_s6 + $0x1b8] sm:$0xf] }
 0x819   : > { %4526 = vmatpush.bf16.msra.mxu1 %v4518_v5  ;;  %v4436_v57 = vunpack.c.l.b16 %v4423_v18  ;;  %v4479_v26 = vpack.c.bf16 %v4475_v4, %v4475_v4  ;;  %v4480_v60 = vpack.c.bf16 %v4476_v31, %v4476_v31  ;;  %v4481_v14 = vpack.c.bf16 %v4477_v2, %v4477_v2  ;;  %v6188_v4 = vld [vmem:[%s9794_s6 + $0x1b8] sm:$0x10] }
 0x81a   : > { %v4437_v11 = vrot.slane %v4434_v24, 7  ;;  %v4439_v12 = vrot.slane %v4435_v48, 6  ;;  %v4482_v3 = vpack.c.bf16 %v4478_v25, %v4478_v25  ;;  %4586 = vmatpush.bf16.msra.mxu2 %v6177_v32  ;;  %v4538_v46 = vpack.c.bf16 %v4534_v8, %v4534_v8 }
 0x81b   : > { %4468 = vmatpush.bf16.msra.mxu0 %v6173_v49  ;;  %v4441_v63 = vrot.slane %v4436_v57, 5  ;;  %v4492_v47 = vunpack.c.l.b16 %v4479_v26  ;;  %v4493_v42 = vunpack.c.l.b16 %v4480_v60  ;;  %4645 = vmatpush.bf16.msra.mxu3 %v6179_v45  ;;  %v4494_v56 = vunpack.c.l.b16 %v4481_v14  ;;  %v4652_v57 = vld [vmem:[#allocation2 + $0x18] sm:$0x1] }
 0x81c   : > { %v4438_v38 = vsel %vm3265_vm9, %v4437_v11, %v4433_v1  ;;  %v4495_v33 = vunpack.c.l.b16 %v4482_v3  ;;  %v4539_v39 = vpack.c.bf16 %v4535_v43, %v4535_v43  ;;  %v4540_v35 = vpack.c.bf16 %v4536_v29, %v4536_v29  ;;  %v4653_v1 = vld [vmem:[#allocation2 + $0x38] sm:$0x1] }
 0x81d   : > { %5854 = vmatmul.msk.bf16.vlgmr.msrb.gmra.mxu2 %vm3226_vm11, %v4325_v40  ;;  %5867 = vmatmul.msk.bf16.vlgmr.msrb.gmra.mxu3 %vm3226_vm11, %v4384_v55  ;;  %v4440_v9 = vsel %vm3268_vm12, %v4439_v12, %v4438_v38  ;;  %v4496_v21 = vrot.slane %v4493_v42, 7  ;;  %v4541_v53 = vpack.c.bf16 %v4537_v52, %v4537_v52  ;;  %v4498_v44 = vrot.slane %v4494_v56, 6  ;;  %v4596_v40 = vld [vmem:[#allocation2 + $0x77] sm:$0x1]  ;;  %v5943_v55 = vld [vmem:[%s9794_s6 + $0x198] sm:$0xf] }
 0x81e   : > { %4527 = vmatpush.bf16.msra.mxu1 %v6175_v19  ;;  %v4442_v7 = vsel %vm3271_vm0, %v4441_v63, %v4440_v9  ;;  %v4500_v10 = vrot.slane %v4495_v33, 5  ;;  %v4551_v27 = vunpack.c.l.b16 %v4538_v46  ;;  %v4552_v34 = vunpack.c.l.b16 %v4539_v39  ;;  %v6184_v19 = vld [vmem:[%s9794_s6 + $0x198] sm:$0x10]  ;;  %v4654_v12 = vld [vmem:[#allocation2 + $0x58] sm:$0x1]  ;;  %v6185_v38 = vld [vmem:[%s9794_s6 + $0x1a0] sm:$0xff] }
 0x81f   : > { %v4443_v17 = vpack.c.b16 %v4442_v7, %v4442_v7  ;;  %v4497_v23 = vsel %vm3265_vm9, %v4496_v21, %v4492_v47  ;;  %v4553_v59 = vunpack.c.l.b16 %v4540_v35  ;;  %v4554_v41 = vunpack.c.l.b16 %v4541_v53  ;;  %v4655_v14 = vld [vmem:[#allocation2 + $0x78] sm:$0x1]  ;;  %v6181_v47 = vld [vmem:[%s9794_s6 + $0x180] sm:$0xff]  ;;  %v4711_v39 = vld [vmem:[#allocation2 + $0x19] sm:$0x1] }
 0x820   : > { %v4499_v61 = vsel %vm3268_vm12, %v4498_v44, %v4497_v23  ;;  %v4597_v30 = vpack.c.bf16 %v4593_v15, %v4593_v15  ;;  %v4598_v58 = vpack.c.bf16 %v4594_v28, %v4594_v28  ;;  %v4555_v49 = vrot.slane %v4552_v34, 7  ;;  %v4712_v9 = vld [vmem:[#allocation2 + $0x39] sm:$0x1]  ;;  %v6187_v15 = vld [vmem:[%s9794_s6 + $0x1b0] sm:$0xff] }
 0x821   : > { %5880 = vmatmul.msk.bf16.vlgmr.msra.gmra.mxu0 %vm3226_vm11, %v4443_v17  ;;  %v4501_v20 = vsel %vm3271_vm0, %v4500_v10, %v4499_v61  ;;  %v4557_v22 = vrot.slane %v4553_v59, 6  ;;  %v4599_v54 = vpack.c.bf16 %v4595_v37, %v4595_v37  ;;  %v4559_v51 = vrot.slane %v4554_v41, 5  ;;  %v4713_v28 = vld [vmem:[#allocation2 + $0x59] sm:$0x1]  ;;  %v4770_v17 = vld [vmem:[#allocation2 + $0x1a] sm:$0x1] }
 0x822   : > { %v4502_v31 = vpack.c.b16 %v4501_v20, %v4501_v20  ;;  %v4600_v5 = vpack.c.bf16 %v4596_v40, %v4596_v40  ;;  %v4610_v32 = vunpack.c.l.b16 %v4597_v30  ;;  %v4556_v18 = vsel %vm3265_vm9, %v4555_v49, %v4551_v27  ;;  %v4714_v7 = vld [vmem:[#allocation2 + $0x79] sm:$0x1]  ;;  %v6183_v61 = vld [vmem:[%s9794_s6 + $0x190] sm:$0xff] }
 0x823   : > { %v4611_v2 = vunpack.c.l.b16 %v4598_v58  ;;  %v4612_v25 = vunpack.c.l.b16 %v4599_v54  ;;  %v5957_v16 = vor.u32 %v6186_v0, %v5956_v62  ;;  %v4558_v24 = vsel %vm3268_vm12, %v4557_v22, %v4556_v18  ;;  %v4772_v0 = vld [vmem:[#allocation2 + $0x5a] sm:$0x1] }
 0x824   : > { %5893 = vmatmul.msk.bf16.vlgmr.msra.gmra.mxu1 %vm3226_vm11, %v4502_v31  ;;  %v4613_v48 = vunpack.c.l.b16 %v4600_v5  ;;  %v5931_v45 = vor.u32 %v6182_v6, %v5930_v13  ;;  %v5970_v8 = vor.u32 %v6188_v4, %v5969_v50  ;;  %v4560_v26 = vsel %vm3271_vm0, %v4559_v51, %v4558_v24  ;;  %v4771_v13 = vld [vmem:[#allocation2 + $0x3a] sm:$0x1] }
 0x825   : > { %v4614_v60 = vrot.slane %v4611_v2, 7  ;;  %v4616_v43 = vrot.slane %v4612_v25, 6  ;;  %v4813_v11 = vand.u32 %v5957_v16, %v9245_v36  ;;  %v4561_v3 = vpack.c.b16 %v4560_v26, %v4560_v26  ;;  %v4773_v6 = vld [vmem:[#allocation2 + $0x7a] sm:$0x1]  ;;  %v4829_v25 = vld [vmem:[#allocation2 + $0x1b] sm:$0x1] }
 0x826   : > { %v4618_v29 = vrot.slane %v4613_v48, 5  ;;  %v4695_v52 = vand.u32 %v5931_v45, %v9245_v36  ;;  %v4872_v63 = vand.u32 %v5970_v8, %v9245_v36  ;;  %v5944_v46 = vor.u32 %v6184_v19, %v5943_v55  ;;  %v4830_v16 = vld [vmem:[#allocation2 + $0x3b] sm:$0x1] }
 0x827   : > { %v4615_v42 = vsel %vm3265_vm9, %v4614_v60, %v4610_v32  ;;  %4821 = vmatpush.bf16.msrb.mxu2 %v4813_v11  ;;  %v4656_v56 = vpack.c.bf16 %v4652_v57, %v4652_v57  ;;  %v4657_v33 = vpack.c.bf16 %v4653_v1, %v4653_v1  ;;  %v4658_v35 = vpack.c.bf16 %v4654_v12, %v4654_v12  ;;  %v4831_v8 = vld [vmem:[#allocation2 + $0x5b] sm:$0x1] }
 0x828   : > { %v4617_v21 = vsel %vm3268_vm12, %v4616_v43, %v4615_v42  ;;  %4703 = vmatpush.bf16.msrb.mxu0 %v4695_v52  ;;  %4880 = vmatpush.bf16.msrb.mxu3 %v4872_v63  ;;  %v4659_v53 = vpack.c.bf16 %v4655_v14, %v4655_v14  ;;  %v4754_v10 = vand.u32 %v5944_v46, %v9245_v36  ;;  %v4832_v60 = vld [vmem:[#allocation2 + $0x7b] sm:$0x1]  ;;  %v6008_v46 = vld [vmem:[%s9794_s6 + $0x1e8] sm:$0xf] }
 0x829   : > { %v4619_v44 = vsel %vm3271_vm0, %v4618_v29, %v4617_v21  ;;  %v4669_v27 = vunpack.c.l.b16 %v4656_v56  ;;  %v4670_v37 = vunpack.c.l.b16 %v4657_v33  ;;  %v4671_v34 = vunpack.c.l.b16 %v4658_v35  ;;  %v6190_v29 = vld [vmem:[%s9794_s6 + $0x1c8] sm:$0x10]  ;;  %v6021_v21 = vld [vmem:[%s9794_s6 + $0x1f8] sm:$0xf]  ;;  %v6196_v35 = vld [vmem:[%s9794_s6 + $0x1f8] sm:$0x10] }
 0x82a   : > { %v4620_v23 = vpack.c.b16 %v4619_v44, %v4619_v44  ;;  %v4672_v59 = vunpack.c.l.b16 %v4659_v53  ;;  %v4715_v40 = vpack.c.bf16 %v4711_v39, %v4711_v39  ;;  %4762 = vmatpush.bf16.msrb.mxu1 %v4754_v10  ;;  %v4716_v30 = vpack.c.bf16 %v4712_v9, %v4712_v9 }
 0x82b   : > { %4822 = vmatpush.bf16.msrb.mxu2 %v6185_v38  ;;  %v4673_v41 = vrot.slane %v4670_v37, 7  ;;  %v4717_v58 = vpack.c.bf16 %v4713_v28, %v4713_v28  ;;  %v4718_v62 = vpack.c.bf16 %v4714_v7, %v4714_v7  ;;  %v4675_v20 = vrot.slane %v4671_v34, 6  ;;  %v6194_v38 = vld [vmem:[%s9794_s6 + $0x1e8] sm:$0x10]  ;;  %v4888_v34 = vld [vmem:[#allocation2 + $0x1c] sm:$0x1] }
 0x82c   : > { %4704 = vmatpush.bf16.msrb.mxu0 %v6181_v47  ;;  %v4677_v49 = vrot.slane %v4672_v59, 5  ;;  %4881 = vmatpush.bf16.msrb.mxu3 %v6187_v15  ;;  %v4728_v22 = vunpack.c.l.b16 %v4715_v40  ;;  %v4774_v54 = vpack.c.bf16 %v4770_v17, %v4770_v17  ;;  %v4729_v4 = vunpack.c.l.b16 %v4716_v30  ;;  %v5995_v17 = vld [vmem:[%s9794_s6 + $0x1d8] sm:$0xf]  ;;  %v4890_v30 = vld [vmem:[#allocation2 + $0x5c] sm:$0x1] }
 0x82d   : > { %5906 = vmatmul.msk.bf16.vlgmr.msra.gmra.mxu2 %vm3226_vm11, %v4561_v3  ;;  %5919 = vmatmul.msk.bf16.vlgmr.msra.gmra.mxu3 %vm3226_vm11, %v4620_v23  ;;  %v4674_v50 = vsel %vm3265_vm9, %v4673_v41, %v4669_v27  ;;  %v4730_v31 = vunpack.c.l.b16 %v4717_v58  ;;  %v4731_v51 = vunpack.c.l.b16 %v4718_v62  ;;  %v4775_v32 = vpack.c.bf16 %v4771_v13, %v4771_v13  ;;  %v5982_v3 = vld [vmem:[%s9794_s6 + $0x1c8] sm:$0xf]  ;;  %v6192_v23 = vld [vmem:[%s9794_s6 + $0x1d8] sm:$0x10] }
 0x82e   : > { %v4676_v5 = vsel %vm3268_vm12, %v4675_v20, %v4674_v50  ;;  %v4776_v18 = vpack.c.bf16 %v4772_v0, %v4772_v0  ;;  %v4777_v2 = vpack.c.bf16 %v4773_v6, %v4773_v6  ;;  %4763 = vmatpush.bf16.msrb.mxu1 %v6183_v61  ;;  %v4732_v24 = vrot.slane %v4729_v4, 7  ;;  %v4889_v41 = vld [vmem:[#allocation2 + $0x3c] sm:$0x1]  ;;  %v6189_v50 = vld [vmem:[%s9794_s6 + $0x1c0] sm:$0xff] }
 0x82f   : > { %v4678_v1 = vsel %vm3271_vm0, %v4677_v49, %v4676_v5  ;;  %v4734_v48 = vrot.slane %v4730_v31, 6  ;;  %v4736_v45 = vrot.slane %v4731_v51, 5  ;;  %v4787_v19 = vunpack.c.l.b16 %v4774_v54  ;;  %v4891_v20 = vld [vmem:[#allocation2 + $0x7c] sm:$0x1]  ;;  %v4947_v31 = vld [vmem:[#allocation2 + $0x1d] sm:$0x1] }
 0x830   : > { %v4679_v55 = vpack.c.b16 %v4678_v1, %v4678_v1  ;;  %v4788_v57 = vunpack.c.l.b16 %v4775_v32  ;;  %v4789_v26 = vunpack.c.l.b16 %v4776_v18  ;;  %v4733_v43 = vsel %vm3265_vm9, %v4732_v24, %v4728_v22  ;;  %v4948_v18 = vld [vmem:[#allocation2 + $0x3d] sm:$0x1]  ;;  %v6193_v24 = vld [vmem:[%s9794_s6 + $0x1e0] sm:$0xff] }
 0x831   : > { %v4790_v11 = vunpack.c.l.b16 %v4777_v2  ;;  %v4833_v12 = vpack.c.bf16 %v4829_v25, %v4829_v25  ;;  %v4834_v14 = vpack.c.bf16 %v4830_v16, %v4830_v16  ;;  %v4735_v52 = vsel %vm3268_vm12, %v4734_v48, %v4733_v43  ;;  %v4949_v2 = vld [vmem:[#allocation2 + $0x5d] sm:$0x1] }
 0x832   : > { %5932 = vmatmul.msk.bf16.vlgmr.msrb.gmra.mxu0 %vm3226_vm11, %v4679_v55  ;;  %v4791_v63 = vrot.slane %v4788_v57, 7  ;;  %v4793_v47 = vrot.slane %v4789_v26, 6  ;;  %v4835_v42 = vpack.c.bf16 %v4831_v8, %v4831_v8  ;;  %v4737_v56 = vsel %vm3271_vm0, %v4736_v45, %v4735_v52  ;;  %v4950_v25 = vld [vmem:[#allocation2 + $0x7d] sm:$0x1]  ;;  %v6195_v8 = vld [vmem:[%s9794_s6 + $0x1f0] sm:$0xff] }
 0x833   : > { %v4795_v33 = vrot.slane %v4790_v11, 5  ;;  %v4836_v39 = vpack.c.bf16 %v4832_v60, %v4832_v60  ;;  %v4846_v9 = vunpack.c.l.b16 %v4833_v12  ;;  %v4738_v53 = vpack.c.b16 %v4737_v56, %v4737_v56  ;;  %v5006_v55 = vld [vmem:[#allocation2 + $0x1e] sm:$0x1]  ;;  %v6191_v57 = vld [vmem:[%s9794_s6 + $0x1d0] sm:$0xff] }
 0x834   : > { %v4792_v15 = vsel %vm3265_vm9, %v4791_v63, %v4787_v19  ;;  %v4847_v28 = vunpack.c.l.b16 %v4834_v14  ;;  %v4848_v7 = vunpack.c.l.b16 %v4835_v42  ;;  %v6009_v27 = vor.u32 %v6194_v38, %v6008_v46  ;;  %v5009_v52 = vld [vmem:[#allocation2 + $0x7e] sm:$0x1] }
 0x835   : > { %v4794_v44 = vsel %vm3268_vm12, %v4793_v47, %v4792_v15  ;;  %v4849_v10 = vunpack.c.l.b16 %v4836_v39  ;;  %v5983_v37 = vor.u32 %v6190_v29, %v5982_v3  ;;  %5945 = vmatmul.msk.bf16.vlgmr.msrb.gmra.mxu1 %vm3226_vm11, %v4738_v53  ;;  %v6022_v61 = vor.u32 %v6196_v35, %v6021_v21  ;;  %v5007_v3 = vld [vmem:[#allocation2 + $0x3e] sm:$0x1]  ;;  %v5065_v15 = vld [vmem:[#allocation2 + $0x1f] sm:$0x1] }
 0x836   : > { %v4796_v59 = vsel %vm3271_vm0, %v4795_v33, %v4794_v44  ;;  %v4850_v40 = vrot.slane %v4847_v28, 7  ;;  %v4852_v13 = vrot.slane %v4848_v7, 6  ;;  %v5049_v0 = vand.u32 %v6009_v27, %v9245_v36  ;;  %v5008_v29 = vld [vmem:[#allocation2 + $0x5e] sm:$0x1]  ;;  %v5066_v27 = vld [vmem:[#allocation2 + $0x3f] sm:$0x1] }
 0x837   : > { %v4797_v58 = vpack.c.b16 %v4796_v59, %v4796_v59  ;;  %v4854_v62 = vrot.slane %v4849_v10, 5  ;;  %v4931_v6 = vand.u32 %v5983_v37, %v9245_v36  ;;  %v5108_v22 = vand.u32 %v6022_v61, %v9245_v36  ;;  %v5067_v59 = vld [vmem:[#allocation2 + $0x5f] sm:$0x1] }
 0x838   : > { %v4851_v49 = vsel %vm3265_vm9, %v4850_v40, %v4846_v9  ;;  %v5996_v54 = vor.u32 %v6192_v23, %v5995_v17  ;;  %v4892_v4 = vpack.c.bf16 %v4888_v34, %v4888_v34  ;;  %5057 = vmatpush.bf16.msra.mxu2 %v5049_v0  ;;  %v4893_v5 = vpack.c.bf16 %v4889_v41, %v4889_v41  ;;  %v5068_v40 = vld [vmem:[#allocation2 + $0x7f] sm:$0x1] }
 0x839   : > { %v4853_v51 = vsel %vm3268_vm12, %v4852_v13, %v4851_v49  ;;  %4939 = vmatpush.bf16.msra.mxu0 %v4931_v6  ;;  %v4894_v32 = vpack.c.bf16 %v4890_v30, %v4890_v30  ;;  %5116 = vmatpush.bf16.msra.mxu3 %v5108_v22  ;;  %v4895_v48 = vpack.c.bf16 %v4891_v20, %v4891_v20 }
 0x83a   : > { %v4855_v16 = vsel %vm3271_vm0, %v4854_v62, %v4853_v51  ;;  %v4990_v1 = vand.u32 %v5996_v54, %v9245_v36  ;;  %v4905_v45 = vunpack.c.l.b16 %v4892_v4  ;;  %v4906_v26 = vunpack.c.l.b16 %v4893_v5 }
 0x83b   : > { %v4856_v19 = vpack.c.b16 %v4855_v16, %v4855_v16  ;;  %v4907_v60 = vunpack.c.l.b16 %v4894_v32  ;;  %v4951_v43 = vpack.c.bf16 %v4947_v31, %v4947_v31  ;;  %v4908_v36 = vunpack.c.l.b16 %v4895_v48 }
 0x83c   : > { %4998 = vmatpush.bf16.msra.mxu1 %v4990_v1  ;;  %v4952_v11 = vpack.c.bf16 %v4948_v18, %v4948_v18  ;;  %v4953_v12 = vpack.c.bf16 %v4949_v2, %v4949_v2  ;;  %v4954_v14 = vpack.c.bf16 %v4950_v25, %v4950_v25  ;;  %v4909_v63 = vrot.slane %v4906_v26, 7  ;;  %5058 = vmatpush.bf16.msra.mxu2 %v6193_v24 }
 0x83d   : > { %5958 = vmatmul.msk.bf16.vlgmr.msrb.gmra.mxu2 %vm3226_vm11, %v4797_v58  ;;  %5971 = vmatmul.msk.bf16.vlgmr.msrb.gmra.mxu3 %vm3226_vm11, %v4856_v19  ;;  %v4911_v47 = vrot.slane %v4907_v60, 6  ;;  %v4964_v42 = vunpack.c.l.b16 %v4951_v43  ;;  %v5010_v46 = vpack.c.bf16 %v5006_v55, %v5006_v55  ;;  %v4913_v38 = vrot.slane %v4908_v36, 5 }
 0x83e   : > { %4940 = vmatpush.bf16.msra.mxu0 %v6189_v50  ;;  %5117 = vmatpush.bf16.msra.mxu3 %v6195_v8  ;;  %v4965_v56 = vunpack.c.l.b16 %v4952_v11  ;;  %v4966_v33 = vunpack.c.l.b16 %v4953_v12  ;;  %v4967_v39 = vunpack.c.l.b16 %v4954_v14  ;;  %v4910_v9 = vsel %vm3265_vm9, %v4909_v63, %v4905_v45 }
 0x83f   : > { %v5011_v21 = vpack.c.bf16 %v5007_v3, %v5007_v3  ;;  %v5012_v35 = vpack.c.bf16 %v5008_v29, %v5008_v29  ;;  %v5013_v53 = vpack.c.bf16 %v5009_v52, %v5009_v52  ;;  %v4912_v28 = vsel %vm3268_vm12, %v4911_v47, %v4910_v9 }
 0x840   : > { %4999 = vmatpush.bf16.msra.mxu1 %v6191_v57  ;;  %v4968_v7 = vrot.slane %v4965_v56, 7  ;;  %v4970_v44 = vrot.slane %v4966_v33, 6  ;;  %v4972_v10 = vrot.slane %v4967_v39, 5  ;;  %v4914_v37 = vsel %vm3271_vm0, %v4913_v38, %v4912_v28 }
 0x841   : > { %v5023_v17 = vunpack.c.l.b16 %v5010_v46  ;;  %v5024_v23 = vunpack.c.l.b16 %v5011_v21  ;;  %v5025_v34 = vunpack.c.l.b16 %v5012_v35  ;;  %v4915_v13 = vpack.c.b16 %v4914_v37, %v4914_v37 }
 0x842   : > { %v4969_v61 = vsel %vm3265_vm9, %v4968_v7, %v4964_v42  ;;  %v5026_v41 = vunpack.c.l.b16 %v5013_v53  ;;  %v5069_v30 = vpack.c.bf16 %v5065_v15, %v5065_v15  ;;  %v5070_v6 = vpack.c.bf16 %v5066_v27, %v5066_v27 }
 0x843   : > { %v4971_v58 = vsel %vm3268_vm12, %v4970_v44, %v4969_v61  ;;  %v5027_v62 = vrot.slane %v5024_v23, 7  ;;  %v5029_v0 = vrot.slane %v5025_v34, 6  ;;  %5984 = vmatmul.msk.bf16.vlgmr.msra.gmra.mxu0 %vm3226_vm11, %v4915_v13  ;;  %v5071_v22 = vpack.c.bf16 %v5067_v59, %v5067_v59 }
 0x844   : > { %v4973_v20 = vsel %vm3271_vm0, %v4972_v10, %v4971_v58  ;;  %v5031_v49 = vrot.slane %v5026_v41, 5  ;;  %v5072_v54 = vpack.c.bf16 %v5068_v40, %v5068_v40  ;;  %v5082_v31 = vunpack.c.l.b16 %v5069_v30 }
 0x845   : > { %v4974_v50 = vpack.c.b16 %v4973_v20, %v4973_v20  ;;  %v5028_v4 = vsel %vm3265_vm9, %v5027_v62, %v5023_v17  ;;  %v5083_v51 = vunpack.c.l.b16 %v5070_v6  ;;  %v5084_v32 = vunpack.c.l.b16 %v5071_v22 }
 0x846   : > { %v5030_v5 = vsel %vm3268_vm12, %v5029_v0, %v5028_v4  ;;  %v5085_v18 = vunpack.c.l.b16 %v5072_v54 }
 0x847   : > { %5997 = vmatmul.msk.bf16.vlgmr.msra.gmra.mxu1 %vm3226_vm11, %v4974_v50  ;;  %v5032_v2 = vsel %vm3271_vm0, %v5031_v49, %v5030_v5  ;;  %v5086_v25 = vrot.slane %v5083_v51, 7  ;;  %v5088_v1 = vrot.slane %v5084_v32, 6  ;;  %v5145_v50 = vld [vmem:[%s9796_s8 + $0x38] sm:$0xf] }
 0x848   : > { %v5033_v16 = vpack.c.b16 %v5032_v2, %v5032_v2  ;;  %v5090_v24 = vrot.slane %v5085_v18, 5  ;;  %v5179_v51 = vunpack.c.l.b16 %v5145_v50 }
 0x849   : > { %v5087_v48 = vsel %vm3265_vm9, %v5086_v25, %v5082_v31 }
 0x84a   : > { %v5089_v45 = vsel %vm3268_vm12, %v5088_v1, %v5087_v48  ;;  %v5187_v32 = vpack.c.b16 %v5179_v51, %v5179_v51  ;;  %v6203_v1 = vld [vmem:[%s9796_s8 + $0x30] sm:$0xff] }
 0x84b   : > { %v5091_v8 = vsel %vm3271_vm0, %v5090_v24, %v5089_v45 }
 0x84c   : > { %v5092_v55 = vpack.c.b16 %v5091_v8, %v5091_v8  ;;  %v5200_v18 = vsel %vm3289_vm15, %v5187_v32, 0  ;;  %v6202_v8 = vld [vmem:[%s9796_s8 + $0x28] sm:$0xff] }
 0x84d   : > { %6010 = vmatmul.msk.bf16.vlgmr.msra.gmra.mxu2 %vm3226_vm11, %v5033_v16  ;;  %5202 = vmatpush.bf16.msrb.mxu0 %v5200_v18  ;;  %v6205_v32 = vld [vmem:[%s9798_s10 + $0x8] sm:$0xff]  ;;  %v6204_v18 = vld [vmem:[%s9798_s10] sm:$0xff] }
 0x84e   : > { %6023 = vmatmul.msk.bf16.vlgmr.msra.gmra.mxu3 %vm3226_vm11, %v5092_v55 }
 0x850   : > { %v3305_v19 = vpop.f32.mrf.mxu2  ;;  %v3350_v57 = vpop.f32.mrf.mxu3 }
 0x851   : > { %v3351_v26 = vadd.f32 %v3350_v57, %v3305_v19  ;;  %5203 = vmatpush.bf16.msrb.mxu0 %v6203_v1 }
 0x855   : > { %5204 = vmatpush.bf16.msrb.mxu0 %v6202_v8 }
 0x858   : > { %v3307_v60 = vpop.f32.mrf.mxu2  ;;  %v3352_v43 = vpop.f32.mrf.mxu3 }
 0x859   : > { %v3526_v36 = vpop.f32.mrf.mxu0 }
 0x85c   : > { %v3585_v11 = vpop.f32.mrf.mxu1 }
 0x860   : > { %v3408_v12 = vpop.f32.mrf.mxu2  ;;  %v3467_v3 = vpop.f32.mrf.mxu3 }
 0x861   : > { %v3412_v14 = vadd.f32 %v3408_v12, %v3351_v26  ;;  %v3528_v52 = vpop.f32.mrf.mxu0  ;;  %v6201_v26 = vld [vmem:[%s9796_s8 + $0x20] sm:$0xff] }
 0x862   : > { %5205 = vmatpush.bf16.msrb.mxu0 %v6201_v26 }
 0x863   : > { %v3471_v29 = vadd.f32 %v3467_v3, %v3412_v14 }
 0x864   : > { %v3587_v47 = vpop.f32.mrf.mxu1 }
 0x865   : > { %v3530_v63 = vadd.f32 %v3526_v36, %v3471_v29  ;;  %v6199_v29 = vld [vmem:[%s9796_s8 + $0x10] sm:$0xff] }
 0x867   : > { %v3589_v42 = vadd.f32 %v3585_v11, %v3530_v63  ;;  %v6200_v11 = vld [vmem:[%s9796_s8 + $0x18] sm:$0xff] }
 0x868   : > { %v3410_v46 = vpop.f32.mrf.mxu2  ;;  %v3469_v38 = vpop.f32.mrf.mxu3  ;;  %5206 = vmatpush.bf16.msrb.mxu0 %v6200_v11 }
 0x869   : > { %v6198_v46 = vld [vmem:[%s9796_s8 + $0x8] sm:$0xff] }
 0x86b   : > { %v3762_v56 = vpop.f32.mrf.mxu0 }
 0x86c   : > { %5207 = vmatpush.bf16.msrb.mxu0 %v6199_v29 }
 0x86d   : > { %v3821_v39 = vpop.f32.mrf.mxu1 }
 0x870   : > { %v3644_v33 = vpop.f32.mrf.mxu2  ;;  %v3703_v9 = vpop.f32.mrf.mxu3  ;;  %5208 = vmatpush.bf16.msrb.mxu0 %v6198_v46 }
 0x871   : > { %v3648_v28 = vadd.f32 %v3644_v33, %v3589_v42 }
 0x873   : > { %v3764_v21 = vpop.f32.mrf.mxu0  ;;  %v3707_v10 = vadd.f32 %v3703_v9, %v3648_v28 }
 0x875   : > { %v3823_v53 = vpop.f32.mrf.mxu1  ;;  %v3766_v17 = vadd.f32 %v3762_v56, %v3707_v10 }
 0x877   : > { %v3825_v59 = vadd.f32 %v3821_v39, %v3766_v17  ;;  %v6197_v39 = vld [vmem:[%s9796_s8] sm:$0xff] }
 0x878   : > { %v3646_v35 = vpop.f32.mrf.mxu2  ;;  %v3705_v15 = vpop.f32.mrf.mxu3  ;;  %5209 = vmatpush.bf16.msrb.mxu0 %v6197_v39  ;;  %v6208_v17 = vld [vmem:[%s9798_s10 + $0x20] sm:$0xff] }
 0x879   : > { %v5227_v35 = vld [vmem:[%s9798_s10 + $0x28] sm:$0x3] }
 0x87a   : > { %v5253_v15 = vunpack.c.l.b16 %v5227_v35 }
 0x87b   : > { %v3998_v7 = vpop.f32.mrf.mxu0 }
 0x87f   : > { %v4057_v27 = vpop.f32.mrf.mxu1 }
 0x880   : > { %v3880_v44 = vpop.f32.mrf.mxu2  ;;  %v3939_v37 = vpop.f32.mrf.mxu3 }
 0x881   : > { %v3884_v13 = vadd.f32 %v3880_v44, %v3825_v59 }
 0x883   : > { %v4000_v23 = vpop.f32.mrf.mxu0  ;;  %v3943_v41 = vadd.f32 %v3939_v37, %v3884_v13 }
 0x885   : > { %v4002_v62 = vadd.f32 %v3998_v7, %v3943_v41  ;;  %v5259_v7 = vpack.c.b16 %v5253_v15, %v5253_v15 }
 0x887   : > { %v4059_v40 = vpop.f32.mrf.mxu1  ;;  %v4061_v20 = vadd.f32 %v4057_v27, %v4002_v62  ;;  %v5271_v10 = vsel %vm5269_vm1, %v5259_v7, 0 }
 0x888   : > { %v3882_v34 = vpop.f32.mrf.mxu2  ;;  %v3941_v61 = vpop.f32.mrf.mxu3  ;;  %5275 = vmatpush.bf16.msrb.mxu1 %v5271_v10  ;;  %v6207_v40 = vld [vmem:[%s9798_s10 + $0x18] sm:$0xff] }
 0x88c   : > { %5276 = vmatpush.bf16.msrb.mxu1 %v6208_v17 }
 0x88d   : > { %v4234_v58 = vpop.f32.mrf.mxu0 }
 0x890   : > { %v4116_v30 = vpop.f32.mrf.mxu2  ;;  %v4175_v0 = vpop.f32.mrf.mxu3  ;;  %5277 = vmatpush.bf16.msrb.mxu1 %v6207_v40 }
 0x891   : > { %v4293_v6 = vpop.f32.mrf.mxu1  ;;  %v4120_v54 = vadd.f32 %v4116_v30, %v4061_v20  ;;  %v6206_v30 = vld [vmem:[%s9798_s10 + $0x10] sm:$0xff] }
 0x893   : > { %v4179_v5 = vadd.f32 %v4175_v0, %v4120_v54 }
 0x894   : > { %5278 = vmatpush.bf16.msrb.mxu1 %v6206_v30 }
 0x895   : > { %v4236_v22 = vpop.f32.mrf.mxu0  ;;  %v4238_v25 = vadd.f32 %v4234_v58, %v4179_v5 }
 0x897   : > { %v4297_v45 = vadd.f32 %v4293_v6, %v4238_v25 }
 0x898   : > { %v4118_v49 = vpop.f32.mrf.mxu2  ;;  %v4177_v4 = vpop.f32.mrf.mxu3  ;;  %5279 = vmatpush.bf16.msrb.mxu1 %v6205_v32 }
 0x899   : > { %v4295_v31 = vpop.f32.mrf.mxu1  ;;  %v6452_v49 = vld [vmem:[%s9795_s7] ss:$0 sm:$0xff] }
 0x89c   : > { %5280 = vmatpush.bf16.msrb.mxu1 %v6204_v18 }
 0x89e   : > { %v4470_v16 = vpop.f32.mrf.mxu0 }
 0x8a0   : > { %v4352_v2 = vpop.f32.mrf.mxu2  ;;  %v4411_v24 = vpop.f32.mrf.mxu3 }
 0x8a1   : > { %v4529_v48 = vpop.f32.mrf.mxu1  ;;  %v4356_v55 = vadd.f32 %v4352_v2, %v4297_v45  ;;  %v6453_v2 = vld [vmem:[%s9938_s17] ss:$0 sm:$0xff]  ;;  %s6475_s17 = scalar_lea.hbm %s9941_s26, 8 }
 0x8a2   : > { %v6454_v45 = vld [vmem:[%s9942_s18] ss:$0 sm:$0xff]  ;;  %p6477_p2 = scmp.lt.s32.totalorder %s6475_s17, %s6471_s14 }
 0x8a3   : > { %v4415_v60 = vadd.f32 %v4411_v24, %v4356_v55 }
 0x8a4   : > { %p6478_p3 = por %p6477_p2, %p6476_p1 }
 0x8a5   : > { %v4474_v12 = vadd.f32 %v4470_v16, %v4415_v60 }
 0x8a6   : > { %v4472_v57 = vpop.f32.mrf.mxu0  ;;  %p6479_p4 = pnand %p6478_p3, %p6474_p0 }
 0x8a7   : > { %v4533_v52 = vadd.f32 %v4529_v48, %v4474_v12 }
 0x8a8   : > { %v4354_v19 = vpop.f32.mrf.mxu2  ;;  %v4413_v43 = vpop.f32.mrf.mxu3 }
 0x8a9   : > { %v4531_v36 = vpop.f32.mrf.mxu1 }
 0x8af   : > { %v4706_v3 = vpop.f32.mrf.mxu0 }
 0x8b0   : > { %v4588_v14 = vpop.f32.mrf.mxu2  ;;  %v4647_v63 = vpop.f32.mrf.mxu3 }
 0x8b1   : > { %v4592_v47 = vadd.f32 %v4588_v14, %v4533_v52 }
 0x8b2   : > { %v4765_v42 = vpop.f32.mrf.mxu1 }
 0x8b3   : > { %v4651_v56 = vadd.f32 %v4647_v63, %v4592_v47 }
 0x8b5   : > { %v4710_v21 = vadd.f32 %v4706_v3, %v4651_v56 }
 0x8b7   : > { %v4708_v33 = vpop.f32.mrf.mxu0  ;;  %v4769_v44 = vadd.f32 %v4765_v42, %v4710_v21 }
 0x8b8   : > { %v4590_v38 = vpop.f32.mrf.mxu2  ;;  %v4649_v9 = vpop.f32.mrf.mxu3 }
 0x8ba   : > { %v4767_v53 = vpop.f32.mrf.mxu1 }
 0x8c0   : > { %v4824_v28 = vpop.f32.mrf.mxu2  ;;  %v4883_v37 = vpop.f32.mrf.mxu3 }
 0x8c1   : > { %v4828_v27 = vadd.f32 %v4824_v28, %v4769_v44  ;;  %v4942_v23 = vpop.f32.mrf.mxu0 }
 0x8c3   : > { %v4887_v34 = vadd.f32 %v4883_v37, %v4828_v27 }
 0x8c4   : > { %v5001_v59 = vpop.f32.mrf.mxu1 }
 0x8c5   : > { %v4946_v61 = vadd.f32 %v4942_v23, %v4887_v34 }
 0x8c7   : > { %v5005_v62 = vadd.f32 %v5001_v59, %v4946_v61 }
 0x8c8   : > { %v4826_v13 = vpop.f32.mrf.mxu2  ;;  %v4885_v41 = vpop.f32.mrf.mxu3 }
 0x8c9   : > { %v4944_v58 = vpop.f32.mrf.mxu0 }
 0x8cc   : > { %v5003_v0 = vpop.f32.mrf.mxu1 }
 0x8d0   : > { %v5060_v6 = vpop.f32.mrf.mxu2 }
 0x8d1   : > { %v5064_v20 = vadd.f32 %v5060_v6, %v5005_v62  ;;  %v5119_v22 = vpop.f32.mrf.mxu3 }
 0x8d3   : > { %v5123_v54 = vadd.f32 %v5119_v22, %v5064_v20 }
 0x8d5   : > { %v5128_v50 = vadd.f32 %v6452_v49, %v5123_v54 }
 0x8d7   : > { %v5129_v31 = vmax.f32 %v5128_v50, 0.0 }
 0x8d8   : > { %v5062_v4 = vpop.f32.mrf.mxu2 }
 0x8d9   : > { %v5130_v51 = vpack.c.bf16 %v5129_v31, %v5129_v31  ;;  %v5121_v5 = vpop.f32.mrf.mxu3 }
 0x8db   : > { %6052 = vmatmul.msk.bf16.vlgmr.msrb.gmra.mxu0 %vm1936_vm14, %v5130_v51  ;;  %vm5265_vm14 = vcmask 687104  }
 0x958   : > { %v5211_v25 = vpop.f32.mrf.mxu0 }
 0x959   : > { %v5212_v16 = vadd.f32 %v6453_v2, %v5211_v25 }
 0x95b   : > { %v5215_v1 = vmax.f32 %v5212_v16, 0.0 }
 0x95d   : > { %v5216_v24 = vpack.c.bf16 %v5215_v1, %v5215_v1 }
 0x95f   : > { %6073 = vmatmul.msk.bf16.vlgmr.msrb.gmra.mxu1 %vm5265_vm14, %v5216_v24 }
 0x960   : > { %v5213_v48 = vpop.f32.mrf.mxu0 }
 0x9dc   : > { %v5282_v8 = vpop.f32.mrf.mxu1 }
 0x9dd   : > { %v5283_v55 = vadd.f32 %v6454_v45, %v5282_v8 }
 0x9df   : > { %5286 = vst [vmem:[%s9944_s15] sm:$0xf] %v5283_v55 }
 0x9e0   : > { %6482 = shalt.err (!%p6479_p4)
}
 0x9e1   : > { %6209 = dma.vmem_to_hbm [thread:$0]  (%p6653_p5), %s5301_s28, 64, %s5303_s19, %s5288_s27  }
 0x9e4   : > { %v5284_v19 = vpop.f32.mrf.mxu1 }
 0x9e5 PF: > { %s9946_s16 = sld [smem:[#allocation9_spill]] }
 0x9e6   : > { %s9947_s0 = sld [smem:[#allocation6_spill]] }
 0x9eb   : > { %p6215_p7 = scmp.ge.s32.totalorder %s9946_s16, 2 }
 0x9ec   : > { %s5314_s24 = sand.u32 1, %s9947_s0  }
 0x9ed   : > { %p6212_p8 = pnand %p6215_p7, %p6657_p6  ;;  %s5315_s20 = scalar_lea.sflag [#allocation4], %s5314_s24 }
 0x9ef   : > { %p6213_p9 = pneg %p6212_p8 }
 0x9f1   : > { %6504 = dma.done.wait (%p6213_p9), %s5315_s20, 64  }
 0x9f2   : > { %6506 = vsyncadd (%p6213_p9), %s5315_s20, 4294967232  ;;  %s9949_s24 = sld [smem:[#allocation10_spill]] }
 0x9f3   : > { %s9950_s21 = sld [smem:[#allocation7_spill]] }
 0x9f4   : > { %s9951_s22 = sld [smem:[#allocation8_spill]] }
 0x9f5   : > { %s9952_s23 = sld [smem:[#allocation11_spill]] }
 0x9f8   : > { %p22_p10 = scmp.ge.s32.totalorder %s9949_s24, 4  }
 0x9fa   :  { %24 = sbr.rel (!%p22_p10) target bundleno = 8 (0x8), region = 154 }
 0x9ff   :  { %5321 = vsyncpa [#allocation4], 1 }
 0xa00   :  { %5323 = vsyncpa [#allocation4 + $0x1], 1 }

</bundles_post_ra>
